<compile_context>
chip_gen: v6e
topology: v6e:2x2x1
jax: 0.10.0
libtpu: 0.0.40
codegen_flags: <defaults>
</compile_context>

<pallas_src>
import functools

import jax
import jax.numpy as jnp
import numpy as np
from jax import lax
from jax.experimental import pallas as pl
from jax.experimental.pallas import tpu as pltpu


# ----------------------------------------------------------------------------
# Host-side (init-time) weight packing
# ----------------------------------------------------------------------------

def _conv_row_mats(w, stride, padding, w_in, w_out):
    """Per-vertical-tap (ky) matrices for a PyTorch Conv2d.

    mats[ky] maps one full input row (channels-last, flattened W_in*C_in) to one
    full output row (W_out*C_out).  Horizontal taps, stride and zero padding
    along W are folded in.  w: (C_out, C_in, k, k)."""
    c_out, c_in, k, _ = w.shape
    m = np.zeros((k, w_in * c_in, w_out * c_out), np.float32)
    for ky in range(k):
        for ox in range(w_out):
            for kx in range(k):
                x = stride * ox + kx - padding
                if 0 <= x < w_in:
                    m[ky, x * c_in:(x + 1) * c_in,
                      ox * c_out:(ox + 1) * c_out] = w[:, :, ky, kx].T
    return m


def _convT_row_mats(w, stride, padding, w_in, w_out):
    """Per-vertical-tap (ky) matrices for a PyTorch ConvTranspose2d.

    Input row iy contributes to output row oy = stride*iy - padding + ky
    through mats[ky]; horizontal zero-dilation is folded in, so no dilated
    data is ever materialized.  w: (C_in, C_out, k, k)."""
    c_in, c_out, k, _ = w.shape
    m = np.zeros((k, w_in * c_in, w_out * c_out), np.float32)
    for ky in range(k):
        for ix in range(w_in):
            for kx in range(k):
                ox = stride * ix - padding + kx
                if 0 <= ox < w_out:
                    m[ky, ix * c_in:(ix + 1) * c_in,
                      ox * c_out:(ox + 1) * c_out] = w[:, :, ky, kx]
    return m


def pack_params(params, code_size):
    """One-time host preprocessing: fold conv structure + NHWC layout into
    matmul operands, tile biases to full output rows, cast weights to bf16."""
    g = lambda k: np.asarray(params[k], np.float32)
    bf16, f32 = jnp.bfloat16, jnp.float32

    w1 = _conv_row_mats(g("enc1_w"), 2, 1, 28, 14)     # (3, 28, 224)
    w2 = _conv_row_mats(g("enc2_w"), 2, 1, 14, 7)      # (3, 224, 224)
    w3 = _conv_row_mats(g("enc3_w"), 1, 0, 7, 1)       # (7, 224, 2*cs)  mu|lv
    d1 = _convT_row_mats(g("dec1_w"), 1, 0, 1, 7)      # (7, cs, 224)
    d2 = _convT_row_mats(g("dec2_w"), 2, 1, 7, 14)     # (3, 224, 224)
    m3 = _convT_row_mats(g("dec3_w"), 2, 1, 14, 28)    # (3, 224, 28)

    # dec3 packed: for each dec2 row-pair m, one 112-wide output covers image
    # rows 4m+0..4m+3 (columns [28g : 28g+28] hold row 4m+g):
    #   row 4m+0 = ev2[m]  @ m3[1]
    #   row 4m+1 = ev2[m]  @ m3[2] + od2[m]   @ m3[0]
    #   row 4m+2 = od2[m]  @ m3[1]
    #   row 4m+3 = od2[m]  @ m3[2] + ev2[m+1] @ m3[0]
    d3 = np.zeros((3, 224, 112), np.float32)
    d3[0, :, 0:28] = m3[1]       # ev2[m]   contributions
    d3[0, :, 28:56] = m3[2]
    d3[1, :, 28:56] = m3[0]      # od2[m]   contributions
    d3[1, :, 56:84] = m3[1]
    d3[1, :, 84:112] = m3[2]
    d3[2, :, 84:112] = m3[0]     # ev2[m+1] contributions

    return {
        "w1": jnp.asarray(w1, bf16),
        "b1": jnp.asarray(np.tile(g("enc1_b"), 14)[None, :], f32),
        "w2": jnp.asarray(w2, bf16),
        "b2": jnp.asarray(np.tile(g("enc2_b"), 7)[None, :], f32),
        "w3": jnp.asarray(w3, bf16),
        "b3": jnp.asarray(g("enc3_b")[None, :], f32),
        "d1": jnp.asarray(d1, bf16),
        "db1": jnp.asarray(np.tile(g("dec1_b"), 7)[None, :], f32),
        "d2": jnp.asarray(d2, bf16),
        "db2": jnp.asarray(np.tile(g("dec2_b"), 14)[None, :], f32),
        "d3": jnp.asarray(d3, bf16),
        "db3": jnp.asarray(np.tile(g("dec3_b"), 112)[None, :], f32),
    }


# ----------------------------------------------------------------------------
# The fused whole-network Pallas kernel (one batch tile of TB images per step)
# ----------------------------------------------------------------------------

def _vae_kernel(x_ref, eps_ref,
                w1_ref, b1_ref, w2_ref, b2_ref, w3_ref, b3_ref,
                d1_ref, db1_ref, d2_ref, db2_ref, d3_ref, db3_ref,
                out_ref, mu_z_ref, logvar_ref, *, tb, code_size):
    f32, bf16 = jnp.float32, jnp.bfloat16
    TB, CS = tb, code_size
    M = 7 * TB                      # matmul M: 7 row-phases x TB images

    def mm(a, w):
        # MXU matmul: operands in the (bf16) weight dtype, f32 accumulation.
        return jnp.dot(a.astype(w.dtype), w, preferred_element_type=f32)

    zrow = jnp.zeros((TB, 224), bf16)          # one zero row-tile (pad rows)

    # ------------------------------ encoder --------------------------------
    # enc1: Conv2d(1->16, k3, s2, p1): 28x28x1 -> 14x14x16.
    # x_ref[ky]   = image rows 4m+ky-1  (feed even output rows 2m)
    # x_ref[3+ky] = image rows 4m+ky+1  (feed odd  output rows 2m+1)
    # pre-gathered (with the single zero pad row folded in) on the host.
    x = x_ref[...]                                         # (6, 7, TB, 28) f32
    b1 = b1_ref[...]
    acc_e = jnp.zeros((M, 224), f32)
    acc_o = jnp.zeros((M, 224), f32)
    for ky in range(3):
        w = w1_ref[ky]                                     # (28, 224) bf16
        acc_e = acc_e + mm(x[ky].reshape(M, 28), w)
        acc_o = acc_o + mm(x[3 + ky].reshape(M, 28), w)
    h1e = jnp.maximum(acc_e + b1, 0.0).astype(bf16)        # enc1 rows 0,2,..,12
    h1o = jnp.maximum(acc_o + b1, 0.0).astype(bf16)        # enc1 rows 1,3,..,13

    # enc2: Conv2d(16->32, k3, s2, p1): 14x14x16 -> 7x7x32.
    # Output row oy reads h1 rows 2oy-1 (odd, shifted), 2oy (even), 2oy+1 (odd).
    h1o_prev = jnp.concatenate([zrow, h1o[:6 * TB]], axis=0)
    acc = mm(h1o_prev, w2_ref[0]) + mm(h1e, w2_ref[1]) + mm(h1o, w2_ref[2])
    h2 = jnp.maximum(acc + b2_ref[...], 0.0).astype(bf16)          # (7*TB, 224)

    # enc3: Conv2d(32 -> 2*CS, k7, valid): 7x7x32 -> 1x1 (mu | logvar), merged.
    stat = jnp.zeros((TB, 2 * CS), f32)
    for r in range(7):
        stat = stat + mm(h2[r * TB:(r + 1) * TB], w3_ref[r])
    stat = stat + b3_ref[...]
    mu = stat[:, :CS]
    lv = stat[:, CS:]
    mu_z_ref[...] = mu
    logvar_ref[...] = lv

    # Reparameterization: z = mu + eps * exp(0.5 * logvar).
    z = (mu + eps_ref[...] * jnp.exp(0.5 * lv)).astype(bf16)        # (TB, CS)

    # ------------------------------ decoder --------------------------------
    # dec1: ConvTranspose2d(CS->32, k7) on the 1x1 latent -> 7x7x32.
    db1 = db1_ref[...]
    rows = [jnp.maximum(mm(z, d1_ref[oy]) + db1, 0.0).astype(bf16)
            for oy in range(7)]
    d1 = jnp.concatenate(rows, axis=0)                     # (7*TB, 224), (oy,b)
    d1n = jnp.concatenate(rows[1:] + [zrow], axis=0)       # rows 1..6 then 0

    # dec2: ConvTranspose2d(32->16, k3, s2, p1, op1): 7x7x32 -> 14x14x16.
    # Row parity: out[2m] <- in[m];  out[2m+1] <- in[m], in[m+1].
    db2 = db2_ref[...]
    ev2 = jnp.maximum(mm(d1, d2_ref[1]) + db2, 0.0).astype(bf16)
    od2 = jnp.maximum(mm(d1, d2_ref[2]) + mm(d1n, d2_ref[0]) + db2,
                      0.0).astype(bf16)
    ev2n = jnp.concatenate([ev2[TB:], zrow], axis=0)       # ev2 rows 1..6, 0

    # dec3: ConvTranspose2d(16->1, k3, s2, p1, op1) + Sigmoid -> 28x28x1.
    # Four output-row phases packed into the weight's 112-wide N dimension:
    # one lane-dense store per tile.
    acc3 = mm(ev2, d3_ref[0]) + mm(od2, d3_ref[1]) + mm(ev2n, d3_ref[2])
    out = jax.nn.sigmoid(acc3 + db3_ref[...])              # (7*TB, 112)
    out_ref[...] = out.reshape(7, TB, 112)


# ----------------------------------------------------------------------------
# Wrapper: host-side tap gather, pallas_call with batch grid, output reassembly
# ----------------------------------------------------------------------------

@functools.partial(jax.jit, static_argnames=("tb",))
def vae_forward(packed, x, eps, tb=8):
    """x: (B, 1, 28, 28) NCHW, eps: (B, code_size).  Returns (mu_x, mu_z,
    logvar) with PyTorch-matching shapes, computed by one fused Pallas kernel
    with a grid over batch tiles of TB images."""
    assert tb % 8 == 0, "batch tile must be a multiple of 8 (f32 sublane)"
    B = x.shape[0]
    CS = eps.shape[1]
    b_pad = ((B + tb - 1) // tb) * tb

    # Pad the batch to a multiple of the tile, then pre-gather the enc1 input
    # row-taps (even/odd output-row phases; the single y=-1 pad row is folded
    # in here) so the kernel needs no staging copy and no strided reads.
    x_img = x.reshape(B, 28, 28).astype(jnp.float32)
    if b_pad != B:
        x_img = jnp.concatenate(
            [x_img, jnp.zeros((b_pad - B, 28, 28), jnp.float32)], axis=0)
        eps = jnp.concatenate(
            [eps, jnp.zeros((b_pad - B, CS), eps.dtype)], axis=0)
    xz = jnp.pad(x_img, ((0, 0), (1, 0), (0, 0)))          # image row y -> y+1
    ky = jnp.arange(3)[:, None]
    m = jnp.arange(7)[None, :]
    taps_e = xz[:, 4 * m + ky, :]                          # rows 4m+ky-1
    taps_o = xz[:, 4 * m + ky + 2, :]                      # rows 4m+ky+1
    x_taps = jnp.concatenate([taps_e, taps_o], axis=1)     # (B_pad, 6, 7, 28)
    x_taps = x_taps.transpose(1, 2, 0, 3)                  # (6, 7, B_pad, 28)

    kernel = functools.partial(_vae_kernel, tb=tb, code_size=CS)
    grid = (b_pad // tb,)

    def full(shape):   # whole-array block, constant index -> VMEM-resident
        return pl.BlockSpec(tuple(shape), lambda i: (0,) * len(shape))

    p = packed
    in_specs = [
        pl.BlockSpec((6, 7, tb, 28), lambda i: (0, 0, i, 0)),   # enc1 taps
        pl.BlockSpec((tb, CS), lambda i: (i, 0)),               # eps
        full(p["w1"].shape), full(p["b1"].shape),
        full(p["w2"].shape), full(p["b2"].shape),
        full(p["w3"].shape), full(p["b3"].shape),
        full(p["d1"].shape), full(p["db1"].shape),
        full(p["d2"].shape), full(p["db2"].shape),
        full(p["d3"].shape), full(p["db3"].shape),
    ]
    out_specs = (
        pl.BlockSpec((7, tb, 112), lambda i: (0, i, 0)),        # packed mu_x
        pl.BlockSpec((tb, CS), lambda i: (i, 0)),               # mu_z
        pl.BlockSpec((tb, CS), lambda i: (i, 0)),               # log variance
    )
    out_shape = (
        jax.ShapeDtypeStruct((7, b_pad, 112), jnp.float32),
        jax.ShapeDtypeStruct((b_pad, CS), jnp.float32),
        jax.ShapeDtypeStruct((b_pad, CS), jnp.float32),
    )

    out_packed, mu_z, logvar = pl.pallas_call(
        kernel,
        grid=grid,
        in_specs=in_specs,
        out_specs=out_specs,
        out_shape=out_shape,
        compiler_params=pltpu.CompilerParams(
            dimension_semantics=("parallel",),
            vmem_limit_bytes=32 * 1024 * 1024),
    )(x_taps, eps,
      p["w1"], p["b1"], p["w2"], p["b2"], p["w3"], p["b3"],
      p["d1"], p["db1"], p["d2"], p["db2"], p["d3"], p["db3"])

    # Packed output: out_packed[m, b, 28*g + w] == image[b, 4*m + g, w].
    mu_x = (out_packed.reshape(7, b_pad, 4, 28)
            .transpose(1, 0, 2, 3)
            .reshape(b_pad, 1, 28, 28)[:B])
    return (mu_x,
            mu_z[:B].reshape(B, CS, 1, 1),
            logvar[:B].reshape(B, CS, 1, 1))


# ----------------------------------------------------------------------------
# Parameters (deterministic synthetic init, PyTorch default-style bounds)
# ----------------------------------------------------------------------------

def _conv_init(key, c_out, c_in, k):
    fan_in = c_in * k * k
    bound = 1.0 / (fan_in ** 0.5)
    k1, k2 = jax.random.split(key)
    w = jax.random.uniform(k1, (c_out, c_in, k, k), jnp.float32, -bound, bound)
    b = jax.random.uniform(k2, (c_out,), jnp.float32, -bound, bound)
    return w, b


def _convT_init(key, c_in, c_out, k):
    fan_in = c_out * k * k
    bound = 1.0 / (fan_in ** 0.5)
    k1, k2 = jax.random.split(key)
    w = jax.random.uniform(k1, (c_in, c_out, k, k), jnp.float32, -bound, bound)
    b = jax.random.uniform(k2, (c_out,), jnp.float32, -bound, bound)
    return w, b


def init_params(key, code_size):
    keys = jax.random.split(key, 6)
    p = {}
    p["enc1_w"], p["enc1_b"] = _conv_init(keys[0], 16, 1, 3)
    p["enc2_w"], p["enc2_b"] = _conv_init(keys[1], 32, 16, 3)
    p["enc3_w"], p["enc3_b"] = _conv_init(keys[2], code_size * 2, 32, 7)
    p["dec1_w"], p["dec1_b"] = _convT_init(keys[3], code_size, 32, 7)
    p["dec2_w"], p["dec2_b"] = _convT_init(keys[4], 32, 16, 3)
    p["dec3_w"], p["dec3_b"] = _convT_init(keys[5], 16, 1, 3)
    return p


# ----------------------------------------------------------------------------
# Pure-JAX (XLA) reference of the same forward, for a numerical sanity check
# ----------------------------------------------------------------------------

def _ref_conv(x, w, b, stride, padding):
    out = lax.conv_general_dilated(
        x, w, window_strides=(stride, stride),
        padding=[(padding, padding), (padding, padding)],
        dimension_numbers=("NCHW", "OIHW", "NCHW"),
        precision=lax.Precision.HIGHEST)
    return out + b[None, :, None, None]


def _ref_convT(x, w, b, stride, padding, output_padding):
    k = w.shape[2]
    w_eq = jnp.flip(w, (2, 3)).transpose(1, 0, 2, 3)
    lo = k - 1 - padding
    hi = k - 1 - padding + output_padding
    out = lax.conv_general_dilated(
        x, w_eq, window_strides=(1, 1),
        padding=[(lo, hi), (lo, hi)],
        lhs_dilation=(stride, stride),
        dimension_numbers=("NCHW", "OIHW", "NCHW"),
        precision=lax.Precision.HIGHEST)
    return out + b[None, :, None, None]


def reference_forward(params, x, eps, code_size):
    h = jax.nn.relu(_ref_conv(x, params["enc1_w"], params["enc1_b"], 2, 1))
    h = jax.nn.relu(_ref_conv(h, params["enc2_w"], params["enc2_b"], 2, 1))
    h = _ref_conv(h, params["enc3_w"], params["enc3_b"], 1, 0)
    mu_z, logvar = h[:, :code_size], h[:, code_size:]
    z = mu_z + eps[:, :, None, None] * jnp.exp(0.5 * logvar)
    d = jax.nn.relu(_ref_convT(z, params["dec1_w"], params["dec1_b"], 1, 0, 0))
    d = jax.nn.relu(_ref_convT(d, params["dec2_w"], params["dec2_b"], 2, 1, 1))
    mu_x = jax.nn.sigmoid(_ref_convT(d, params["dec3_w"], params["dec3_b"], 2, 1, 1))
    return mu_x, mu_z, logvar


# ----------------------------------------------------------------------------
# Main
# ----------------------------------------------------------------------------

if __name__ == "__main__":
    code_size = 8
    batch = 2

    key = jax.random.PRNGKey(0)
    pkey, xkey, ekey = jax.random.split(key, 3)

    params = init_params(pkey, code_size)
    packed = pack_params(params, code_size)

    x = jax.random.uniform(xkey, (batch, 1, 28, 28), jnp.float32)   # MNIST-shaped
    eps = jax.random.normal(ekey, (batch, code_size), jnp.float32)  # randn_like(sigma)

    mu_x, mu_z, log_variance_z = vae_forward(packed, x, eps)
    jax.block_until_ready((mu_x, mu_z, log_variance_z))

    # Shape / sanity checks (mirror the AssertShape modules + Sigmoid range).
    assert mu_x.shape == (batch, 1, 28, 28)
    assert mu_z.shape == (batch, code_size, 1, 1)
    assert log_variance_z.shape == (batch, code_size, 1, 1)
    assert bool(jnp.all(jnp.isfinite(mu_x)))
    assert bool(jnp.all((mu_x >= 0.0) & (mu_x <= 1.0)))

    # Numerical check against the pure-JAX reference (bf16 matmul operands /
    # activations in the kernel, f32 accumulation -> loose tolerance).
    r_mu_x, r_mu_z, r_lv = reference_forward(params, x, eps, code_size)
    assert float(jnp.max(jnp.abs(mu_x - r_mu_x))) < 5e-2
    assert float(jnp.max(jnp.abs(mu_z - r_mu_z))) < 8e-2
    assert float(jnp.max(jnp.abs(log_variance_z - r_lv))) < 8e-2

    print("KERNEL_OK")
</pallas_src>

<mosaic_0001>
module attributes {stable_mosaic.version = 11 : i64} {
  func.func @_vae_kernel(%arg0: i32, %arg1: memref<6x7x8x28xf32, #tpu.memory_space<vmem>>, %arg2: memref<8x8xf32, #tpu.memory_space<vmem>>, %arg3: memref<3x28x224xbf16, #tpu.memory_space<vmem>>, %arg4: memref<1x224xf32, #tpu.memory_space<vmem>>, %arg5: memref<3x224x224xbf16, #tpu.memory_space<vmem>>, %arg6: memref<1x224xf32, #tpu.memory_space<vmem>>, %arg7: memref<7x224x16xbf16, #tpu.memory_space<vmem>>, %arg8: memref<1x16xf32, #tpu.memory_space<vmem>>, %arg9: memref<7x8x224xbf16, #tpu.memory_space<vmem>>, %arg10: memref<1x224xf32, #tpu.memory_space<vmem>>, %arg11: memref<3x224x224xbf16, #tpu.memory_space<vmem>>, %arg12: memref<1x224xf32, #tpu.memory_space<vmem>>, %arg13: memref<3x224x112xbf16, #tpu.memory_space<vmem>>, %arg14: memref<1x112xf32, #tpu.memory_space<vmem>>, %arg15: memref<7x8x112xf32, #tpu.memory_space<vmem>>, %arg16: memref<8x8xf32, #tpu.memory_space<vmem>>, %arg17: memref<8x8xf32, #tpu.memory_space<vmem>>) attributes {dimension_semantics = [#tpu.dimension_semantics<parallel>], iteration_bounds = array<i64: 1>, scalar_prefetch = 0 : i64, scratch_operands = 0 : i64, tpu.core_type = #tpu.core_type<tc>, window_params = [{transform_indices = @transform_0, window_bounds = array<i64: 6, 7, 8, 28>}, {transform_indices = @transform_1, window_bounds = array<i64: 8, 8>}, {pipeline_mode = #tpu.pipeline_mode<synchronous>, transform_indices = @transform_2, window_bounds = array<i64: 3, 28, 224>}, {pipeline_mode = #tpu.pipeline_mode<synchronous>, transform_indices = @transform_3, window_bounds = array<i64: 1, 224>}, {pipeline_mode = #tpu.pipeline_mode<synchronous>, transform_indices = @transform_4, window_bounds = array<i64: 3, 224, 224>}, {pipeline_mode = #tpu.pipeline_mode<synchronous>, transform_indices = @transform_5, window_bounds = array<i64: 1, 224>}, {pipeline_mode = #tpu.pipeline_mode<synchronous>, transform_indices = @transform_6, window_bounds = array<i64: 7, 224, 16>}, {pipeline_mode = #tpu.pipeline_mode<synchronous>, transform_indices = @transform_7, window_bounds = array<i64: 1, 16>}, {pipeline_mode = #tpu.pipeline_mode<synchronous>, transform_indices = @transform_8, window_bounds = array<i64: 7, 8, 224>}, {pipeline_mode = #tpu.pipeline_mode<synchronous>, transform_indices = @transform_9, window_bounds = array<i64: 1, 224>}, {pipeline_mode = #tpu.pipeline_mode<synchronous>, transform_indices = @transform_10, window_bounds = array<i64: 3, 224, 224>}, {pipeline_mode = #tpu.pipeline_mode<synchronous>, transform_indices = @transform_11, window_bounds = array<i64: 1, 224>}, {pipeline_mode = #tpu.pipeline_mode<synchronous>, transform_indices = @transform_12, window_bounds = array<i64: 3, 224, 112>}, {pipeline_mode = #tpu.pipeline_mode<synchronous>, transform_indices = @transform_13, window_bounds = array<i64: 1, 112>}, {transform_indices = @transform_14, window_bounds = array<i64: 7, 8, 112>}, {transform_indices = @transform_15, window_bounds = array<i64: 8, 8>}, {transform_indices = @transform_16, window_bounds = array<i64: 8, 8>}]} {
    %cst = arith.constant 0.000000e+00 : bf16
    %0 = vector.broadcast %cst : bf16 to vector<8x224xbf16>
    %c0 = arith.constant 0 : index
    %c0_0 = arith.constant 0 : index
    %c0_1 = arith.constant 0 : index
    %c0_2 = arith.constant 0 : index
    %1 = vector.load %arg1[%c0, %c0_0, %c0_1, %c0_2] : memref<6x7x8x28xf32, #tpu.memory_space<vmem>>, vector<6x7x8x28xf32>
    %c0_3 = arith.constant 0 : index
    %c0_4 = arith.constant 0 : index
    %2 = vector.load %arg4[%c0_3, %c0_4] : memref<1x224xf32, #tpu.memory_space<vmem>>, vector<1x224xf32>
    %cst_5 = arith.constant 0.000000e+00 : f32
    %3 = vector.broadcast %cst_5 : f32 to vector<56x224xf32>
    %cst_6 = arith.constant 0.000000e+00 : f32
    %4 = vector.broadcast %cst_6 : f32 to vector<56x224xf32>
    %c0_7 = arith.constant 0 : index
    %c0_8 = arith.constant 0 : index
    %c0_9 = arith.constant 0 : index
    %5 = vector.load %arg3[%c0_7, %c0_8, %c0_9] : memref<3x28x224xbf16, #tpu.memory_space<vmem>>, vector<1x28x224xbf16>
    %6 = vector.shape_cast %5 : vector<1x28x224xbf16> to vector<28x224xbf16>
    %7 = vector.extract_strided_slice %1 {offsets = [0, 0, 0, 0], sizes = [1, 7, 8, 28], strides = [1, 1, 1, 1]} : vector<6x7x8x28xf32> to vector<1x7x8x28xf32>
    %8 = vector.shape_cast %7 : vector<1x7x8x28xf32> to vector<7x8x28xf32>
    %9 = vector.shape_cast %8 : vector<7x8x28xf32> to vector<56x28xf32>
    %10 = arith.truncf %9 : vector<56x28xf32> to vector<56x28xbf16>
    %cst_10 = arith.constant dense<0.000000e+00> : vector<56x224xf32>
    %11 = tpu.matmul %10, %6, %cst_10 {dimension_numbers = #tpu.dot_dimension_numbers<[1], [0], [0], [1], [0, 0, 1, 1], [], []>} : vector<56x28xbf16>, vector<28x224xbf16>, vector<56x224xf32> -> vector<56x224xf32>
    %12 = arith.addf %3, %11 : vector<56x224xf32>
    %13 = vector.extract_strided_slice %1 {offsets = [3, 0, 0, 0], sizes = [1, 7, 8, 28], strides = [1, 1, 1, 1]} : vector<6x7x8x28xf32> to vector<1x7x8x28xf32>
    %14 = vector.shape_cast %13 : vector<1x7x8x28xf32> to vector<7x8x28xf32>
    %15 = vector.shape_cast %14 : vector<7x8x28xf32> to vector<56x28xf32>
    %16 = arith.truncf %15 : vector<56x28xf32> to vector<56x28xbf16>
    %cst_11 = arith.constant dense<0.000000e+00> : vector<56x224xf32>
    %17 = tpu.matmul %16, %6, %cst_11 {dimension_numbers = #tpu.dot_dimension_numbers<[1], [0], [0], [1], [0, 0, 1, 1], [], []>} : vector<56x28xbf16>, vector<28x224xbf16>, vector<56x224xf32> -> vector<56x224xf32>
    %18 = arith.addf %4, %17 : vector<56x224xf32>
    %c1 = arith.constant 1 : index
    %c0_12 = arith.constant 0 : index
    %c0_13 = arith.constant 0 : index
    %19 = vector.load %arg3[%c1, %c0_12, %c0_13] : memref<3x28x224xbf16, #tpu.memory_space<vmem>>, vector<1x28x224xbf16>
    %20 = vector.shape_cast %19 : vector<1x28x224xbf16> to vector<28x224xbf16>
    %21 = vector.extract_strided_slice %1 {offsets = [1, 0, 0, 0], sizes = [1, 7, 8, 28], strides = [1, 1, 1, 1]} : vector<6x7x8x28xf32> to vector<1x7x8x28xf32>
    %22 = vector.shape_cast %21 : vector<1x7x8x28xf32> to vector<7x8x28xf32>
    %23 = vector.shape_cast %22 : vector<7x8x28xf32> to vector<56x28xf32>
    %24 = arith.truncf %23 : vector<56x28xf32> to vector<56x28xbf16>
    %cst_14 = arith.constant dense<0.000000e+00> : vector<56x224xf32>
    %25 = tpu.matmul %24, %20, %cst_14 {dimension_numbers = #tpu.dot_dimension_numbers<[1], [0], [0], [1], [0, 0, 1, 1], [], []>} : vector<56x28xbf16>, vector<28x224xbf16>, vector<56x224xf32> -> vector<56x224xf32>
    %26 = arith.addf %12, %25 : vector<56x224xf32>
    %27 = vector.extract_strided_slice %1 {offsets = [4, 0, 0, 0], sizes = [1, 7, 8, 28], strides = [1, 1, 1, 1]} : vector<6x7x8x28xf32> to vector<1x7x8x28xf32>
    %28 = vector.shape_cast %27 : vector<1x7x8x28xf32> to vector<7x8x28xf32>
    %29 = vector.shape_cast %28 : vector<7x8x28xf32> to vector<56x28xf32>
    %30 = arith.truncf %29 : vector<56x28xf32> to vector<56x28xbf16>
    %cst_15 = arith.constant dense<0.000000e+00> : vector<56x224xf32>
    %31 = tpu.matmul %30, %20, %cst_15 {dimension_numbers = #tpu.dot_dimension_numbers<[1], [0], [0], [1], [0, 0, 1, 1], [], []>} : vector<56x28xbf16>, vector<28x224xbf16>, vector<56x224xf32> -> vector<56x224xf32>
    %32 = arith.addf %18, %31 : vector<56x224xf32>
    %c2 = arith.constant 2 : index
    %c0_16 = arith.constant 0 : index
    %c0_17 = arith.constant 0 : index
    %33 = vector.load %arg3[%c2, %c0_16, %c0_17] : memref<3x28x224xbf16, #tpu.memory_space<vmem>>, vector<1x28x224xbf16>
    %34 = vector.shape_cast %33 : vector<1x28x224xbf16> to vector<28x224xbf16>
    %35 = vector.extract_strided_slice %1 {offsets = [2, 0, 0, 0], sizes = [1, 7, 8, 28], strides = [1, 1, 1, 1]} : vector<6x7x8x28xf32> to vector<1x7x8x28xf32>
    %36 = vector.shape_cast %35 : vector<1x7x8x28xf32> to vector<7x8x28xf32>
    %37 = vector.shape_cast %36 : vector<7x8x28xf32> to vector<56x28xf32>
    %38 = arith.truncf %37 : vector<56x28xf32> to vector<56x28xbf16>
    %cst_18 = arith.constant dense<0.000000e+00> : vector<56x224xf32>
    %39 = tpu.matmul %38, %34, %cst_18 {dimension_numbers = #tpu.dot_dimension_numbers<[1], [0], [0], [1], [0, 0, 1, 1], [], []>} : vector<56x28xbf16>, vector<28x224xbf16>, vector<56x224xf32> -> vector<56x224xf32>
    %40 = arith.addf %26, %39 : vector<56x224xf32>
    %41 = vector.extract_strided_slice %1 {offsets = [5, 0, 0, 0], sizes = [1, 7, 8, 28], strides = [1, 1, 1, 1]} : vector<6x7x8x28xf32> to vector<1x7x8x28xf32>
    %42 = vector.shape_cast %41 : vector<1x7x8x28xf32> to vector<7x8x28xf32>
    %43 = vector.shape_cast %42 : vector<7x8x28xf32> to vector<56x28xf32>
    %44 = arith.truncf %43 : vector<56x28xf32> to vector<56x28xbf16>
    %cst_19 = arith.constant dense<0.000000e+00> : vector<56x224xf32>
    %45 = tpu.matmul %44, %34, %cst_19 {dimension_numbers = #tpu.dot_dimension_numbers<[1], [0], [0], [1], [0, 0, 1, 1], [], []>} : vector<56x28xbf16>, vector<28x224xbf16>, vector<56x224xf32> -> vector<56x224xf32>
    %46 = arith.addf %32, %45 : vector<56x224xf32>
    %47 = vector.broadcast %2 : vector<1x224xf32> to vector<56x224xf32>
    %48 = arith.addf %40, %47 : vector<56x224xf32>
    %cst_20 = arith.constant 0.000000e+00 : f32
    %49 = vector.broadcast %cst_20 : f32 to vector<56x224xf32>
    %50 = arith.maximumf %48, %49 : vector<56x224xf32>
    %51 = arith.truncf %50 : vector<56x224xf32> to vector<56x224xbf16>
    %52 = vector.broadcast %2 : vector<1x224xf32> to vector<56x224xf32>
    %53 = arith.addf %46, %52 : vector<56x224xf32>
    %cst_21 = arith.constant 0.000000e+00 : f32
    %54 = vector.broadcast %cst_21 : f32 to vector<56x224xf32>
    %55 = arith.maximumf %53, %54 : vector<56x224xf32>
    %56 = arith.truncf %55 : vector<56x224xf32> to vector<56x224xbf16>
    %57 = vector.extract_strided_slice %56 {offsets = [0, 0], sizes = [48, 224], strides = [1, 1]} : vector<56x224xbf16> to vector<48x224xbf16>
    %58 = tpu.concatenate %0, %57 in 0 : vector<8x224xbf16>, vector<48x224xbf16> -> vector<56x224xbf16>
    %c0_22 = arith.constant 0 : index
    %c0_23 = arith.constant 0 : index
    %c0_24 = arith.constant 0 : index
    %59 = vector.load %arg5[%c0_22, %c0_23, %c0_24] : memref<3x224x224xbf16, #tpu.memory_space<vmem>>, vector<1x224x224xbf16>
    %60 = vector.shape_cast %59 : vector<1x224x224xbf16> to vector<224x224xbf16>
    %cst_25 = arith.constant dense<0.000000e+00> : vector<56x224xf32>
    %61 = tpu.matmul %58, %60, %cst_25 {dimension_numbers = #tpu.dot_dimension_numbers<[1], [0], [0], [1], [0, 0, 1, 1], [], []>} : vector<56x224xbf16>, vector<224x224xbf16>, vector<56x224xf32> -> vector<56x224xf32>
    %c1_26 = arith.constant 1 : index
    %c0_27 = arith.constant 0 : index
    %c0_28 = arith.constant 0 : index
    %62 = vector.load %arg5[%c1_26, %c0_27, %c0_28] : memref<3x224x224xbf16, #tpu.memory_space<vmem>>, vector<1x224x224xbf16>
    %63 = vector.shape_cast %62 : vector<1x224x224xbf16> to vector<224x224xbf16>
    %cst_29 = arith.constant dense<0.000000e+00> : vector<56x224xf32>
    %64 = tpu.matmul %51, %63, %cst_29 {dimension_numbers = #tpu.dot_dimension_numbers<[1], [0], [0], [1], [0, 0, 1, 1], [], []>} : vector<56x224xbf16>, vector<224x224xbf16>, vector<56x224xf32> -> vector<56x224xf32>
    %65 = arith.addf %61, %64 : vector<56x224xf32>
    %c2_30 = arith.constant 2 : index
    %c0_31 = arith.constant 0 : index
    %c0_32 = arith.constant 0 : index
    %66 = vector.load %arg5[%c2_30, %c0_31, %c0_32] : memref<3x224x224xbf16, #tpu.memory_space<vmem>>, vector<1x224x224xbf16>
    %67 = vector.shape_cast %66 : vector<1x224x224xbf16> to vector<224x224xbf16>
    %cst_33 = arith.constant dense<0.000000e+00> : vector<56x224xf32>
    %68 = tpu.matmul %56, %67, %cst_33 {dimension_numbers = #tpu.dot_dimension_numbers<[1], [0], [0], [1], [0, 0, 1, 1], [], []>} : vector<56x224xbf16>, vector<224x224xbf16>, vector<56x224xf32> -> vector<56x224xf32>
    %69 = arith.addf %65, %68 : vector<56x224xf32>
    %c0_34 = arith.constant 0 : index
    %c0_35 = arith.constant 0 : index
    %70 = vector.load %arg6[%c0_34, %c0_35] : memref<1x224xf32, #tpu.memory_space<vmem>>, vector<1x224xf32>
    %71 = vector.broadcast %70 : vector<1x224xf32> to vector<56x224xf32>
    %72 = arith.addf %69, %71 : vector<56x224xf32>
    %cst_36 = arith.constant 0.000000e+00 : f32
    %73 = vector.broadcast %cst_36 : f32 to vector<56x224xf32>
    %74 = arith.maximumf %72, %73 : vector<56x224xf32>
    %75 = arith.truncf %74 : vector<56x224xf32> to vector<56x224xbf16>
    %cst_37 = arith.constant 0.000000e+00 : f32
    %76 = vector.broadcast %cst_37 : f32 to vector<8x16xf32>
    %77 = vector.extract_strided_slice %75 {offsets = [0, 0], sizes = [8, 224], strides = [1, 1]} : vector<56x224xbf16> to vector<8x224xbf16>
    %c0_38 = arith.constant 0 : index
    %c0_39 = arith.constant 0 : index
    %c0_40 = arith.constant 0 : index
    %78 = vector.load %arg7[%c0_38, %c0_39, %c0_40] : memref<7x224x16xbf16, #tpu.memory_space<vmem>>, vector<1x224x16xbf16>
    %79 = vector.shape_cast %78 : vector<1x224x16xbf16> to vector<224x16xbf16>
    %cst_41 = arith.constant dense<0.000000e+00> : vector<8x16xf32>
    %80 = tpu.matmul %77, %79, %cst_41 {dimension_numbers = #tpu.dot_dimension_numbers<[1], [0], [0], [1], [0, 0, 1, 1], [], []>} : vector<8x224xbf16>, vector<224x16xbf16>, vector<8x16xf32> -> vector<8x16xf32>
    %81 = arith.addf %76, %80 : vector<8x16xf32>
    %82 = vector.extract_strided_slice %75 {offsets = [8, 0], sizes = [8, 224], strides = [1, 1]} : vector<56x224xbf16> to vector<8x224xbf16>
    %c1_42 = arith.constant 1 : index
    %c0_43 = arith.constant 0 : index
    %c0_44 = arith.constant 0 : index
    %83 = vector.load %arg7[%c1_42, %c0_43, %c0_44] : memref<7x224x16xbf16, #tpu.memory_space<vmem>>, vector<1x224x16xbf16>
    %84 = vector.shape_cast %83 : vector<1x224x16xbf16> to vector<224x16xbf16>
    %cst_45 = arith.constant dense<0.000000e+00> : vector<8x16xf32>
    %85 = tpu.matmul %82, %84, %cst_45 {dimension_numbers = #tpu.dot_dimension_numbers<[1], [0], [0], [1], [0, 0, 1, 1], [], []>} : vector<8x224xbf16>, vector<224x16xbf16>, vector<8x16xf32> -> vector<8x16xf32>
    %86 = arith.addf %81, %85 : vector<8x16xf32>
    %87 = vector.extract_strided_slice %75 {offsets = [16, 0], sizes = [8, 224], strides = [1, 1]} : vector<56x224xbf16> to vector<8x224xbf16>
    %c2_46 = arith.constant 2 : index
    %c0_47 = arith.constant 0 : index
    %c0_48 = arith.constant 0 : index
    %88 = vector.load %arg7[%c2_46, %c0_47, %c0_48] : memref<7x224x16xbf16, #tpu.memory_space<vmem>>, vector<1x224x16xbf16>
    %89 = vector.shape_cast %88 : vector<1x224x16xbf16> to vector<224x16xbf16>
    %cst_49 = arith.constant dense<0.000000e+00> : vector<8x16xf32>
    %90 = tpu.matmul %87, %89, %cst_49 {dimension_numbers = #tpu.dot_dimension_numbers<[1], [0], [0], [1], [0, 0, 1, 1], [], []>} : vector<8x224xbf16>, vector<224x16xbf16>, vector<8x16xf32> -> vector<8x16xf32>
    %91 = arith.addf %86, %90 : vector<8x16xf32>
    %92 = vector.extract_strided_slice %75 {offsets = [24, 0], sizes = [8, 224], strides = [1, 1]} : vector<56x224xbf16> to vector<8x224xbf16>
    %c3 = arith.constant 3 : index
    %c0_50 = arith.constant 0 : index
    %c0_51 = arith.constant 0 : index
    %93 = vector.load %arg7[%c3, %c0_50, %c0_51] : memref<7x224x16xbf16, #tpu.memory_space<vmem>>, vector<1x224x16xbf16>
    %94 = vector.shape_cast %93 : vector<1x224x16xbf16> to vector<224x16xbf16>
    %cst_52 = arith.constant dense<0.000000e+00> : vector<8x16xf32>
    %95 = tpu.matmul %92, %94, %cst_52 {dimension_numbers = #tpu.dot_dimension_numbers<[1], [0], [0], [1], [0, 0, 1, 1], [], []>} : vector<8x224xbf16>, vector<224x16xbf16>, vector<8x16xf32> -> vector<8x16xf32>
    %96 = arith.addf %91, %95 : vector<8x16xf32>
    %97 = vector.extract_strided_slice %75 {offsets = [32, 0], sizes = [8, 224], strides = [1, 1]} : vector<56x224xbf16> to vector<8x224xbf16>
    %c4 = arith.constant 4 : index
    %c0_53 = arith.constant 0 : index
    %c0_54 = arith.constant 0 : index
    %98 = vector.load %arg7[%c4, %c0_53, %c0_54] : memref<7x224x16xbf16, #tpu.memory_space<vmem>>, vector<1x224x16xbf16>
    %99 = vector.shape_cast %98 : vector<1x224x16xbf16> to vector<224x16xbf16>
    %cst_55 = arith.constant dense<0.000000e+00> : vector<8x16xf32>
    %100 = tpu.matmul %97, %99, %cst_55 {dimension_numbers = #tpu.dot_dimension_numbers<[1], [0], [0], [1], [0, 0, 1, 1], [], []>} : vector<8x224xbf16>, vector<224x16xbf16>, vector<8x16xf32> -> vector<8x16xf32>
    %101 = arith.addf %96, %100 : vector<8x16xf32>
    %102 = vector.extract_strided_slice %75 {offsets = [40, 0], sizes = [8, 224], strides = [1, 1]} : vector<56x224xbf16> to vector<8x224xbf16>
    %c5 = arith.constant 5 : index
    %c0_56 = arith.constant 0 : index
    %c0_57 = arith.constant 0 : index
    %103 = vector.load %arg7[%c5, %c0_56, %c0_57] : memref<7x224x16xbf16, #tpu.memory_space<vmem>>, vector<1x224x16xbf16>
    %104 = vector.shape_cast %103 : vector<1x224x16xbf16> to vector<224x16xbf16>
    %cst_58 = arith.constant dense<0.000000e+00> : vector<8x16xf32>
    %105 = tpu.matmul %102, %104, %cst_58 {dimension_numbers = #tpu.dot_dimension_numbers<[1], [0], [0], [1], [0, 0, 1, 1], [], []>} : vector<8x224xbf16>, vector<224x16xbf16>, vector<8x16xf32> -> vector<8x16xf32>
    %106 = arith.addf %101, %105 : vector<8x16xf32>
    %107 = vector.extract_strided_slice %75 {offsets = [48, 0], sizes = [8, 224], strides = [1, 1]} : vector<56x224xbf16> to vector<8x224xbf16>
    %c6 = arith.constant 6 : index
    %c0_59 = arith.constant 0 : index
    %c0_60 = arith.constant 0 : index
    %108 = vector.load %arg7[%c6, %c0_59, %c0_60] : memref<7x224x16xbf16, #tpu.memory_space<vmem>>, vector<1x224x16xbf16>
    %109 = vector.shape_cast %108 : vector<1x224x16xbf16> to vector<224x16xbf16>
    %cst_61 = arith.constant dense<0.000000e+00> : vector<8x16xf32>
    %110 = tpu.matmul %107, %109, %cst_61 {dimension_numbers = #tpu.dot_dimension_numbers<[1], [0], [0], [1], [0, 0, 1, 1], [], []>} : vector<8x224xbf16>, vector<224x16xbf16>, vector<8x16xf32> -> vector<8x16xf32>
    %111 = arith.addf %106, %110 : vector<8x16xf32>
    %c0_62 = arith.constant 0 : index
    %c0_63 = arith.constant 0 : index
    %112 = vector.load %arg8[%c0_62, %c0_63] : memref<1x16xf32, #tpu.memory_space<vmem>>, vector<1x16xf32>
    %113 = vector.broadcast %112 : vector<1x16xf32> to vector<8x16xf32>
    %114 = arith.addf %111, %113 : vector<8x16xf32>
    %115 = vector.extract_strided_slice %114 {offsets = [0, 0], sizes = [8, 8], strides = [1, 1]} : vector<8x16xf32> to vector<8x8xf32>
    %116 = vector.extract_strided_slice %114 {offsets = [0, 8], sizes = [8, 8], strides = [1, 1]} : vector<8x16xf32> to vector<8x8xf32>
    %c0_64 = arith.constant 0 : index
    %c0_65 = arith.constant 0 : index
    %117 = vector.load %arg16[%c0_64, %c0_65] : memref<8x8xf32, #tpu.memory_space<vmem>>, vector<8x8xf32>
    tpu.vector_store %arg16[%c0_64, %c0_65], %115 {strides = array<i32>} : memref<8x8xf32, #tpu.memory_space<vmem>>, vector<8x8xf32>,
    %c0_66 = arith.constant 0 : index
    %c0_67 = arith.constant 0 : index
    %118 = vector.load %arg17[%c0_66, %c0_67] : memref<8x8xf32, #tpu.memory_space<vmem>>, vector<8x8xf32>
    tpu.vector_store %arg17[%c0_66, %c0_67], %116 {strides = array<i32>} : memref<8x8xf32, #tpu.memory_space<vmem>>, vector<8x8xf32>,
    %c0_68 = arith.constant 0 : index
    %c0_69 = arith.constant 0 : index
    %119 = vector.load %arg2[%c0_68, %c0_69] : memref<8x8xf32, #tpu.memory_space<vmem>>, vector<8x8xf32>
    %cst_70 = arith.constant 5.000000e-01 : f32
    %120 = vector.broadcast %cst_70 : f32 to vector<8x8xf32>
    %121 = arith.mulf %120, %116 : vector<8x8xf32>
    %122 = math.exp %121 : vector<8x8xf32>
    %123 = arith.mulf %119, %122 : vector<8x8xf32>
    %124 = arith.addf %115, %123 : vector<8x8xf32>
    %125 = arith.truncf %124 : vector<8x8xf32> to vector<8x8xbf16>
    %c0_71 = arith.constant 0 : index
    %c0_72 = arith.constant 0 : index
    %126 = vector.load %arg10[%c0_71, %c0_72] : memref<1x224xf32, #tpu.memory_space<vmem>>, vector<1x224xf32>
    %c0_73 = arith.constant 0 : index
    %c0_74 = arith.constant 0 : index
    %c0_75 = arith.constant 0 : index
    %127 = vector.load %arg9[%c0_73, %c0_74, %c0_75] : memref<7x8x224xbf16, #tpu.memory_space<vmem>>, vector<1x8x224xbf16>
    %128 = vector.shape_cast %127 : vector<1x8x224xbf16> to vector<8x224xbf16>
    %cst_76 = arith.constant dense<0.000000e+00> : vector<8x224xf32>
    %129 = tpu.matmul %125, %128, %cst_76 {dimension_numbers = #tpu.dot_dimension_numbers<[1], [0], [0], [1], [0, 0, 1, 1], [], []>} : vector<8x8xbf16>, vector<8x224xbf16>, vector<8x224xf32> -> vector<8x224xf32>
    %130 = vector.broadcast %126 : vector<1x224xf32> to vector<8x224xf32>
    %131 = arith.addf %129, %130 : vector<8x224xf32>
    %cst_77 = arith.constant 0.000000e+00 : f32
    %132 = vector.broadcast %cst_77 : f32 to vector<8x224xf32>
    %133 = arith.maximumf %131, %132 : vector<8x224xf32>
    %134 = arith.truncf %133 : vector<8x224xf32> to vector<8x224xbf16>
    %c1_78 = arith.constant 1 : index
    %c0_79 = arith.constant 0 : index
    %c0_80 = arith.constant 0 : index
    %135 = vector.load %arg9[%c1_78, %c0_79, %c0_80] : memref<7x8x224xbf16, #tpu.memory_space<vmem>>, vector<1x8x224xbf16>
    %136 = vector.shape_cast %135 : vector<1x8x224xbf16> to vector<8x224xbf16>
    %cst_81 = arith.constant dense<0.000000e+00> : vector<8x224xf32>
    %137 = tpu.matmul %125, %136, %cst_81 {dimension_numbers = #tpu.dot_dimension_numbers<[1], [0], [0], [1], [0, 0, 1, 1], [], []>} : vector<8x8xbf16>, vector<8x224xbf16>, vector<8x224xf32> -> vector<8x224xf32>
    %138 = vector.broadcast %126 : vector<1x224xf32> to vector<8x224xf32>
    %139 = arith.addf %137, %138 : vector<8x224xf32>
    %cst_82 = arith.constant 0.000000e+00 : f32
    %140 = vector.broadcast %cst_82 : f32 to vector<8x224xf32>
    %141 = arith.maximumf %139, %140 : vector<8x224xf32>
    %142 = arith.truncf %141 : vector<8x224xf32> to vector<8x224xbf16>
    %c2_83 = arith.constant 2 : index
    %c0_84 = arith.constant 0 : index
    %c0_85 = arith.constant 0 : index
    %143 = vector.load %arg9[%c2_83, %c0_84, %c0_85] : memref<7x8x224xbf16, #tpu.memory_space<vmem>>, vector<1x8x224xbf16>
    %144 = vector.shape_cast %143 : vector<1x8x224xbf16> to vector<8x224xbf16>
    %cst_86 = arith.constant dense<0.000000e+00> : vector<8x224xf32>
    %145 = tpu.matmul %125, %144, %cst_86 {dimension_numbers = #tpu.dot_dimension_numbers<[1], [0], [0], [1], [0, 0, 1, 1], [], []>} : vector<8x8xbf16>, vector<8x224xbf16>, vector<8x224xf32> -> vector<8x224xf32>
    %146 = vector.broadcast %126 : vector<1x224xf32> to vector<8x224xf32>
    %147 = arith.addf %145, %146 : vector<8x224xf32>
    %cst_87 = arith.constant 0.000000e+00 : f32
    %148 = vector.broadcast %cst_87 : f32 to vector<8x224xf32>
    %149 = arith.maximumf %147, %148 : vector<8x224xf32>
    %150 = arith.truncf %149 : vector<8x224xf32> to vector<8x224xbf16>
    %c3_88 = arith.constant 3 : index
    %c0_89 = arith.constant 0 : index
    %c0_90 = arith.constant 0 : index
    %151 = vector.load %arg9[%c3_88, %c0_89, %c0_90] : memref<7x8x224xbf16, #tpu.memory_space<vmem>>, vector<1x8x224xbf16>
    %152 = vector.shape_cast %151 : vector<1x8x224xbf16> to vector<8x224xbf16>
    %cst_91 = arith.constant dense<0.000000e+00> : vector<8x224xf32>
    %153 = tpu.matmul %125, %152, %cst_91 {dimension_numbers = #tpu.dot_dimension_numbers<[1], [0], [0], [1], [0, 0, 1, 1], [], []>} : vector<8x8xbf16>, vector<8x224xbf16>, vector<8x224xf32> -> vector<8x224xf32>
    %154 = vector.broadcast %126 : vector<1x224xf32> to vector<8x224xf32>
    %155 = arith.addf %153, %154 : vector<8x224xf32>
    %cst_92 = arith.constant 0.000000e+00 : f32
    %156 = vector.broadcast %cst_92 : f32 to vector<8x224xf32>
    %157 = arith.maximumf %155, %156 : vector<8x224xf32>
    %158 = arith.truncf %157 : vector<8x224xf32> to vector<8x224xbf16>
    %c4_93 = arith.constant 4 : index
    %c0_94 = arith.constant 0 : index
    %c0_95 = arith.constant 0 : index
    %159 = vector.load %arg9[%c4_93, %c0_94, %c0_95] : memref<7x8x224xbf16, #tpu.memory_space<vmem>>, vector<1x8x224xbf16>
    %160 = vector.shape_cast %159 : vector<1x8x224xbf16> to vector<8x224xbf16>
    %cst_96 = arith.constant dense<0.000000e+00> : vector<8x224xf32>
    %161 = tpu.matmul %125, %160, %cst_96 {dimension_numbers = #tpu.dot_dimension_numbers<[1], [0], [0], [1], [0, 0, 1, 1], [], []>} : vector<8x8xbf16>, vector<8x224xbf16>, vector<8x224xf32> -> vector<8x224xf32>
    %162 = vector.broadcast %126 : vector<1x224xf32> to vector<8x224xf32>
    %163 = arith.addf %161, %162 : vector<8x224xf32>
    %cst_97 = arith.constant 0.000000e+00 : f32
    %164 = vector.broadcast %cst_97 : f32 to vector<8x224xf32>
    %165 = arith.maximumf %163, %164 : vector<8x224xf32>
    %166 = arith.truncf %165 : vector<8x224xf32> to vector<8x224xbf16>
    %c5_98 = arith.constant 5 : index
    %c0_99 = arith.constant 0 : index
    %c0_100 = arith.constant 0 : index
    %167 = vector.load %arg9[%c5_98, %c0_99, %c0_100] : memref<7x8x224xbf16, #tpu.memory_space<vmem>>, vector<1x8x224xbf16>
    %168 = vector.shape_cast %167 : vector<1x8x224xbf16> to vector<8x224xbf16>
    %cst_101 = arith.constant dense<0.000000e+00> : vector<8x224xf32>
    %169 = tpu.matmul %125, %168, %cst_101 {dimension_numbers = #tpu.dot_dimension_numbers<[1], [0], [0], [1], [0, 0, 1, 1], [], []>} : vector<8x8xbf16>, vector<8x224xbf16>, vector<8x224xf32> -> vector<8x224xf32>
    %170 = vector.broadcast %126 : vector<1x224xf32> to vector<8x224xf32>
    %171 = arith.addf %169, %170 : vector<8x224xf32>
    %cst_102 = arith.constant 0.000000e+00 : f32
    %172 = vector.broadcast %cst_102 : f32 to vector<8x224xf32>
    %173 = arith.maximumf %171, %172 : vector<8x224xf32>
    %174 = arith.truncf %173 : vector<8x224xf32> to vector<8x224xbf16>
    %c6_103 = arith.constant 6 : index
    %c0_104 = arith.constant 0 : index
    %c0_105 = arith.constant 0 : index
    %175 = vector.load %arg9[%c6_103, %c0_104, %c0_105] : memref<7x8x224xbf16, #tpu.memory_space<vmem>>, vector<1x8x224xbf16>
    %176 = vector.shape_cast %175 : vector<1x8x224xbf16> to vector<8x224xbf16>
    %cst_106 = arith.constant dense<0.000000e+00> : vector<8x224xf32>
    %177 = tpu.matmul %125, %176, %cst_106 {dimension_numbers = #tpu.dot_dimension_numbers<[1], [0], [0], [1], [0, 0, 1, 1], [], []>} : vector<8x8xbf16>, vector<8x224xbf16>, vector<8x224xf32> -> vector<8x224xf32>
    %178 = vector.broadcast %126 : vector<1x224xf32> to vector<8x224xf32>
    %179 = arith.addf %177, %178 : vector<8x224xf32>
    %cst_107 = arith.constant 0.000000e+00 : f32
    %180 = vector.broadcast %cst_107 : f32 to vector<8x224xf32>
    %181 = arith.maximumf %179, %180 : vector<8x224xf32>
    %182 = arith.truncf %181 : vector<8x224xf32> to vector<8x224xbf16>
    %183 = tpu.concatenate %134, %142, %150, %158, %166, %174, %182 in 0 : vector<8x224xbf16>, vector<8x224xbf16>, vector<8x224xbf16>, vector<8x224xbf16>, vector<8x224xbf16>, vector<8x224xbf16>, vector<8x224xbf16> -> vector<56x224xbf16>
    %184 = tpu.concatenate %142, %150, %158, %166, %174, %182, %0 in 0 : vector<8x224xbf16>, vector<8x224xbf16>, vector<8x224xbf16>, vector<8x224xbf16>, vector<8x224xbf16>, vector<8x224xbf16>, vector<8x224xbf16> -> vector<56x224xbf16>
    %c0_108 = arith.constant 0 : index
    %c0_109 = arith.constant 0 : index
    %185 = vector.load %arg12[%c0_108, %c0_109] : memref<1x224xf32, #tpu.memory_space<vmem>>, vector<1x224xf32>
    %c1_110 = arith.constant 1 : index
    %c0_111 = arith.constant 0 : index
    %c0_112 = arith.constant 0 : index
    %186 = vector.load %arg11[%c1_110, %c0_111, %c0_112] : memref<3x224x224xbf16, #tpu.memory_space<vmem>>, vector<1x224x224xbf16>
    %187 = vector.shape_cast %186 : vector<1x224x224xbf16> to vector<224x224xbf16>
    %cst_113 = arith.constant dense<0.000000e+00> : vector<56x224xf32>
    %188 = tpu.matmul %183, %187, %cst_113 {dimension_numbers = #tpu.dot_dimension_numbers<[1], [0], [0], [1], [0, 0, 1, 1], [], []>} : vector<56x224xbf16>, vector<224x224xbf16>, vector<56x224xf32> -> vector<56x224xf32>
    %189 = vector.broadcast %185 : vector<1x224xf32> to vector<56x224xf32>
    %190 = arith.addf %188, %189 : vector<56x224xf32>
    %cst_114 = arith.constant 0.000000e+00 : f32
    %191 = vector.broadcast %cst_114 : f32 to vector<56x224xf32>
    %192 = arith.maximumf %190, %191 : vector<56x224xf32>
    %193 = arith.truncf %192 : vector<56x224xf32> to vector<56x224xbf16>
    %c2_115 = arith.constant 2 : index
    %c0_116 = arith.constant 0 : index
    %c0_117 = arith.constant 0 : index
    %194 = vector.load %arg11[%c2_115, %c0_116, %c0_117] : memref<3x224x224xbf16, #tpu.memory_space<vmem>>, vector<1x224x224xbf16>
    %195 = vector.shape_cast %194 : vector<1x224x224xbf16> to vector<224x224xbf16>
    %cst_118 = arith.constant dense<0.000000e+00> : vector<56x224xf32>
    %196 = tpu.matmul %183, %195, %cst_118 {dimension_numbers = #tpu.dot_dimension_numbers<[1], [0], [0], [1], [0, 0, 1, 1], [], []>} : vector<56x224xbf16>, vector<224x224xbf16>, vector<56x224xf32> -> vector<56x224xf32>
    %c0_119 = arith.constant 0 : index
    %c0_120 = arith.constant 0 : index
    %c0_121 = arith.constant 0 : index
    %197 = vector.load %arg11[%c0_119, %c0_120, %c0_121] : memref<3x224x224xbf16, #tpu.memory_space<vmem>>, vector<1x224x224xbf16>
    %198 = vector.shape_cast %197 : vector<1x224x224xbf16> to vector<224x224xbf16>
    %cst_122 = arith.constant dense<0.000000e+00> : vector<56x224xf32>
    %199 = tpu.matmul %184, %198, %cst_122 {dimension_numbers = #tpu.dot_dimension_numbers<[1], [0], [0], [1], [0, 0, 1, 1], [], []>} : vector<56x224xbf16>, vector<224x224xbf16>, vector<56x224xf32> -> vector<56x224xf32>
    %200 = arith.addf %196, %199 : vector<56x224xf32>
    %201 = vector.broadcast %185 : vector<1x224xf32> to vector<56x224xf32>
    %202 = arith.addf %200, %201 : vector<56x224xf32>
    %cst_123 = arith.constant 0.000000e+00 : f32
    %203 = vector.broadcast %cst_123 : f32 to vector<56x224xf32>
    %204 = arith.maximumf %202, %203 : vector<56x224xf32>
    %205 = arith.truncf %204 : vector<56x224xf32> to vector<56x224xbf16>
    %206 = vector.extract_strided_slice %193 {offsets = [8, 0], sizes = [48, 224], strides = [1, 1]} : vector<56x224xbf16> to vector<48x224xbf16>
    %207 = tpu.concatenate %206, %0 in 0 : vector<48x224xbf16>, vector<8x224xbf16> -> vector<56x224xbf16>
    %c0_124 = arith.constant 0 : index
    %c0_125 = arith.constant 0 : index
    %c0_126 = arith.constant 0 : index
    %208 = vector.load %arg13[%c0_124, %c0_125, %c0_126] : memref<3x224x112xbf16, #tpu.memory_space<vmem>>, vector<1x224x112xbf16>
    %209 = vector.shape_cast %208 : vector<1x224x112xbf16> to vector<224x112xbf16>
    %cst_127 = arith.constant dense<0.000000e+00> : vector<56x112xf32>
    %210 = tpu.matmul %193, %209, %cst_127 {dimension_numbers = #tpu.dot_dimension_numbers<[1], [0], [0], [1], [0, 0, 1, 1], [], []>} : vector<56x224xbf16>, vector<224x112xbf16>, vector<56x112xf32> -> vector<56x112xf32>
    %c1_128 = arith.constant 1 : index
    %c0_129 = arith.constant 0 : index
    %c0_130 = arith.constant 0 : index
    %211 = vector.load %arg13[%c1_128, %c0_129, %c0_130] : memref<3x224x112xbf16, #tpu.memory_space<vmem>>, vector<1x224x112xbf16>
    %212 = vector.shape_cast %211 : vector<1x224x112xbf16> to vector<224x112xbf16>
    %cst_131 = arith.constant dense<0.000000e+00> : vector<56x112xf32>
    %213 = tpu.matmul %205, %212, %cst_131 {dimension_numbers = #tpu.dot_dimension_numbers<[1], [0], [0], [1], [0, 0, 1, 1], [], []>} : vector<56x224xbf16>, vector<224x112xbf16>, vector<56x112xf32> -> vector<56x112xf32>
    %214 = arith.addf %210, %213 : vector<56x112xf32>
    %c2_132 = arith.constant 2 : index
    %c0_133 = arith.constant 0 : index
    %c0_134 = arith.constant 0 : index
    %215 = vector.load %arg13[%c2_132, %c0_133, %c0_134] : memref<3x224x112xbf16, #tpu.memory_space<vmem>>, vector<1x224x112xbf16>
    %216 = vector.shape_cast %215 : vector<1x224x112xbf16> to vector<224x112xbf16>
    %cst_135 = arith.constant dense<0.000000e+00> : vector<56x112xf32>
    %217 = tpu.matmul %207, %216, %cst_135 {dimension_numbers = #tpu.dot_dimension_numbers<[1], [0], [0], [1], [0, 0, 1, 1], [], []>} : vector<56x224xbf16>, vector<224x112xbf16>, vector<56x112xf32> -> vector<56x112xf32>
    %218 = arith.addf %214, %217 : vector<56x112xf32>
    %c0_136 = arith.constant 0 : index
    %c0_137 = arith.constant 0 : index
    %219 = vector.load %arg14[%c0_136, %c0_137] : memref<1x112xf32, #tpu.memory_space<vmem>>, vector<1x112xf32>
    %220 = vector.broadcast %219 : vector<1x112xf32> to vector<56x112xf32>
    %221 = arith.addf %218, %220 : vector<56x112xf32>
    %222 = arith.negf %221 : vector<56x112xf32>
    %223 = math.exp %222 : vector<56x112xf32>
    %cst_138 = arith.constant 1.000000e+00 : f32
    %224 = vector.broadcast %cst_138 : f32 to vector<56x112xf32>
    %225 = arith.addf %224, %223 : vector<56x112xf32>
    %226 = arith.divf %224, %225 : vector<56x112xf32>
    %227 = vector.shape_cast %226 : vector<56x112xf32> to vector<7x8x112xf32>
    %c0_139 = arith.constant 0 : index
    %c0_140 = arith.constant 0 : index
    %c0_141 = arith.constant 0 : index
    %228 = vector.load %arg15[%c0_139, %c0_140, %c0_141] : memref<7x8x112xf32, #tpu.memory_space<vmem>>, vector<7x8x112xf32>
    tpu.vector_store %arg15[%c0_139, %c0_140, %c0_141], %227 {strides = array<i32>} : memref<7x8x112xf32, #tpu.memory_space<vmem>>, vector<7x8x112xf32>,
    return
  }
  func.func @transform_0(%arg0: i32) -> (i32, i32, i32, i32) {
    %c0_i32 = arith.constant 0 : i32
    %c0_i32_0 = arith.constant 0 : i32
    %c0_i32_1 = arith.constant 0 : i32
    %c0_i32_2 = arith.constant 0 : i32
    return %c0_i32, %c0_i32_0, %arg0, %c0_i32_1 : i32, i32, i32, i32
  }
  func.func @transform_1(%arg0: i32) -> (i32, i32) {
    %c0_i32 = arith.constant 0 : i32
    %c0_i32_0 = arith.constant 0 : i32
    return %arg0, %c0_i32 : i32, i32
  }
  func.func @transform_2(%arg0: i32) -> (i32, i32, i32) {
    %c0_i32 = arith.constant 0 : i32
    %c0_i32_0 = arith.constant 0 : i32
    %c0_i32_1 = arith.constant 0 : i32
    %c0_i32_2 = arith.constant 0 : i32
    return %c0_i32, %c0_i32_0, %c0_i32_1 : i32, i32, i32
  }
  func.func @transform_3(%arg0: i32) -> (i32, i32) {
    %c0_i32 = arith.constant 0 : i32
    %c0_i32_0 = arith.constant 0 : i32
    %c0_i32_1 = arith.constant 0 : i32
    return %c0_i32, %c0_i32_0 : i32, i32
  }
  func.func @transform_4(%arg0: i32) -> (i32, i32, i32) {
    %c0_i32 = arith.constant 0 : i32
    %c0_i32_0 = arith.constant 0 : i32
    %c0_i32_1 = arith.constant 0 : i32
    %c0_i32_2 = arith.constant 0 : i32
    return %c0_i32, %c0_i32_0, %c0_i32_1 : i32, i32, i32
  }
  func.func @transform_5(%arg0: i32) -> (i32, i32) {
    %c0_i32 = arith.constant 0 : i32
    %c0_i32_0 = arith.constant 0 : i32
    %c0_i32_1 = arith.constant 0 : i32
    return %c0_i32, %c0_i32_0 : i32, i32
  }
  func.func @transform_6(%arg0: i32) -> (i32, i32, i32) {
    %c0_i32 = arith.constant 0 : i32
    %c0_i32_0 = arith.constant 0 : i32
    %c0_i32_1 = arith.constant 0 : i32
    %c0_i32_2 = arith.constant 0 : i32
    return %c0_i32, %c0_i32_0, %c0_i32_1 : i32, i32, i32
  }
  func.func @transform_7(%arg0: i32) -> (i32, i32) {
    %c0_i32 = arith.constant 0 : i32
    %c0_i32_0 = arith.constant 0 : i32
    %c0_i32_1 = arith.constant 0 : i32
    return %c0_i32, %c0_i32_0 : i32, i32
  }
  func.func @transform_8(%arg0: i32) -> (i32, i32, i32) {
    %c0_i32 = arith.constant 0 : i32
    %c0_i32_0 = arith.constant 0 : i32
    %c0_i32_1 = arith.constant 0 : i32
    %c0_i32_2 = arith.constant 0 : i32
    return %c0_i32, %c0_i32_0, %c0_i32_1 : i32, i32, i32
  }
  func.func @transform_9(%arg0: i32) -> (i32, i32) {
    %c0_i32 = arith.constant 0 : i32
    %c0_i32_0 = arith.constant 0 : i32
    %c0_i32_1 = arith.constant 0 : i32
    return %c0_i32, %c0_i32_0 : i32, i32
  }
  func.func @transform_10(%arg0: i32) -> (i32, i32, i32) {
    %c0_i32 = arith.constant 0 : i32
    %c0_i32_0 = arith.constant 0 : i32
    %c0_i32_1 = arith.constant 0 : i32
    %c0_i32_2 = arith.constant 0 : i32
    return %c0_i32, %c0_i32_0, %c0_i32_1 : i32, i32, i32
  }
  func.func @transform_11(%arg0: i32) -> (i32, i32) {
    %c0_i32 = arith.constant 0 : i32
    %c0_i32_0 = arith.constant 0 : i32
    %c0_i32_1 = arith.constant 0 : i32
    return %c0_i32, %c0_i32_0 : i32, i32
  }
  func.func @transform_12(%arg0: i32) -> (i32, i32, i32) {
    %c0_i32 = arith.constant 0 : i32
    %c0_i32_0 = arith.constant 0 : i32
    %c0_i32_1 = arith.constant 0 : i32
    %c0_i32_2 = arith.constant 0 : i32
    return %c0_i32, %c0_i32_0, %c0_i32_1 : i32, i32, i32
  }
  func.func @transform_13(%arg0: i32) -> (i32, i32) {
    %c0_i32 = arith.constant 0 : i32
    %c0_i32_0 = arith.constant 0 : i32
    %c0_i32_1 = arith.constant 0 : i32
    return %c0_i32, %c0_i32_0 : i32, i32
  }
  func.func @transform_14(%arg0: i32) -> (i32, i32, i32) {
    %c0_i32 = arith.constant 0 : i32
    %c0_i32_0 = arith.constant 0 : i32
    %c0_i32_1 = arith.constant 0 : i32
    return %c0_i32, %arg0, %c0_i32_0 : i32, i32, i32
  }
  func.func @transform_15(%arg0: i32) -> (i32, i32) {
    %c0_i32 = arith.constant 0 : i32
    %c0_i32_0 = arith.constant 0 : i32
    return %arg0, %c0_i32 : i32, i32
  }
  func.func @transform_16(%arg0: i32) -> (i32, i32) {
    %c0_i32 = arith.constant 0 : i32
    %c0_i32_0 = arith.constant 0 : i32
    return %arg0, %c0_i32 : i32, i32
  }
}

</mosaic_0001>

<bundles_post_ra>
// kernel: vae_forward.1
= control target key start
LH: loop header
LB: loop body
LE: loop exit
PB: predicated region body
PF: predicated region fallthrough
CT: control target
= control target key end

     0   :  { %vm146_vm0 = vcmask 1045504   ;;  %v5995_v1 = vmov 0   ;;  %vm133_vm1 = vcmask 228352   ;;  %vm1039_vm2 = vcmask 785408   ;;  %s7915_s2 = inlined_call_operand.vmem [shape: bf16[3,28,224], index: 2, kind: input, shape index: {}]   ;;  %s7916_s0 = inlined_call_operand.vmem [shape: f32[6,7,8,28], index: 0, kind: input, shape index: {}]   ;;  %s7917_s4 = inlined_call_operand.vmem [shape: bf16[3,224,224], index: 4, kind: input, shape index: {}]   ;;  %s7918_s3 = inlined_call_operand.vmem [shape: f32[1,224], index: 3, kind: input, shape index: {}]   ;;  %s7919_s6 = inlined_call_operand.vmem [shape: bf16[7,224,16], index: 6, kind: input, shape index: {}]   ;;  %s7920_s5 = inlined_call_operand.vmem [shape: f32[1,224], index: 5, kind: input, shape index: {}]   ;;  %s7921_s8 = inlined_call_operand.vmem [shape: bf16[7,8,224], index: 8, kind: input, shape index: {}]   ;;  %s7922_s7 = inlined_call_operand.vmem [shape: f32[1,16], index: 7, kind: input, shape index: {}]   ;;  %s7923_s15 = inlined_call_operand.vmem [shape: f32[8,8], index: 15, kind: output, shape index: {1}]   ;;  %s7924_s10 = inlined_call_operand.vmem [shape: bf16[3,224,224], index: 10, kind: input, shape index: {}]   ;;  %s7925_s1 = inlined_call_operand.vmem [shape: f32[8,8], index: 1, kind: input, shape index: {}]   ;;  %s7926_s16 = inlined_call_operand.vmem [shape: f32[8,8], index: 16, kind: output, shape index: {2}]   ;;  %s7927_s12 = inlined_call_operand.vmem [shape: bf16[3,224,112], index: 12, kind: input, shape index: {}]   ;;  %s7928_s9 = inlined_call_operand.vmem [shape: f32[1,224], index: 9, kind: input, shape index: {}]   ;;  %s7929_s11 = inlined_call_operand.vmem [shape: f32[1,224], index: 11, kind: input, shape index: {}]   ;;  %s7930_s13 = inlined_call_operand.vmem [shape: f32[1,112], index: 13, kind: input, shape index: {}]   ;;  %s7931_s14 = inlined_call_operand.vmem [shape: f32[7,8,112], index: 14, kind: output, shape index: {0}]  }
   0x1   :  { %7933 = sst [smem:[#allocation2_spill]] %s7915_s2  ;;  %185 = vmatprep.mubr.bf16.mxu0 %v5995_v1  ;;  %292 = vmatprep.mubr.bf16.mxu1 %v5995_v1  ;;  %v58_v11 = vld [vmem:[%s7916_s0 + $0x38] sm:$0xff]  ;;  %v59_v12 = vld [vmem:[%s7916_s0 + $0x40] sm:$0xff]  ;;  %v52_v14 = vld [vmem:[%s7916_s0 + $0x8] sm:$0xff]  ;;  %vm821_vm3 = vcmask 1043456   ;;  %vm2778_vm5 = vcmask 64512  }
   0x2   :  { %s7934_s23 = sld [smem:[#allocation2_spill]]  ;;  %v51_v13 = vld [vmem:[%s7916_s0] sm:$0xff]  ;;  %v111_v15 = vpack.c.bf16 %v59_v12, %v58_v11  ;;  %v60_v17 = vld [vmem:[%s7916_s0 + $0x48] sm:$0xff]  ;;  %v61_v18 = vld [vmem:[%s7916_s0 + $0x50] sm:$0xff]  ;;  %vm4739_vm6 = vcmask 916480  }
   0x3   :  { %v98_v16 = vpack.c.bf16 %v52_v14, %v51_v13  ;;  %v53_v19 = vld [vmem:[%s7916_s0 + $0x10] sm:$0xff]  ;;  %v54_v20 = vld [vmem:[%s7916_s0 + $0x18] sm:$0xff]  ;;  %v112_v22 = vpack.c.bf16 %v61_v18, %v60_v17  ;;  %v63_v25 = vld [vmem:[%s7916_s0 + $0x60] sm:$0xff] }
   0x4   :  { %v99_v23 = vpack.c.bf16 %v54_v20, %v53_v19  ;;  %v62_v24 = vld [vmem:[%s7916_s0 + $0x58] sm:$0xff]  ;;  %v55_v26 = vld [vmem:[%s7916_s0 + $0x20] sm:$0xff]  ;;  %v56_v27 = vld [vmem:[%s7916_s0 + $0x28] sm:$0xff] }
   0x5   :  { %v113_v28 = vpack.c.bf16 %v63_v25, %v62_v24  ;;  %v100_v29 = vpack.c.bf16 %v56_v27, %v55_v26  ;;  %v64_v30 = vld [vmem:[%s7916_s0 + $0x68] sm:$0xff]  ;;  %v57_v31 = vld [vmem:[%s7916_s0 + $0x30] sm:$0xff]  ;;  %v79_v34 = vld [vmem:[%s7916_s0 + $0xe0] sm:$0xff] }
   0x6   :  { %v114_v32 = vpack.c.bf16 %v64_v30, %v64_v30  ;;  %v101_v33 = vpack.c.bf16 %v57_v31, %v57_v31  ;;  %v80_v35 = vld [vmem:[%s7916_s0 + $0xe8] sm:$0xff]  ;;  %v73_v37 = vld [vmem:[%s7916_s0 + $0xb0] sm:$0xff]  ;;  %v82_v44 = vld [vmem:[%s7916_s0 + $0xf8] sm:$0xff] }
   0x7   :  { %v72_v36 = vld [vmem:[%s7916_s0 + $0xa8] sm:$0xff]  ;;  %v331_v39 = vpack.c.bf16 %v80_v35, %v79_v34  ;;  %v81_v43 = vld [vmem:[%s7916_s0 + $0xf0] sm:$0xff]  ;;  %v74_v45 = vld [vmem:[%s7916_s0 + $0xb8] sm:$0xff] }
   0x8   :  { %v5541_v0 = vld [vmem:[%s7934_s23 + $0x34] ss:$8 sps:$4 sm:$0x3f]   ;;  %v5545_v3 = vld [vmem:[%s7934_s23 + $0x30] ss:$8 sps:$4 sm:$0x3f]   ;;  %v102_v40 = vpack.c.bf16 %v73_v37, %v72_v36  ;;  %v332_v48 = vpack.c.bf16 %v82_v44, %v81_v43  ;;  %vm6587_vm4 = vmneg %vm821_vm3 }
   0x9   :  { %v5543_v2 = vld [vmem:[%s7934_s23 + $0x14] ss:$8 sps:$4 sm:$0x3f]   ;;  %4767 = vmatprep.subr.msk.bf16.mxu0 %vm146_vm0, %v5541_v0  ;;  %v5546_v4 = vld [vmem:[%s7934_s23 + $0x10] ss:$8 sps:$4 sm:$0x3f]  }
   0xa   :  { %4776 = vmatprep.subr.msk.bf16.mxu1 %vm146_vm0, %v5543_v2  ;;  %v5547_v5 = vld [vmem:[%s7934_s23 + $0x24] ss:$8 sps:$4 sm:$0xff]   ;;  %v148_v6 = vsel %vm146_vm0, %v5545_v3, 0  ;;  %v255_v7 = vsel %vm146_vm0, %v5546_v4, 0  ;;  %v5551_v9 = vld [vmem:[%s7934_s23 + $0x20] ss:$8 sps:$4 sm:$0xff]  }
   0xb   :  { %v5549_v8 = vld [vmem:[%s7934_s23 + $0x4] ss:$8 sps:$4 sm:$0xff]   ;;  %166 = vmatpush1.bf16.msra.mxu0 %v148_v6  ;;  %273 = vmatpush1.bf16.msra.mxu1 %v255_v7  ;;  %v5552_v10 = vld [vmem:[%s7934_s23] ss:$8 sps:$4 sm:$0xff]   ;;  %v77_v53 = vld [vmem:[%s7916_s0 + $0xd0] sm:$0xff] }
   0xc   :  { %167 = vmatprep.subr.bf16.mxu0 %v5547_v5  ;;  %274 = vmatprep.subr.bf16.mxu1 %v5549_v8  ;;  %v5553_v21 = vld [vmem:[%s7934_s23 + $0x54] ss:$8 sps:$4 sm:$0x3f]   ;;  %v5555_v38 = vld [vmem:[%s7934_s23 + $0x50] ss:$8 sps:$4 sm:$0x3f]  }
   0xd   :  { %v541_v41 = vsel %vm146_vm0, %v5555_v38, 0  ;;  %v5558_v42 = vld [vmem:[%s7934_s23 + $0x44] ss:$8 sps:$4 sm:$0xff]   ;;  %v5556_v47 = vld [vmem:[%s7934_s23 + $0x40] ss:$8 sps:$4 sm:$0xff]   ;;  %v85_v56 = vld [vmem:[%s7916_s0 + $0x110] sm:$0xff] }
   0xe   :  { %v75_v46 = vld [vmem:[%s7916_s0 + $0xc0] sm:$0xff]  ;;  %v84_v51 = vld [vmem:[%s7916_s0 + $0x108] sm:$0xff]  ;;  %v78_v57 = vld [vmem:[%s7916_s0 + $0xd8] sm:$0xff]  ;;  %v334_v58 = vpack.c.bf16 %v85_v56, %v85_v56 }
   0xf   :  { %168 = vmatpush1.bf16.msra.mxu0 %v5551_v9  ;;  %275 = vmatpush1.bf16.msra.mxu1 %v5552_v10  ;;  %v103_v49 = vpack.c.bf16 %v75_v46, %v74_v45  ;;  %v83_v50 = vld [vmem:[%s7916_s0 + $0x100] sm:$0xff]  ;;  %v76_v52 = vld [vmem:[%s7916_s0 + $0xc8] sm:$0xff]  ;;  %v105_v59 = vpack.c.bf16 %v78_v57, %v78_v57  ;;  %v65_v60 = vld [vmem:[%s7916_s0 + $0x70] sm:$0xff] }
  0x10   :  { %4781 = vmatprep.subr.msk.bf16.mxu0 %vm146_vm0, %v5541_v0  ;;  %4786 = vmatprep.subr.msk.bf16.mxu1 %vm146_vm0, %v5543_v2  ;;  %v333_v54 = vpack.c.bf16 %v84_v51, %v83_v50  ;;  %v104_v55 = vpack.c.bf16 %v77_v53, %v76_v52  ;;  %v66_v61 = vld [vmem:[%s7916_s0 + $0x78] sm:$0xff]  ;;  %v87_v63 = vld [vmem:[%s7916_s0 + $0x120] sm:$0xff]  ;;  %v68_v4 = vld [vmem:[%s7916_s0 + $0x88] sm:$0xff] }
  0x11   :  { %v86_v62 = vld [vmem:[%s7916_s0 + $0x118] sm:$0xff]  ;;  %v506_v0 = vpack.c.bf16 %v66_v61, %v65_v60  ;;  %v67_v3 = vld [vmem:[%s7916_s0 + $0x80] sm:$0xff] }
  0x12   :  { %4768 = vmatmul.mubr.msk.bf16.vlgmr.msra.gmra.mxu0 %vm133_vm1, %v111_v15  ;;  %4777 = vmatmul.mubr.msk.bf16.vlgmr.msra.gmra.mxu1 %vm133_vm1, %v98_v16  ;;  %v631_v2 = vpack.c.bf16 %v87_v63, %v86_v62  ;;  %v90_v11 = vld [vmem:[%s7916_s0 + $0x138] sm:$0xff]  ;;  %v91_v12 = vld [vmem:[%s7916_s0 + $0x140] sm:$0xff]  ;;  %v92_v16 = vld [vmem:[%s7916_s0 + $0x148] sm:$0xff] }
  0x13   :  { %360 = vmatpush1.bf16.msra.mxu0 %v148_v6  ;;  %195 = vmatprep.mubr.bf16.mxu0 %v5995_v1  ;;  %v89_v6 = vld [vmem:[%s7916_s0 + $0x130] sm:$0xff]  ;;  %v633_v14 = vpack.c.bf16 %v91_v12, %v90_v11  ;;  %v71_v15 = vld [vmem:[%s7916_s0 + $0xa0] sm:$0xff]  ;;  %v634_v18 = vpack.c.bf16 %v92_v16, %v92_v16 }
  0x14   :  { %302 = vmatprep.mubr.bf16.mxu1 %v5995_v1  ;;  %361 = vmatprep.subr.bf16.mxu0 %v5547_v5  ;;  %v88_v5 = vld [vmem:[%s7916_s0 + $0x128] sm:$0xff]  ;;  %v509_v17 = vpack.c.bf16 %v71_v15, %v71_v15  ;;  %v5561_v19 = vld [vmem:[%s7917_s4 + $0x154] ss:$8 sps:$4 sm:$0xff]   ;;  %v5559_v20 = vld [vmem:[%s7917_s4 + $0x150] ss:$8 sps:$4 sm:$0xff]  }
  0x15   :  { %443 = vmatpush1.bf16.msra.mxu1 %v255_v7  ;;  %v507_v7 = vpack.c.bf16 %v68_v4, %v67_v3  ;;  %v5565_v24 = vld [vmem:[%s7917_s4 + $0x70] ss:$8 sps:$4 sm:$0xff]   ;;  %v5570_v25 = vld [vmem:[%s7917_s4 + $0x134] ss:$8 sps:$4 sm:$0xff]   ;;  %v5573_v26 = vld [vmem:[%s7917_s4 + $0x64] ss:$8 sps:$4 sm:$0xff]  }
  0x16   :  { %444 = vmatprep.subr.bf16.mxu1 %v5549_v8  ;;  %v632_v8 = vpack.c.bf16 %v89_v6, %v88_v5  ;;  %v5568_v27 = vld [vmem:[%s7917_s4 + $0x130] ss:$8 sps:$4 sm:$0xff]   ;;  %v5579_v30 = vld [vmem:[%s7917_s4 + $0x54] ss:$8 sps:$4 sm:$0xff]   ;;  %v5574_v31 = vld [vmem:[%s7917_s4 + $0x120] ss:$8 sps:$4 sm:$0xff]  }
  0x17   :  { %362 = vmatpush1.bf16.msra.mxu0 %v5551_v9  ;;  %v69_v9 = vld [vmem:[%s7916_s0 + $0x90] sm:$0xff]  ;;  %v5585_v34 = vld [vmem:[%s7917_s4 + $0x44] ss:$8 sps:$4 sm:$0xff]   ;;  %v5583_v36 = vld [vmem:[%s7917_s4 + $0x40] ss:$8 sps:$4 sm:$0xff]  }
  0x18   :  { %4799 = vmatprep.subr.msk.bf16.mxu0 %vm146_vm0, %v5553_v21  ;;  %v5580_v35 = vld [vmem:[%s7917_s4 + $0x110] ss:$8 sps:$4 sm:$0xff]   ;;  %v5588_v37 = vld [vmem:[%s7917_s4 + $0x104] ss:$8 sps:$4 sm:$0xff]   ;;  %v5591_v38 = vld [vmem:[%s7917_s4 + $0x34] ss:$8 sps:$4 sm:$0xff]  }
  0x19   :  { %445 = vmatpush1.bf16.msra.mxu1 %v5552_v10  ;;  %v70_v10 = vld [vmem:[%s7916_s0 + $0x98] sm:$0xff]  ;;  %v5595_v44 = vld [vmem:[%s7917_s4 + $0x20] ss:$8 sps:$4 sm:$0xff]   ;;  %v5600_v45 = vld [vmem:[%s7917_s4 + $0xe4] ss:$8 sps:$4 sm:$0xff]   ;;  %s5996_s0 = smov 120  }
  0x1a   :  { %4769 = vmatmul.mubr.msk.bf16.gmra.mxu0 %vm133_vm1, %v112_v22  ;;  %4778 = vmatmul.mubr.msk.bf16.gmra.mxu1 %vm133_vm1, %v99_v23  ;;  %v508_v13 = vpack.c.bf16 %v70_v10, %v69_v9  ;;  %v5567_v22 = vld [vmem:[%s7917_s4 + $0x74] ss:$8 sps:$4 sm:$0xff]   ;;  %v5562_v23 = vld [vmem:[%s7917_s4 + $0x140] ss:$8 sps:$4 sm:$0xff]   ;;  %v5592_v43 = vld [vmem:[%s7917_s4 + $0xf0] ss:$8 sps:$4 sm:$0xff]  }
  0x1b   :  { %205 = vmatprep.mubr.bf16.mxu0 %v5995_v1  ;;  %312 = vmatprep.mubr.bf16.mxu1 %v5995_v1  ;;  %v5603_v46 = vld [vmem:[%s7917_s4 + $0x14] ss:$8 sps:$4 sm:$0xff]   ;;  %v5609_v50 = vld [vmem:[%s7917_s4 + $0x4] ss:$8 sps:$4 sm:$0xff]   ;;  %v5604_v51 = vld [vmem:[%s7917_s4 + $0x1b0] ss:$8 sps:$4 sm:$0xff]  }
  0x1c   :  { %4804 = vmatprep.subr.msk.bf16.mxu1 %vm146_vm0, %v5553_v21  ;;  %v5564_v21 = vld [vmem:[%s7917_s4 + $0x144] ss:$8 sps:$4 sm:$0xff]   ;;  %v5607_v52 = vld [vmem:[%s7917_s4] ss:$8 sps:$4 sm:$0xff]   ;;  %v5613_v56 = vld [vmem:[%s7917_s4 + $0xd0] ss:$8 sps:$4 sm:$0xff]  }
  0x1d   :  { %v5612_v53 = vld [vmem:[%s7917_s4 + $0x1a4] ss:$8 sps:$4 sm:$0xff]   ;;  %v5618_v57 = vld [vmem:[%s7917_s4 + $0x194] ss:$8 sps:$4 sm:$0xff]   ;;  %v5619_v60 = vld [vmem:[%s7917_s4 + $0xc0] ss:$8 sps:$4 sm:$0xff]  }
  0x1e   :  { %v5624_v61 = vld [vmem:[%s7917_s4 + $0x184] ss:$8 sps:$4 sm:$0xff]   ;;  %v5627_v62 = vld [vmem:[%s7917_s4 + $0xb4] ss:$8 sps:$4 sm:$0xff]   ;;  %v5622_v63 = vld [vmem:[%s7917_s4 + $0x180] ss:$8 sps:$4 sm:$0xff]  }
  0x1f   :  { %v5633_v3 = vld [vmem:[%s7917_s4 + $0xa4] ss:$8 sps:$4 sm:$0xff]   ;;  %v5628_v4 = vld [vmem:[%s7917_s4 + $0x170] ss:$8 sps:$4 sm:$0xff]   ;;  %v5631_v5 = vld [vmem:[%s7917_s4 + $0xa0] ss:$8 sps:$4 sm:$0xff]  }
  0x20   :  { %v5636_v6 = vld [vmem:[%s7917_s4 + $0x164] ss:$8 sps:$4 sm:$0xff]   ;;  %v5637_v9 = vld [vmem:[%s7917_s4 + $0x90] ss:$8 sps:$4 sm:$0xff]   ;;  %v5645_v11 = vld [vmem:[%s7917_s4 + $0x234] ss:$8 sps:$4 sm:$0xff]  }
  0x21   :  { %v5642_v10 = vld [vmem:[%s7917_s4 + $0x84] ss:$8 sps:$4 sm:$0xff]   ;;  %v5640_v12 = vld [vmem:[%s7917_s4 + $0x80] ss:$8 sps:$4 sm:$0xff]  }
  0x22   :  { %4770 = vmatmul.mubr.msk.bf16.gmra.mxu0 %vm133_vm1, %v113_v28  ;;  %4779 = vmatmul.mubr.msk.bf16.gmra.mxu1 %vm133_vm1, %v100_v29  ;;  %v5571_v28 = vld [vmem:[%s7917_s4 + $0x60] ss:$8 sps:$4 sm:$0xff]   ;;  %v5576_v29 = vld [vmem:[%s7917_s4 + $0x124] ss:$8 sps:$4 sm:$0xff]  }
  0x23   :  { %215 = vmatprep.mubr.bf16.mxu0 %v5995_v1  ;;  %322 = vmatprep.mubr.bf16.mxu1 %v5995_v1 }
  0x2a   :  { %4771 = vmatmul.mubr.msk.bf16.gmra.mxu0 %vm133_vm1, %v114_v32  ;;  %4780 = vmatmul.mubr.msk.bf16.gmra.mxu1 %vm133_vm1, %v101_v33  ;;  %v5577_v32 = vld [vmem:[%s7917_s4 + $0x50] ss:$8 sps:$4 sm:$0xff]   ;;  %v5582_v33 = vld [vmem:[%s7917_s4 + $0x114] ss:$8 sps:$4 sm:$0xff]  }
  0x2b   :  { %379 = vmatprep.mubr.bf16.mxu0 %v5995_v1  ;;  %462 = vmatprep.mubr.bf16.mxu1 %v5995_v1 }
  0x32   :  { %4782 = vmatmul.mubr.msk.bf16.vlgmr.msra.gmra.mxu0 %vm133_vm1, %v331_v39  ;;  %4787 = vmatmul.mubr.msk.bf16.vlgmr.msra.gmra.mxu1 %vm133_vm1, %v102_v40  ;;  %v5586_v39 = vld [vmem:[%s7917_s4 + $0x100] ss:$8 sps:$4 sm:$0xff]   ;;  %v5589_v40 = vld [vmem:[%s7917_s4 + $0x30] ss:$8 sps:$4 sm:$0xff]  }
  0x33   :  { %559 = vmatpush1.bf16.msra.mxu0 %v541_v41  ;;  %389 = vmatprep.mubr.bf16.mxu0 %v5995_v1 }
  0x34   :  { %472 = vmatprep.mubr.bf16.mxu1 %v5995_v1  ;;  %560 = vmatprep.subr.bf16.mxu0 %v5558_v42 }
  0x35   :  { %660 = vmatpush1.bf16.msra.mxu1 %v541_v41  ;;  %v5594_v41 = vld [vmem:[%s7917_s4 + $0xf4] ss:$8 sps:$4 sm:$0xff]  }
  0x36   :  { %661 = vmatprep.subr.bf16.mxu1 %v5558_v42  ;;  %v5597_v42 = vld [vmem:[%s7917_s4 + $0x24] ss:$8 sps:$4 sm:$0xff]  }
  0x37   :  { %561 = vmatpush1.bf16.msra.mxu0 %v5556_v47 }
  0x38   :  { %1052 = vmatprep.subr.bf16.mxu0 %v5561_v19 }
  0x39   :  { %662 = vmatpush1.bf16.msra.mxu1 %v5556_v47  ;;  %v5598_v47 = vld [vmem:[%s7917_s4 + $0xe0] ss:$8 sps:$4 sm:$0xff]  }
  0x3a   :  { %4783 = vmatmul.mubr.msk.bf16.gmra.mxu0 %vm133_vm1, %v332_v48  ;;  %4788 = vmatmul.mubr.msk.bf16.gmra.mxu1 %vm133_vm1, %v103_v49  ;;  %v5601_v48 = vld [vmem:[%s7917_s4 + $0x10] ss:$8 sps:$4 sm:$0xff]   ;;  %v5606_v49 = vld [vmem:[%s7917_s4 + $0x1b4] ss:$8 sps:$4 sm:$0xff]  }
  0x3b   :  { %399 = vmatprep.mubr.bf16.mxu0 %v5995_v1  ;;  %482 = vmatprep.mubr.bf16.mxu1 %v5995_v1 }
  0x3c   :  { %1274 = vmatprep.subr.bf16.mxu1 %v5567_v22 }
  0x42   :  { %4784 = vmatmul.mubr.msk.bf16.gmra.mxu0 %vm133_vm1, %v333_v54  ;;  %4789 = vmatmul.mubr.msk.bf16.gmra.mxu1 %vm133_vm1, %v104_v55  ;;  %v5615_v54 = vld [vmem:[%s7917_s4 + $0xd4] ss:$8 sps:$4 sm:$0xff]   ;;  %v5610_v55 = vld [vmem:[%s7917_s4 + $0x1a0] ss:$8 sps:$4 sm:$0xff]  }
  0x43   :  { %409 = vmatprep.mubr.bf16.mxu0 %v5995_v1  ;;  %492 = vmatprep.mubr.bf16.mxu1 %v5995_v1 }
  0x4a   :  { %4785 = vmatmul.mubr.msk.bf16.gmra.mxu0 %vm133_vm1, %v334_v58  ;;  %4790 = vmatmul.mubr.msk.bf16.gmra.mxu1 %vm133_vm1, %v105_v59  ;;  %v5621_v58 = vld [vmem:[%s7917_s4 + $0xc4] ss:$8 sps:$4 sm:$0xff]   ;;  %v5616_v59 = vld [vmem:[%s7917_s4 + $0x190] ss:$8 sps:$4 sm:$0xff]  }
  0x4b   :  { %578 = vmatprep.mubr.bf16.mxu0 %v5995_v1  ;;  %679 = vmatprep.mubr.bf16.mxu1 %v5995_v1 }
  0x52   :  { %4800 = vmatmul.mubr.msk.bf16.vlgmr.msra.gmra.mxu0 %vm133_vm1, %v506_v0  ;;  %4805 = vmatmul.mubr.msk.bf16.vlgmr.msra.gmra.mxu1 %vm133_vm1, %v631_v2  ;;  %v5625_v0 = vld [vmem:[%s7917_s4 + $0xb0] ss:$8 sps:$4 sm:$0xff]   ;;  %v5630_v2 = vld [vmem:[%s7917_s4 + $0x174] ss:$8 sps:$4 sm:$0xff]  }
  0x53   :  { %588 = vmatprep.mubr.bf16.mxu0 %v5995_v1  ;;  %689 = vmatprep.mubr.bf16.mxu1 %v5995_v1 }
  0x54   :  { %1053 = vmatpush1.bf16.msra.mxu0 %v5559_v20  ;;  %1275 = vmatpush1.bf16.msra.mxu1 %v5565_v24 }
  0x55   :  { %1054 = vmatprep.subr.bf16.mxu0 %v5564_v21  ;;  %1276 = vmatprep.subr.bf16.mxu1 %v5573_v26 }
  0x58   :  { %1055 = vmatpush1.bf16.msra.mxu0 %v5562_v23  ;;  %1277 = vmatpush1.bf16.msra.mxu1 %v5571_v28 }
  0x59   :  { %1056 = vmatprep.subr.bf16.mxu0 %v5570_v25  ;;  %1278 = vmatprep.subr.bf16.mxu1 %v5579_v30 }
  0x5a   :  { %4801 = vmatmul.mubr.msk.bf16.gmra.mxu0 %vm133_vm1, %v507_v7  ;;  %4806 = vmatmul.mubr.msk.bf16.gmra.mxu1 %vm133_vm1, %v632_v8  ;;  %v5639_v7 = vld [vmem:[%s7917_s4 + $0x94] ss:$8 sps:$4 sm:$0xff]   ;;  %v5634_v8 = vld [vmem:[%s7917_s4 + $0x160] ss:$8 sps:$4 sm:$0xff]  }
  0x5b   :  { %598 = vmatprep.mubr.bf16.mxu0 %v5995_v1  ;;  %699 = vmatprep.mubr.bf16.mxu1 %v5995_v1 }
  0x5c   :  { %1057 = vmatpush1.bf16.msra.mxu0 %v5568_v27  ;;  %1279 = vmatpush1.bf16.msra.mxu1 %v5577_v32 }
  0x5d   :  { %1058 = vmatprep.subr.bf16.mxu0 %v5576_v29  ;;  %1280 = vmatprep.subr.bf16.mxu1 %v5585_v34 }
  0x60   :  { %1059 = vmatpush1.bf16.msra.mxu0 %v5574_v31  ;;  %1281 = vmatpush1.bf16.msra.mxu1 %v5583_v36 }
  0x61   :  { %1060 = vmatprep.subr.bf16.mxu0 %v5582_v33  ;;  %1282 = vmatprep.subr.bf16.mxu1 %v5591_v38 }
  0x62   :  { %4802 = vmatmul.mubr.msk.bf16.gmra.mxu0 %vm133_vm1, %v508_v13  ;;  %4807 = vmatmul.mubr.msk.bf16.gmra.mxu1 %vm133_vm1, %v633_v14 }
  0x63   :  { %608 = vmatprep.mubr.bf16.mxu0 %v5995_v1  ;;  %709 = vmatprep.mubr.bf16.mxu1 %v5995_v1 }
  0x64   :  { %1061 = vmatpush1.bf16.msra.mxu0 %v5580_v35  ;;  %1283 = vmatpush1.bf16.msra.mxu1 %v5589_v40 }
  0x65   :  { %1062 = vmatprep.subr.bf16.mxu0 %v5588_v37  ;;  %1284 = vmatprep.subr.bf16.mxu1 %v5597_v42 }
  0x68   :  { %1063 = vmatpush1.bf16.msra.mxu0 %v5586_v39  ;;  %1285 = vmatpush1.bf16.msra.mxu1 %v5595_v44 }
  0x69   :  { %1064 = vmatprep.subr.bf16.mxu0 %v5594_v41  ;;  %1286 = vmatprep.subr.bf16.mxu1 %v5603_v46 }
  0x6a   :  { %4803 = vmatmul.mubr.msk.bf16.gmra.mxu0 %vm133_vm1, %v509_v17  ;;  %4808 = vmatmul.mubr.msk.bf16.gmra.mxu1 %vm133_vm1, %v634_v18 }
  0x6c   :  { %1065 = vmatpush1.bf16.msra.mxu0 %v5592_v43  ;;  %1287 = vmatpush1.bf16.msra.mxu1 %v5601_v48 }
  0x6d   :  { %1066 = vmatprep.subr.bf16.mxu0 %v5600_v45  ;;  %1288 = vmatprep.subr.bf16.mxu1 %v5609_v50 }
  0x70   :  { %1067 = vmatpush1.bf16.msra.mxu0 %v5598_v47  ;;  %1289 = vmatpush1.bf16.msra.mxu1 %v5607_v52 }
  0x71   :  { %1072 = vmatprep.subr.bf16.mxu0 %v5606_v49  ;;  %1294 = vmatprep.subr.bf16.mxu1 %v5615_v54 }
  0x74   :  { %1073 = vmatpush2.bf16.msra.mxu0 %v5604_v51  ;;  %1295 = vmatpush2.bf16.msra.mxu1 %v5613_v56 }
  0x75   :  { %1074 = vmatprep.subr.bf16.mxu0 %v5612_v53  ;;  %1296 = vmatprep.subr.bf16.mxu1 %v5621_v58 }
  0x78   :  { %1075 = vmatpush2.bf16.msra.mxu0 %v5610_v55  ;;  %1297 = vmatpush2.bf16.msra.mxu1 %v5619_v60 }
  0x79   :  { %1076 = vmatprep.subr.bf16.mxu0 %v5618_v57  ;;  %1298 = vmatprep.subr.bf16.mxu1 %v5627_v62 }
  0x7c   :  { %1077 = vmatpush2.bf16.msra.mxu0 %v5616_v59  ;;  %1299 = vmatpush2.bf16.msra.mxu1 %v5625_v0 }
  0x7d   :  { %1078 = vmatprep.subr.bf16.mxu0 %v5624_v61  ;;  %1300 = vmatprep.subr.bf16.mxu1 %v5633_v3 }
  0x80   :  { %1079 = vmatpush2.bf16.msra.mxu0 %v5622_v63  ;;  %1301 = vmatpush2.bf16.msra.mxu1 %v5631_v5 }
  0x81   :  { %1080 = vmatprep.subr.bf16.mxu0 %v5630_v2  ;;  %1302 = vmatprep.subr.bf16.mxu1 %v5639_v7 }
  0x84   :  { %1081 = vmatpush2.bf16.msra.mxu0 %v5628_v4  ;;  %1303 = vmatpush2.bf16.msra.mxu1 %v5637_v9 }
  0x85   :  { %1082 = vmatprep.subr.bf16.mxu0 %v5636_v6  ;;  %1304 = vmatprep.subr.bf16.mxu1 %v5642_v10 }
  0x88   :  { %1083 = vmatpush2.bf16.msra.mxu0 %v5634_v8  ;;  %1305 = vmatpush2.bf16.msra.mxu1 %v5640_v12 }
  0x89   :  { %1526 = vmatprep.subr.bf16.mxu0 %v5645_v11  ;;  %1808 = vmatprep.subr.bf16.mxu1 %v5995_v1 }
  0xd2   :  { %v187_v13 = vpop.f32.mrf.mxu0  ;;  %v294_v14 = vpop.f32.mrf.mxu1 }
  0xd3   :  { %v6473_v15 = vadd.f32 %v294_v14, %v187_v13  ;;  %v733_v14 = vlaneseq }
  0xd4   :  { %v189_v16 = vpop.f32.mrf.mxu0  ;;  %v296_v17 = vpop.f32.mrf.mxu1 }
  0xd5   :  { %v6475_v18 = vadd.f32 %v296_v17, %v189_v16 }
  0xd6   :  { %v191_v19 = vpop.f32.mrf.mxu0  ;;  %v298_v20 = vpop.f32.mrf.mxu1 }
  0xd7   :  { %v6477_v21 = vadd.f32 %v298_v20, %v191_v19 }
  0xd8   :  { %v6479_v22 = vpop.f32.mrf.mxu0  ;;  %v6481_v23 = vpop.f32.mrf.mxu1 }
  0xda   :  { %v197_v24 = vpop.f32.mrf.mxu0  ;;  %v304_v25 = vpop.f32.mrf.mxu1 }
  0xdb   :  { %v6483_v26 = vadd.f32 %v304_v25, %v197_v24  ;;  %v734_v24 = vshrl.u32 %v733_v14, 7 }
  0xdc   :  { %v199_v27 = vpop.f32.mrf.mxu0  ;;  %v306_v28 = vpop.f32.mrf.mxu1 }
  0xdd   :  { %v6485_v29 = vadd.f32 %v306_v28, %v199_v27 }
  0xde   :  { %v201_v30 = vpop.f32.mrf.mxu0  ;;  %v308_v31 = vpop.f32.mrf.mxu1 }
  0xdf   :  { %v6487_v32 = vadd.f32 %v308_v31, %v201_v30 }
  0xe0   :  { %v6489_v33 = vpop.f32.mrf.mxu0  ;;  %v6491_v34 = vpop.f32.mrf.mxu1 }
  0xe2   :  { %v207_v35 = vpop.f32.mrf.mxu0  ;;  %v314_v36 = vpop.f32.mrf.mxu1 }
  0xe3   :  { %v6493_v37 = vadd.f32 %v314_v36, %v207_v35  ;;  %v6519_v36 = vsub.s32 0, %v734_v24 }
  0xe4   :  { %v209_v38 = vpop.f32.mrf.mxu0  ;;  %v316_v39 = vpop.f32.mrf.mxu1 }
  0xe5   :  { %v6495_v40 = vadd.f32 %v316_v39, %v209_v38  ;;  %v93_v38 = vld [vmem:[%s7918_s3] sm:$0x3] }
  0xe6   :  { %v211_v41 = vpop.f32.mrf.mxu0  ;;  %v318_v42 = vpop.f32.mrf.mxu1 }
  0xe7   :  { %v6497_v43 = vadd.f32 %v318_v42, %v211_v41  ;;  %v6524_v42 = vsub.s32 1, %v734_v24 }
  0xe8   :  { %v6499_v44 = vpop.f32.mrf.mxu0  ;;  %v320_v45 = vpop.f32.mrf.mxu1 }
  0xea   :  { %v217_v46 = vpop.f32.mrf.mxu0  ;;  %v324_v47 = vpop.f32.mrf.mxu1 }
  0xeb   :  { %v6501_v48 = vadd.f32 %v324_v47, %v217_v46 }
  0xec   :  { %v219_v49 = vpop.f32.mrf.mxu0  ;;  %v326_v50 = vpop.f32.mrf.mxu1 }
  0xee   :  { %v221_v51 = vpop.f32.mrf.mxu0  ;;  %v328_v52 = vpop.f32.mrf.mxu1 }
  0xef   :  { %v6527_v51 = vrot.slane %v93_v38, %v6519_v36 }
  0xf0   :  { %v222_v53 = vpop.f32.mrf.mxu0  ;;  %v329_v54 = vpop.f32.mrf.mxu1 }
  0xf2   :  { %v381_v55 = vpop.f32.mrf.mxu0  ;;  %v464_v56 = vpop.f32.mrf.mxu1 }
  0xf3   :  { %v465_v46 = vadd.f32 %v464_v56, %v381_v55  ;;  %v6537_v55 = vadd.f32 %v6491_v34, %v6489_v33  ;;  %v6540_v56 = vadd.f32 %v320_v45, %v6499_v44 }
  0xf4   :  { %v383_v57 = vpop.f32.mrf.mxu0  ;;  %v466_v58 = vpop.f32.mrf.mxu1 }
  0xf5   :  { %v467_v53 = vadd.f32 %v466_v58, %v383_v57 }
  0xf6   :  { %v385_v59 = vpop.f32.mrf.mxu0  ;;  %v468_v60 = vpop.f32.mrf.mxu1 }
  0xf7   :  { %v469_v24 = vadd.f32 %v468_v60, %v385_v59 }
  0xf8   :  { %v387_v61 = vpop.f32.mrf.mxu0  ;;  %v470_v62 = vpop.f32.mrf.mxu1 }
  0xfa   :  { %v391_v63 = vpop.f32.mrf.mxu0  ;;  %v474_v0 = vpop.f32.mrf.mxu1 }
  0xfc   :  { %v393_v2 = vpop.f32.mrf.mxu0  ;;  %v476_v3 = vpop.f32.mrf.mxu1 }
  0xfd   :  { %v477_v33 = vadd.f32 %v476_v3, %v393_v2 }
  0xfe   :  { %v395_v4 = vpop.f32.mrf.mxu0  ;;  %v478_v5 = vpop.f32.mrf.mxu1 }
  0xff   :  { %v479_v34 = vadd.f32 %v478_v5, %v395_v4 }
 0x100   :  { %v397_v6 = vpop.f32.mrf.mxu0  ;;  %v480_v7 = vpop.f32.mrf.mxu1 }
 0x101   :  { %v481_v60 = vadd.f32 %v480_v7, %v397_v6 }
 0x102   :  { %v401_v8 = vpop.f32.mrf.mxu0  ;;  %v484_v9 = vpop.f32.mrf.mxu1 }
 0x104   :  { %v6503_v10 = vpop.f32.mrf.mxu0  ;;  %v6505_v11 = vpop.f32.mrf.mxu1 }
 0x106   :  { %v6507_v12 = vpop.f32.mrf.mxu0  ;;  %v6509_v13 = vpop.f32.mrf.mxu1 }
 0x108   :  { %v6511_v16 = vpop.f32.mrf.mxu0  ;;  %v6513_v17 = vpop.f32.mrf.mxu1 }
 0x10a   :  { %v411_v19 = vpop.f32.mrf.mxu0  ;;  %v494_v20 = vpop.f32.mrf.mxu1 }
 0x10b   :  { %v6515_v25 = vadd.f32 %v494_v20, %v411_v19  ;;  %v301_v19 = vadd.f32 %v6481_v23, %v6479_v22 }
 0x10c   :  { %v413_v27 = vpop.f32.mrf.mxu0  ;;  %v496_v28 = vpop.f32.mrf.mxu1 }
 0x10d   :  { %v6517_v30 = vadd.f32 %v496_v28, %v413_v27  ;;  %v6533_v27 = vrot.slane %v93_v38, %v6524_v42  ;;  %v471_v38 = vadd.f32 %v470_v62, %v387_v61 }
 0x10e   :  { %v415_v31 = vpop.f32.mrf.mxu0  ;;  %v498_v35 = vpop.f32.mrf.mxu1 }
 0x110   :  { %v416_v39 = vpop.f32.mrf.mxu0  ;;  %v499_v41 = vpop.f32.mrf.mxu1 }
 0x111   :  { %v475_v39 = vadd.f32 %v474_v0, %v391_v63  ;;  %v485_v41 = vadd.f32 %v484_v9, %v401_v8 }
 0x112   :  { %v580_v47 = vpop.f32.mrf.mxu0  ;;  %v681_v52 = vpop.f32.mrf.mxu1 }
 0x113   :  { %v617_v54 = vadd.f32 %v580_v47, %v6473_v15  ;;  %v718_v14 = vadd.f32 %v681_v52, %v465_v46  ;;  %v6543_v15 = vadd.f32 %v326_v50, %v219_v49 }
 0x114   :  { %v582_v20 = vpop.f32.mrf.mxu0  ;;  %v683_v28 = vpop.f32.mrf.mxu1 }
 0x115   :  { %v618_v57 = vadd.f32 %v582_v20, %v6475_v18  ;;  %v719_v58 = vadd.f32 %v683_v28, %v467_v53  ;;  %v743_v22 = vadd.f32 %v6527_v51, %v617_v54  ;;  %v779_v23 = vadd.f32 %v6527_v51, %v718_v14 }
 0x116   :  { %v584_v31 = vpop.f32.mrf.mxu0  ;;  %v685_v35 = vpop.f32.mrf.mxu1 }
 0x117   :  { %v744_v44 = vadd.f32 %v6533_v27, %v618_v57  ;;  %v780_v45 = vadd.f32 %v6533_v27, %v719_v58  ;;  %v619_v18 = vadd.f32 %v584_v31, %v6477_v21  ;;  %v720_v49 = vadd.f32 %v685_v35, %v469_v24 }
 0x118   :  { %v586_v50 = vpop.f32.mrf.mxu0  ;;  %v687_v59 = vpop.f32.mrf.mxu1  ;;  %v757_v52 = vmax.f32 %v743_v22, 0.0  ;;  %v793_v53 = vmax.f32 %v779_v23, 0.0  ;;  %v487_v31 = vadd.f32 %v6505_v11, %v6503_v10  ;;  %v6564_v35 = vadd.f32 %v6509_v13, %v6507_v12  ;;  %v5648_v11 = vld [vmem:[%s7917_s4 + $0x224] ss:$8 sps:$4 sm:$0xff]  }
 0x119   :  { %v620_v46 = vadd.f32 %v586_v50, %v301_v19  ;;  %v721_v47 = vadd.f32 %v687_v59, %v471_v38  ;;  %v745_v61 = vadd.f32 %v6527_v51, %v619_v18  ;;  %v781_v62 = vadd.f32 %v6527_v51, %v720_v49 }
 0x11a   :  { %v590_v63 = vpop.f32.mrf.mxu0  ;;  %v691_v0 = vpop.f32.mrf.mxu1  ;;  %v758_v5 = vmax.f32 %v744_v44, 0.0  ;;  %v794_v6 = vmax.f32 %v780_v45, 0.0  ;;  %v5643_v44 = vld [vmem:[%s7917_s4 + $0x230] ss:$8 sps:$4 sm:$0xff]  }
 0x11b   :  { %v746_v2 = vadd.f32 %v6533_v27, %v620_v46  ;;  %v782_v21 = vadd.f32 %v6533_v27, %v721_v47  ;;  %v621_v3 = vadd.f32 %v590_v63, %v6483_v26  ;;  %v722_v4 = vadd.f32 %v691_v0, %v475_v39  ;;  %v5646_v0 = vld [vmem:[%s7917_s4 + $0x220] ss:$8 sps:$4 sm:$0xff]  }
 0x11c   :  { %v759_v7 = vmax.f32 %v745_v61, 0.0  ;;  %v795_v8 = vmax.f32 %v781_v62, 0.0  ;;  %v592_v9 = vpop.f32.mrf.mxu0  ;;  %v693_v54 = vpop.f32.mrf.mxu1 }
 0x11d   :  { %v760_v14 = vmax.f32 %v746_v2, 0.0  ;;  %v796_v19 = vmax.f32 %v782_v21, 0.0  ;;  %v747_v20 = vadd.f32 %v6527_v51, %v621_v3  ;;  %v783_v28 = vadd.f32 %v6527_v51, %v722_v4 }
 0x11e   :  { %v771_v57 = vpack.c.bf16 %v759_v7, %v757_v52  ;;  %v6557_v58 = vpack.c.bf16 %v795_v8, %v793_v53  ;;  %v622_v24 = vadd.f32 %v592_v9, %v6485_v29  ;;  %v723_v22 = vadd.f32 %v693_v54, %v477_v33  ;;  %v594_v26 = vpop.f32.mrf.mxu0  ;;  %v695_v23 = vpop.f32.mrf.mxu1 }
 0x11f   :  { %v772_v38 = vpack.c.bf16 %v760_v14, %v758_v5  ;;  %v6566_v39 = vpack.c.bf16 %v796_v19, %v794_v6  ;;  %v761_v45 = vmax.f32 %v747_v20, 0.0  ;;  %v623_v18 = vadd.f32 %v594_v26, %v6487_v32 }
 0x120   :  { %v748_v29 = vadd.f32 %v6533_v27, %v622_v24  ;;  %v784_v33 = vadd.f32 %v6533_v27, %v723_v22  ;;  %v596_v49 = vpop.f32.mrf.mxu0  ;;  %v697_v10 = vpop.f32.mrf.mxu1  ;;  %v724_v12 = vadd.f32 %v695_v23, %v479_v34  ;;  %v822_v46 = vrot.slane %v6557_v58, 4 }
 0x121   :  { %v624_v13 = vadd.f32 %v596_v49, %v6537_v55  ;;  %v725_v50 = vadd.f32 %v697_v10, %v481_v60  ;;  %4865 = vmatprep.mubr.msk.bf16.mxu0 %vm1039_vm2, %v772_v38  ;;  %v823_v59 = vrot.slane %v6566_v39, 4  ;;  %v797_v47 = vmax.f32 %v783_v28, 0.0 }
 0x122   :  { %v762_v52 = vmax.f32 %v748_v29, 0.0  ;;  %v749_v32 = vadd.f32 %v6527_v51, %v623_v18  ;;  %v600_v53 = vpop.f32.mrf.mxu0  ;;  %v701_v61 = vpop.f32.mrf.mxu1  ;;  %1085 = vmatmul.mubr.bf16.vlgmr.msra.gmra.mxu0 %v771_v57  ;;  %v785_v62 = vadd.f32 %v6527_v51, %v724_v12  ;;  %v798_v2 = vmax.f32 %v784_v33, 0.0 }
 0x123   :  { %v750_v34 = vadd.f32 %v6533_v27, %v624_v13  ;;  %v786_v55 = vadd.f32 %v6533_v27, %v725_v50  ;;  %v625_v60 = vadd.f32 %v600_v53, %v6493_v37  ;;  %1527 = vmatpush1.bf16.msra.mxu0 %v5643_v44  ;;  %v726_v3 = vadd.f32 %v701_v61, %v485_v41  ;;  %v5651_v37 = vld [vmem:[%s7917_s4 + $0x214] ss:$8 sps:$4 sm:$0xff]  }
 0x124   :  { %v763_v21 = vmax.f32 %v749_v32, 0.0  ;;  %v602_v4 = vpop.f32.mrf.mxu0  ;;  %v703_v5 = vpop.f32.mrf.mxu1  ;;  %v841_v6 = vsel %vm821_vm3, 0, %v823_v59  ;;  %1528 = vmatprep.subr.bf16.mxu0 %v5648_v11  ;;  %v799_v7 = vmax.f32 %v785_v62, 0.0  ;;  %v491_v24 = vadd.f32 %v6513_v17, %v6511_v16  ;;  %v5654_v16 = vld [vmem:[%s7917_s4 + $0x204] ss:$8 sps:$4 sm:$0xff]  }
 0x125   :  { %v764_v8 = vmax.f32 %v750_v34, 0.0  ;;  %v800_v9 = vmax.f32 %v786_v55, 0.0  ;;  %v751_v54 = vadd.f32 %v6527_v51, %v625_v60  ;;  %4897 = vmatprep.mubr.msk.bf16.mxu1 %vm1039_vm2, %v841_v6  ;;  %v787_v41 = vadd.f32 %v6527_v51, %v726_v3 }
 0x126   :  { %v626_v14 = vadd.f32 %v602_v4, %v6495_v40  ;;  %v727_v19 = vadd.f32 %v703_v5, %v487_v31  ;;  %4899 = vmatmul.mubr.msk.bf16.vlgmr.msra.gmra.mxu1 %vm6587_vm4, %v822_v46  ;;  %v604_v20 = vpop.f32.mrf.mxu0  ;;  %v705_v28 = vpop.f32.mrf.mxu1  ;;  %v773_v57 = vpack.c.bf16 %v763_v21, %v761_v45  ;;  %v6610_v22 = vpack.c.bf16 %v799_v7, %v797_v47  ;;  %v5649_v40 = vld [vmem:[%s7917_s4 + $0x210] ss:$8 sps:$4 sm:$0xff]  }
 0x127   :  { %v774_v26 = vpack.c.bf16 %v764_v8, %v762_v52  ;;  %v6612_v23 = vpack.c.bf16 %v800_v9, %v798_v2  ;;  %1529 = vmatpush1.bf16.msra.mxu0 %v5646_v0  ;;  %v765_v31 = vmax.f32 %v751_v54, 0.0  ;;  %v627_v45 = vadd.f32 %v604_v20, %v6497_v43  ;;  %v5657_v0 = vld [vmem:[%s7917_s4 + $0x1f4] ss:$8 sps:$4 sm:$0xff]  }
 0x128   :  { %v752_v38 = vadd.f32 %v6533_v27, %v626_v14  ;;  %v788_v44 = vadd.f32 %v6533_v27, %v727_v19  ;;  %v606_v29 = vpop.f32.mrf.mxu0  ;;  %v707_v33 = vpop.f32.mrf.mxu1  ;;  %1530 = vmatprep.subr.bf16.mxu0 %v5651_v37  ;;  %v728_v18 = vadd.f32 %v705_v28, %v6564_v35  ;;  %v801_v11 = vmax.f32 %v787_v41, 0.0  ;;  %v5660_v41 = vld [vmem:[%s7917_s4 + $0x1e4] ss:$8 sps:$4 sm:$0xff]  }
 0x129   :  { %v826_v17 = vrot.slane %v6612_v23, 4  ;;  %v628_v49 = vadd.f32 %v606_v29, %v6540_v56  ;;  %v729_v10 = vadd.f32 %v707_v33, %v491_v24  ;;  %4866 = vmatprep.mubr.msk.bf16.mxu0 %vm1039_vm2, %v774_v26  ;;  %v753_v43 = vadd.f32 %v6527_v51, %v627_v45  ;;  %v5652_v56 = vld [vmem:[%s7917_s4 + $0x200] ss:$8 sps:$4 sm:$0xff]   ;;  %v5666_v45 = vld [vmem:[%s7917_s4 + $0x1c4] ss:$8 sps:$4 sm:$0xff]  }
 0x12a   :  { %v766_v12 = vmax.f32 %v752_v38, 0.0  ;;  %v610_v13 = vpop.f32.mrf.mxu0  ;;  %v711_v50 = vpop.f32.mrf.mxu1  ;;  %1095 = vmatmul.mubr.bf16.gmra.mxu0 %v773_v57  ;;  %v824_v47 = vrot.slane %v6610_v22, 4  ;;  %v802_v52 = vmax.f32 %v788_v44, 0.0  ;;  %v789_v32 = vadd.f32 %v6527_v51, %v728_v18  ;;  %v5661_v38 = vld [vmem:[%s7917_s4 + $0x1d0] ss:$8 sps:$4 sm:$0xff]  }
 0x12b   :  { %v754_v53 = vadd.f32 %v6533_v27, %v628_v49  ;;  %v790_v35 = vadd.f32 %v6533_v27, %v729_v10  ;;  %1531 = vmatpush1.bf16.msra.mxu0 %v5649_v40  ;;  %v767_v61 = vmax.f32 %v753_v43, 0.0  ;;  %v629_v62 = vadd.f32 %v610_v13, %v6501_v48  ;;  %v5663_v40 = vld [vmem:[%s7917_s4 + $0x1d4] ss:$8 sps:$4 sm:$0xff]   ;;  %v5664_v29 = vld [vmem:[%s7917_s4 + $0x1c0] ss:$8 sps:$4 sm:$0xff]  }
 0x12c   :  { %v730_v34 = vadd.f32 %v711_v50, %v6515_v25  ;;  %v612_v55 = vpop.f32.mrf.mxu0  ;;  %v713_v60 = vpop.f32.mrf.mxu1  ;;  %v827_v63 = vsel %vm821_vm3, %v823_v59, %v826_v17  ;;  %1532 = vmatprep.subr.bf16.mxu0 %v5654_v16  ;;  %v803_v2 = vmax.f32 %v789_v32, 0.0  ;;  %v825_v48 = vsel %vm821_vm3, %v822_v46, %v824_v47  ;;  %v5655_v46 = vld [vmem:[%s7917_s4 + $0x1f0] ss:$8 sps:$4 sm:$0xff]   ;;  %v5669_v33 = vld [vmem:[%s7917_s4 + $0x294] ss:$8 sps:$4 sm:$0xff]  }
 0x12d   :  { %v768_v21 = vmax.f32 %v754_v53, 0.0  ;;  %v804_v3 = vmax.f32 %v790_v35, 0.0  ;;  %4900 = vmatprep.mubr.msk.bf16.mxu1 %vm1039_vm2, %v827_v63  ;;  %v630_v4 = vadd.f32 %v612_v55, %v6543_v15  ;;  %v731_v59 = vadd.f32 %v713_v60, %v6517_v30  ;;  %v5667_v16 = vld [vmem:[%s7917_s4 + $0x290] ss:$8 sps:$4 sm:$0xff]   ;;  %v5675_v18 = vld [vmem:[%s7917_s4 + $0x274] ss:$8 sps:$4 sm:$0xff]  }
 0x12e   :  { %v6648_v25 = vadd.f32 %v6527_v51, %v730_v34  ;;  %1317 = vmatmul.mubr.bf16.gmra.mxu1 %v825_v48  ;;  %v775_v5 = vpack.c.bf16 %v767_v61, %v765_v31  ;;  %v614_v6 = vpop.f32.mrf.mxu0  ;;  %v715_v37 = vpop.f32.mrf.mxu1  ;;  %v6652_v7 = vpack.c.bf16 %v803_v2, %v801_v11  ;;  %v755_v54 = vadd.f32 %v6527_v51, %v629_v62  ;;  %v5673_v49 = vld [vmem:[%s7917_s4 + $0x270] ss:$8 sps:$4 sm:$0xff]   ;;  %v5678_v10 = vld [vmem:[%s7917_s4 + $0x264] ss:$8 sps:$4 sm:$0xff]   ;;  %v5676_v11 = vld [vmem:[%s7917_s4 + $0x260] ss:$8 sps:$4 sm:$0xff]  }
 0x12f   :  { %v776_v8 = vpack.c.bf16 %v768_v21, %v766_v12  ;;  %v6654_v9 = vpack.c.bf16 %v804_v3, %v802_v52  ;;  %1533 = vmatpush1.bf16.msra.mxu0 %v5652_v56  ;;  %v756_v15 = vadd.f32 %v6533_v27, %v630_v4  ;;  %v6662_v30 = vadd.f32 %v6533_v27, %v731_v59  ;;  %v5658_v27 = vld [vmem:[%s7917_s4 + $0x1e0] ss:$8 sps:$4 sm:$0xff]   ;;  %v5681_v12 = vld [vmem:[%s7917_s4 + $0x254] ss:$8 sps:$4 sm:$0xff]   ;;  %v5679_v43 = vld [vmem:[%s7917_s4 + $0x250] ss:$8 sps:$4 sm:$0xff]  }
 0x130   :  { %1534 = vmatprep.subr.bf16.mxu0 %v5657_v0  ;;  %v615_v14 = vpop.f32.mrf.mxu0  ;;  %v716_v19 = vpop.f32.mrf.mxu1  ;;  %v828_v28 = vrot.slane %v6652_v7, 4  ;;  %v769_v24 = vmax.f32 %v755_v54, 0.0  ;;  %v5684_v13 = vld [vmem:[%s7917_s4 + $0x244] ss:$8 sps:$4 sm:$0xff]   ;;  %v5682_v50 = vld [vmem:[%s7917_s4 + $0x240] ss:$8 sps:$4 sm:$0xff]  }
 0x131   :  { %v830_v20 = vrot.slane %v6654_v9, 4  ;;  %4867 = vmatprep.mubr.msk.bf16.mxu0 %vm1039_vm2, %v776_v8  ;;  %v770_v57 = vmax.f32 %v756_v15, 0.0  ;;  %v805_v32 = vmax.f32 %v6648_v25, 0.0  ;;  %v5688_v35 = vld [vmem:[%s7919_s6 + $0xa0] sm:$0xff]   ;;  %v5689_v56 = vld [vmem:[%s7919_s6 + $0x28] sm:$0xff]   ;;  %v5690_v61 = vld [vmem:[%s7919_s6 + $0x98] sm:$0xff]  }
 0x132   :  { %1105 = vmatmul.mubr.bf16.gmra.mxu0 %v775_v5  ;;  %v829_v31 = vsel %vm821_vm3, %v824_v47, %v828_v28  ;;  %v777_v44 = vpack.c.bf16 %v769_v24, %v769_v24  ;;  %v806_v47 = vmax.f32 %v6662_v30, 0.0  ;;  %v5691_v62 = vld [vmem:[%s7919_s6 + $0x20] sm:$0xff]   ;;  %v5692_v34 = vld [vmem:[%s7919_s6 + $0x90] sm:$0xff]   ;;  %v5693_v55 = vld [vmem:[%s7919_s6 + $0x18] sm:$0xff]  }
 0x133   :  { %1535 = vmatpush1.bf16.msra.mxu0 %v5655_v46  ;;  %v831_v51 = vsel %vm821_vm3, %v826_v17, %v830_v20  ;;  %v778_v26 = vpack.c.bf16 %v770_v57, %v770_v57  ;;  %v5670_v17 = vld [vmem:[%s7917_s4 + $0x280] ss:$8 sps:$4 sm:$0xff]   ;;  %v813_v53 = vpack.c.bf16 %v805_v32, %v805_v32  ;;  %v5695_v63 = vld [vmem:[%s7919_s6 + $0x10] sm:$0xff]   ;;  %v5698_v21 = vld [vmem:[%s7919_s6 + $0x78] sm:$0xff]  }
 0x134   :  { %4901 = vmatprep.mubr.msk.bf16.mxu1 %vm1039_vm2, %v831_v51  ;;  %1536 = vmatprep.subr.bf16.mxu0 %v5660_v41  ;;  %v814_v52 = vpack.c.bf16 %v806_v47, %v806_v47  ;;  %v5694_v60 = vld [vmem:[%s7919_s6 + $0x88] sm:$0xff]   ;;  %v5696_v0 = vld [vmem:[%s7919_s6 + $0x80] sm:$0xff]   ;;  %v5700_v48 = vld [vmem:[%s7919_s6 + $0x70] sm:$0xff]  }
 0x135   :  { %4868 = vmatprep.mubr.msk.bf16.mxu0 %vm1039_vm2, %v778_v26  ;;  %v5697_v2 = vld [vmem:[%s7919_s6 + $0x8] sm:$0xff]   ;;  %v5699_v3 = vld [vmem:[%s7919_s6] sm:$0xff]   ;;  %v5702_v4 = vld [vmem:[%s7919_s6 + $0xd8] sm:$0xff]  }
 0x136   :  { %1327 = vmatmul.mubr.bf16.gmra.mxu1 %v829_v31  ;;  %v5701_v25 = vld [vmem:[%s7919_s6 + $0x68] sm:$0xff]   ;;  %v5703_v59 = vld [vmem:[%s7919_s6 + $0x60] sm:$0xff]   ;;  %v5704_v5 = vld [vmem:[%s7919_s6 + $0xd0] sm:$0xff]  }
 0x137   :  { %4902 = vmatprep.mubr.msk.bf16.mxu1 %vm1039_vm2, %v830_v20  ;;  %1537 = vmatpush1.bf16.msra.mxu0 %v5658_v27  ;;  %v5705_v6 = vld [vmem:[%s7919_s6 + $0x58] sm:$0xff]   ;;  %v5706_v37 = vld [vmem:[%s7919_s6 + $0xc8] sm:$0xff]   ;;  %v5708_v8 = vld [vmem:[%s7919_s6 + $0xc0] sm:$0xff]  }
 0x138   :  { %1538 = vmatprep.subr.bf16.mxu0 %v5663_v40  ;;  %v5710_v46 = vld [vmem:[%s7919_s6 + $0xb8] sm:$0xff]   ;;  %v5711_v54 = vld [vmem:[%s7919_s6 + $0x40] sm:$0xff]   ;;  %v5712_v15 = vld [vmem:[%s7919_s6 + $0xb0] sm:$0xff]  }
 0x13a   :  { %1115 = vmatmul.mubr.bf16.gmra.mxu0 %v777_v44 }
 0x13b   :  { %1539 = vmatpush1.bf16.msra.mxu0 %v5661_v38  ;;  %4959 = vmatprep.mubr.msk.bf16.mxu0 %vm1039_vm2, %v6566_v39  ;;  %v5672_v39 = vld [vmem:[%s7917_s4 + $0x284] ss:$8 sps:$4 sm:$0xff]  }
 0x13c   :  { %1540 = vmatprep.subr.bf16.mxu0 %v5666_v45 }
 0x13e   :  { %1337 = vmatmul.mubr.bf16.gmra.mxu1 %v828_v28 }
 0x13f   :  { %1541 = vmatpush1.bf16.msra.mxu0 %v5664_v29 }
 0x140   :  { %1546 = vmatprep.subr.bf16.mxu0 %v5669_v33 }
 0x143   :  { %1547 = vmatpush2.bf16.msra.mxu0 %v5667_v16 }
 0x144   :  { %1548 = vmatprep.subr.bf16.mxu0 %v5672_v39 }
 0x147   :  { %1549 = vmatpush2.bf16.msra.mxu0 %v5670_v17 }
 0x148   :  { %1550 = vmatprep.subr.bf16.mxu0 %v5675_v18 }
 0x14b   :  { %1551 = vmatpush2.bf16.msra.mxu0 %v5673_v49 }
 0x14c   :  { %1552 = vmatprep.subr.bf16.mxu0 %v5678_v10 }
 0x14f   :  { %1553 = vmatpush2.bf16.msra.mxu0 %v5676_v11 }
 0x150   :  { %1554 = vmatprep.subr.bf16.mxu0 %v5681_v12 }
 0x153   :  { %1555 = vmatpush2.bf16.msra.mxu0 %v5679_v43 }
 0x154   :  { %1556 = vmatprep.subr.bf16.mxu0 %v5684_v13 }
 0x157   :  { %1557 = vmatpush2.bf16.msra.mxu0 %v5682_v50 }
 0x158   :  { %1935 = vmatprep.subr.bf16.mxu0 %v5995_v1 }
 0x15a   :  { %1559 = vmatmul.mubr.bf16.vlgmr.msra.gmra.mxu0 %v6557_v58  ;;  %v5685_v58 = vld [vmem:[%s7919_s6 + $0x38] sm:$0xff]  }
 0x15b   :  { %4960 = vmatprep.mubr.msk.bf16.mxu0 %vm1039_vm2, %v6612_v23  ;;  %1936 = vmatpush1.bf16.msra.mxu0 %v5685_v58  ;;  %v5687_v23 = vld [vmem:[%s7919_s6 + $0x30] sm:$0xff]  }
 0x15c   :  { %1937 = vmatprep.subr.bf16.mxu0 %v5995_v1 }
 0x15f   :  { %1938 = vmatpush1.bf16.msra.mxu0 %v5687_v23 }
 0x160   :  { %1939 = vmatprep.subr.bf16.mxu0 %v5995_v1 }
 0x162   :  { %1569 = vmatmul.mubr.bf16.gmra.mxu0 %v6610_v22  ;;  %v5686_v22 = vld [vmem:[%s7919_s6 + $0xa8] sm:$0xff]  }
 0x163   :  { %4961 = vmatprep.mubr.msk.bf16.mxu0 %vm1039_vm2, %v6654_v9  ;;  %1809 = vmatpush1.bf16.msra.mxu1 %v5686_v22  ;;  %v5709_v9 = vld [vmem:[%s7919_s6 + $0x48] sm:$0xff]  }
 0x164   :  { %1810 = vmatprep.subr.bf16.mxu1 %v5995_v1  ;;  %1940 = vmatpush1.bf16.msra.mxu0 %v5689_v56 }
 0x165   :  { %1941 = vmatprep.subr.bf16.mxu0 %v5995_v1 }
 0x167   :  { %1811 = vmatpush1.bf16.msra.mxu1 %v5688_v35 }
 0x168   :  { %1812 = vmatprep.subr.bf16.mxu1 %v5995_v1  ;;  %1942 = vmatpush1.bf16.msra.mxu0 %v5691_v62 }
 0x169   :  { %1943 = vmatprep.subr.bf16.mxu0 %v5995_v1 }
 0x16a   :  { %1579 = vmatmul.mubr.bf16.gmra.mxu0 %v6652_v7  ;;  %v5707_v7 = vld [vmem:[%s7919_s6 + $0x50] sm:$0xff]  }
 0x16b   :  { %4962 = vmatprep.mubr.msk.bf16.mxu0 %vm1039_vm2, %v814_v52  ;;  %1813 = vmatpush1.bf16.msra.mxu1 %v5690_v61 }
 0x16c   :  { %1814 = vmatprep.subr.bf16.mxu1 %v5995_v1  ;;  %1944 = vmatpush1.bf16.msra.mxu0 %v5693_v55 }
 0x16d   :  { %1945 = vmatprep.subr.bf16.mxu0 %v5995_v1 }
 0x16f   :  { %1815 = vmatpush1.bf16.msra.mxu1 %v5692_v34  ;;  %v1611_v34 = vld [vmem:[%s7920_s5] sm:$0x3] }
 0x170   :  { %1816 = vmatprep.subr.bf16.mxu1 %v5995_v1  ;;  %1946 = vmatpush1.bf16.msra.mxu0 %v5695_v63 }
 0x171   :  { %1947 = vmatprep.subr.bf16.mxu0 %v5995_v1 }
 0x172   :  { %1589 = vmatmul.mubr.bf16.gmra.mxu0 %v813_v53 }
 0x173   :  { %1817 = vmatpush1.bf16.msra.mxu1 %v5694_v60 }
 0x174   :  { %1818 = vmatprep.subr.bf16.mxu1 %v5995_v1  ;;  %1948 = vmatpush1.bf16.msra.mxu0 %v5697_v2  ;;  %v6867_v2 = vrot.slane %v1611_v34, %v6519_v36 }
 0x175   :  { %1949 = vmatprep.subr.bf16.mxu0 %v5995_v1 }
 0x177   :  { %1819 = vmatpush1.bf16.msra.mxu1 %v5696_v0 }
 0x178   :  { %1820 = vmatprep.subr.bf16.mxu1 %v5995_v1  ;;  %1950 = vmatpush1.bf16.msra.mxu0 %v5699_v3 }
 0x179   :  { %1955 = vmatprep.subr.bf16.mxu0 %v5995_v1 }
 0x17b   :  { %1821 = vmatpush1.bf16.msra.mxu1 %v5698_v21 }
 0x17c   :  { %1822 = vmatprep.subr.bf16.mxu1 %v5995_v1  ;;  %1956 = vmatpush2.bf16.msra.mxu0 %v5701_v25  ;;  %v6870_v25 = vrot.slane %v1611_v34, %v6524_v42 }
 0x17d   :  { %1957 = vmatprep.subr.bf16.mxu0 %v5995_v1 }
 0x17f   :  { %1823 = vmatpush1.bf16.msra.mxu1 %v5700_v48 }
 0x180   :  { %1828 = vmatprep.subr.bf16.mxu1 %v5995_v1  ;;  %1958 = vmatpush2.bf16.msra.mxu0 %v5703_v59 }
 0x181   :  { %1959 = vmatprep.subr.bf16.mxu0 %v5995_v1 }
 0x183   :  { %1829 = vmatpush2.bf16.msra.mxu1 %v5702_v4 }
 0x184   :  { %1830 = vmatprep.subr.bf16.mxu1 %v5995_v1  ;;  %1960 = vmatpush2.bf16.msra.mxu0 %v5705_v6 }
 0x185   :  { %1961 = vmatprep.subr.bf16.mxu0 %v5995_v1 }
 0x187   :  { %1831 = vmatpush2.bf16.msra.mxu1 %v5704_v5 }
 0x188   :  { %1832 = vmatprep.subr.bf16.mxu1 %v5995_v1  ;;  %1962 = vmatpush2.bf16.msra.mxu0 %v5707_v7 }
 0x189   :  { %1963 = vmatprep.subr.bf16.mxu0 %v5995_v1 }
 0x18b   :  { %1833 = vmatpush2.bf16.msra.mxu1 %v5706_v37 }
 0x18c   :  { %1834 = vmatprep.subr.bf16.mxu1 %v5995_v1  ;;  %1964 = vmatpush2.bf16.msra.mxu0 %v5709_v9 }
 0x18d   :  { %1965 = vmatprep.subr.bf16.mxu0 %v5995_v1 }
 0x18f   :  { %1835 = vmatpush2.bf16.msra.mxu1 %v5708_v8 }
 0x190   :  { %1836 = vmatprep.subr.bf16.mxu1 %v5995_v1  ;;  %1966 = vmatpush2.bf16.msra.mxu0 %v5711_v54 }
 0x191   :  { %2253 = vmatprep.subr.bf16.mxu0 %v5995_v1 }
 0x193   :  { %1837 = vmatpush2.bf16.msra.mxu1 %v5710_v46 }
 0x194   :  { %1838 = vmatprep.subr.bf16.mxu1 %v5995_v1 }
 0x197   :  { %1839 = vmatpush2.bf16.msra.mxu1 %v5712_v15 }
 0x198   :  { %2091 = vmatprep.subr.bf16.mxu1 %v5995_v1 }
 0x1e2   :  { %v1086_v30 = vpop.f32.mrf.mxu0 }
 0x1e4   :  { %v1088_v41 = vpop.f32.mrf.mxu0 }
 0x1e6   :  { %v1308_v14 = vpop.f32.mrf.mxu1  ;;  %v1090_v19 = vpop.f32.mrf.mxu0 }
 0x1e7   :  { %v1309_v55 = vadd.f32 %v1308_v14, %v1086_v30 }
 0x1e8   :  { %v1310_v20 = vpop.f32.mrf.mxu1  ;;  %v1092_v28 = vpop.f32.mrf.mxu0 }
 0x1e9   :  { %v1311_v63 = vadd.f32 %v1310_v20, %v1088_v41 }
 0x1ea   :  { %v1312_v57 = vpop.f32.mrf.mxu1  ;;  %v1096_v51 = vpop.f32.mrf.mxu0 }
 0x1eb   :  { %v1313_v3 = vadd.f32 %v1312_v57, %v1090_v19 }
 0x1ec   :  { %v1314_v27 = vpop.f32.mrf.mxu1  ;;  %v1098_v24 = vpop.f32.mrf.mxu0 }
 0x1ed   :  { %v1315_v59 = vadd.f32 %v1314_v27, %v1092_v28 }
 0x1ee   :  { %v1318_v26 = vpop.f32.mrf.mxu1  ;;  %v1100_v40 = vpop.f32.mrf.mxu0 }
 0x1ef   :  { %v1319_v31 = vadd.f32 %v1318_v26, %v1096_v51 }
 0x1f0   :  { %v1320_v38 = vpop.f32.mrf.mxu1  ;;  %v1102_v44 = vpop.f32.mrf.mxu0 }
 0x1f1   :  { %v1321_v54 = vadd.f32 %v1320_v38, %v1098_v24 }
 0x1f2   :  { %v1322_v45 = vpop.f32.mrf.mxu1  ;;  %v1106_v29 = vpop.f32.mrf.mxu0 }
 0x1f3   :  { %v1323_v33 = vadd.f32 %v1322_v45, %v1100_v40  ;;  %v5713_v45 = vld [vmem:[%s7919_s6 + $0x188] sm:$0xff]  }
 0x1f4   :  { %v1324_v16 = vpop.f32.mrf.mxu1  ;;  %v1108_v39 = vpop.f32.mrf.mxu0 }
 0x1f5   :  { %v1325_v26 = vadd.f32 %v1324_v16, %v1102_v44 }
 0x1f6   :  { %v1328_v17 = vpop.f32.mrf.mxu1  ;;  %v1110_v18 = vpop.f32.mrf.mxu0 }
 0x1f7   :  { %v6851_v49 = vadd.f32 %v1328_v17, %v1106_v29 }
 0x1f8   :  { %v1330_v10 = vpop.f32.mrf.mxu1  ;;  %v1112_v11 = vpop.f32.mrf.mxu0 }
 0x1f9   :  { %v6853_v12 = vadd.f32 %v1330_v10, %v1108_v39 }
 0x1fa   :  { %v1332_v43 = vpop.f32.mrf.mxu1  ;;  %v1116_v13 = vpop.f32.mrf.mxu0 }
 0x1fb   :  { %v6855_v50 = vadd.f32 %v1332_v43, %v1110_v18  ;;  %v5714_v18 = vld [vmem:[%s7919_s6 + $0x118] sm:$0xff]   ;;  %v5715_v43 = vld [vmem:[%s7919_s6 + $0x180] sm:$0xff]  }
 0x1fc   :  { %v1334_v47 = vpop.f32.mrf.mxu1  ;;  %v1118_v52 = vpop.f32.mrf.mxu0 }
 0x1fd   :  { %v6857_v32 = vadd.f32 %v1334_v47, %v1112_v11 }
 0x1fe   :  { %v1338_v53 = vpop.f32.mrf.mxu1  ;;  %v1120_v58 = vpop.f32.mrf.mxu0 }
 0x1ff   :  { %v6859_v22 = vadd.f32 %v1338_v53, %v1116_v13 }
 0x200   :  { %v1340_v23 = vpop.f32.mrf.mxu1  ;;  %v1121_v35 = vpop.f32.mrf.mxu0 }
 0x201   :  { %v6861_v56 = vadd.f32 %v1340_v23, %v1118_v52 }
 0x202   :  { %v1342_v61 = vpop.f32.mrf.mxu1 }
 0x204   :  { %v1343_v62 = vpop.f32.mrf.mxu1 }
 0x21a   :  { %v1560_v60 = vpop.f32.mrf.mxu0 }
 0x21b   :  { %v1597_v0 = vadd.f32 %v1560_v60, %v1309_v55  ;;  %v5717_v60 = vld [vmem:[%s7919_s6 + $0x178] sm:$0xff]  }
 0x21c   :  { %v1562_v21 = vpop.f32.mrf.mxu0 }
 0x21d   :  { %v1598_v48 = vadd.f32 %v1562_v21, %v1311_v63  ;;  %v1623_v6 = vadd.f32 %v6867_v2, %v1597_v0 }
 0x21e   :  { %v1564_v4 = vpop.f32.mrf.mxu0 }
 0x21f   :  { %v1599_v5 = vadd.f32 %v1564_v4, %v1313_v3  ;;  %v1624_v7 = vadd.f32 %v6870_v25, %v1598_v48  ;;  %v1637_v41 = vmax.f32 %v1623_v6, 0.0 }
 0x220   :  { %v1566_v37 = vpop.f32.mrf.mxu0 }
 0x221   :  { %v1625_v8 = vadd.f32 %v6867_v2, %v1599_v5  ;;  %v1600_v9 = vadd.f32 %v1566_v37, %v1315_v59  ;;  %v1638_v20 = vmax.f32 %v1624_v7, 0.0 }
 0x222   :  { %v1570_v46 = vpop.f32.mrf.mxu0 }
 0x223   :  { %v1639_v15 = vmax.f32 %v1625_v8, 0.0  ;;  %v1626_v30 = vadd.f32 %v6870_v25, %v1600_v9  ;;  %v1601_v14 = vadd.f32 %v1570_v46, %v1319_v31 }
 0x224   :  { %v1572_v19 = vpop.f32.mrf.mxu0 }
 0x225   :  { %v1640_v57 = vmax.f32 %v1626_v30, 0.0  ;;  %v1602_v28 = vadd.f32 %v1572_v19, %v1321_v54  ;;  %v1651_v51 = vpack.c.bf16 %v1639_v15, %v1637_v41  ;;  %v1627_v29 = vadd.f32 %v6867_v2, %v1601_v14  ;;  %v5724_v19 = vld [vmem:[%s7919_s6 + $0xf0] sm:$0xff]  }
 0x226   :  { %v1574_v27 = vpop.f32.mrf.mxu0 }
 0x227   :  { %v1652_v40 = vpack.c.bf16 %v1640_v57, %v1638_v20  ;;  %v1603_v24 = vadd.f32 %v1574_v27, %v1323_v33  ;;  %v1628_v17 = vadd.f32 %v6870_v25, %v1602_v28  ;;  %v1718_v44 = vrot.slane %v1651_v51, 4  ;;  %v5725_v20 = vld [vmem:[%s7919_s6 + $0x158] sm:$0xff]   ;;  %v5726_v57 = vld [vmem:[%s7919_s6 + $0xe8] sm:$0xff]   ;;  %v5727_v28 = vld [vmem:[%s7919_s6 + $0x150] sm:$0xff]  }
 0x228   :  { %v1576_v38 = vpop.f32.mrf.mxu0  ;;  %v1641_v13 = vmax.f32 %v1627_v29, 0.0  ;;  %v5729_v27 = vld [vmem:[%s7919_s6 + $0x1b8] sm:$0xff]   ;;  %v5733_v29 = vld [vmem:[%s7919_s6 + $0x1a8] sm:$0xff]  }
 0x229   :  { %v1719_v39 = vrot.slane %v1652_v40, 4  ;;  %v1604_v31 = vadd.f32 %v1576_v38, %v1325_v26  ;;  %5020 = vmatprep.mubr.msk.bf16.mxu0 %vm1039_vm2, %v1652_v40  ;;  %v1629_v16 = vadd.f32 %v6867_v2, %v1603_v24  ;;  %v1642_v53 = vmax.f32 %v1628_v17, 0.0  ;;  %v5730_v26 = vld [vmem:[%s7919_s6 + $0x148] sm:$0xff]   ;;  %v5731_v40 = vld [vmem:[%s7919_s6 + $0x1b0] sm:$0xff]   ;;  %v5734_v24 = vld [vmem:[%s7919_s6 + $0x138] sm:$0xff]  }
 0x22a   :  { %v1580_v10 = vpop.f32.mrf.mxu0  ;;  %1968 = vmatmul.mubr.bf16.vlgmr.msra.gmra.mxu0 %v1651_v51  ;;  %v5728_v51 = vld [vmem:[%s7919_s6 + $0xe0] sm:$0xff]   ;;  %v5737_v17 = vld [vmem:[%s7919_s6 + $0x198] sm:$0xff]  }
 0x22b   :  { %v1630_v11 = vadd.f32 %v6870_v25, %v1604_v31  ;;  %v1605_v33 = vadd.f32 %v1580_v10, %v6851_v49  ;;  %2254 = vmatpush1.bf16.msra.mxu0 %v5713_v45  ;;  %5005 = vmatprep.mubr.msk.bf16.mxu1 %vm1039_vm2, %v1719_v39  ;;  %v1643_v47 = vmax.f32 %v1629_v16, 0.0  ;;  %v5716_v49 = vld [vmem:[%s7919_s6 + $0x110] sm:$0xff]   ;;  %v5732_v45 = vld [vmem:[%s7919_s6 + $0x140] sm:$0xff]   ;;  %v5738_v31 = vld [vmem:[%s7919_s6 + $0x128] sm:$0xff]  }
 0x22c   :  { %v1582_v52 = vpop.f32.mrf.mxu0  ;;  %1841 = vmatmul.mubr.bf16.vlgmr.msra.gmra.mxu1 %v1718_v44  ;;  %2255 = vmatprep.subr.bf16.mxu0 %v5995_v1  ;;  %v5735_v38 = vld [vmem:[%s7919_s6 + $0x1a0] sm:$0xff]   ;;  %v5736_v39 = vld [vmem:[%s7919_s6 + $0x130] sm:$0xff]   ;;  %v5741_v16 = vld [vmem:[%s7919_s6 + $0x268] sm:$0xff]  }
 0x22d   :  { %v1644_v58 = vmax.f32 %v1630_v11, 0.0  ;;  %v1631_v23 = vadd.f32 %v6867_v2, %v1605_v33  ;;  %v1606_v35 = vadd.f32 %v1582_v52, %v6853_v12  ;;  %2092 = vmatpush1.bf16.msra.mxu1 %v5714_v18  ;;  %v6898_v61 = vpack.c.bf16 %v1643_v47, %v1641_v13  ;;  %v5739_v18 = vld [vmem:[%s7919_s6 + $0x190] sm:$0xff]   ;;  %v5740_v44 = vld [vmem:[%s7919_s6 + $0x120] sm:$0xff]   ;;  %v5742_v33 = vld [vmem:[%s7919_s6 + $0x1f8] sm:$0xff]  }
 0x22e   :  { %v1584_v62 = vpop.f32.mrf.mxu0  ;;  %2093 = vmatprep.subr.bf16.mxu1 %v5995_v1  ;;  %v5744_v13 = vld [vmem:[%s7919_s6 + $0x1f0] sm:$0xff]   ;;  %v5745_v47 = vld [vmem:[%s7919_s6 + $0x258] sm:$0xff]   ;;  %v5746_v52 = vld [vmem:[%s7919_s6 + $0x1e8] sm:$0xff]  }
 0x22f   :  { %v1654_v34 = vpack.c.bf16 %v1644_v58, %v1642_v53  ;;  %v1607_v55 = vadd.f32 %v1584_v62, %v6855_v50  ;;  %2256 = vmatpush1.bf16.msra.mxu0 %v5715_v43  ;;  %v1632_v12 = vadd.f32 %v6870_v25, %v1606_v35  ;;  %v5718_v50 = vld [vmem:[%s7919_s6 + $0x108] sm:$0xff]   ;;  %v1645_v4 = vmax.f32 %v1631_v23, 0.0  ;;  %v5743_v43 = vld [vmem:[%s7919_s6 + $0x260] sm:$0xff]   ;;  %v5747_v53 = vld [vmem:[%s7919_s6 + $0x250] sm:$0xff]  }
 0x230   :  { %v1586_v63 = vpop.f32.mrf.mxu0  ;;  %2257 = vmatprep.subr.bf16.mxu0 %v5995_v1  ;;  %v2163_v10 = vrot.slane %v6898_v61, 4  ;;  %v5748_v58 = vld [vmem:[%s7919_s6 + $0x1e0] sm:$0xff]   ;;  %v5749_v23 = vld [vmem:[%s7919_s6 + $0x248] sm:$0xff]   ;;  %v5750_v35 = vld [vmem:[%s7919_s6 + $0x1d8] sm:$0xff]  }
 0x231   :  { %v2164_v0 = vrot.slane %v1654_v34, 4  ;;  %v1633_v21 = vadd.f32 %v6867_v2, %v1607_v55  ;;  %v1608_v3 = vadd.f32 %v1586_v63, %v6857_v32  ;;  %2094 = vmatpush1.bf16.msra.mxu1 %v5716_v49  ;;  %5063 = vmatprep.mubr.msk.bf16.mxu1 %vm1039_vm2, %v1654_v34  ;;  %v5719_v32 = vld [vmem:[%s7919_s6 + $0x170] sm:$0xff]   ;;  %v1646_v37 = vmax.f32 %v1632_v12, 0.0  ;;  %v5751_v49 = vld [vmem:[%s7919_s6 + $0x240] sm:$0xff]   ;;  %v5753_v62 = vld [vmem:[%s7919_s6 + $0x238] sm:$0xff]  }
 0x232   :  { %v1590_v48 = vpop.f32.mrf.mxu0  ;;  %2095 = vmatprep.subr.bf16.mxu1 %v5995_v1  ;;  %v5754_v34 = vld [vmem:[%s7919_s6 + $0x1c8] sm:$0xff]   ;;  %v5755_v55 = vld [vmem:[%s7919_s6 + $0x230] sm:$0xff]   ;;  %v5757_v12 = vld [vmem:[%s7919_s6 + $0x298] sm:$0xff]  }
 0x233   :  { %v1647_v59 = vmax.f32 %v1633_v21, 0.0  ;;  %v1634_v5 = vadd.f32 %v6870_v25, %v1608_v3  ;;  %v1609_v6 = vadd.f32 %v1590_v48, %v6859_v22  ;;  %2258 = vmatpush1.bf16.msra.mxu0 %v5717_v60  ;;  %5106 = vmatprep.mubr.msk.bf16.mxu0 %vm1039_vm2, %v2164_v0  ;;  %v5720_v22 = vld [vmem:[%s7919_s6 + $0x100] sm:$0xff]   ;;  %v5758_v63 = vld [vmem:[%s7919_s6 + $0x228] sm:$0xff]   ;;  %v5759_v0 = vld [vmem:[%s7919_s6 + $0x290] sm:$0xff]  }
 0x234   :  { %v1592_v7 = vpop.f32.mrf.mxu0  ;;  %2259 = vmatprep.subr.bf16.mxu0 %v5995_v1  ;;  %v5756_v60 = vld [vmem:[%s7919_s6 + $0x1c0] sm:$0xff]   ;;  %v5761_v3 = vld [vmem:[%s7919_s6 + $0x288] sm:$0xff]  }
 0x235   :  { %v6921_v8 = vpack.c.bf16 %v1647_v59, %v1645_v4  ;;  %v1648_v9 = vmax.f32 %v1634_v5, 0.0  ;;  %v6924_v46 = vadd.f32 %v6867_v2, %v1609_v6  ;;  %v1610_v54 = vadd.f32 %v1592_v7, %v6861_v56  ;;  %2096 = vmatpush1.bf16.msra.mxu1 %v5718_v50  ;;  %v5721_v2 = vld [vmem:[%s7919_s6 + $0x168] sm:$0xff]   ;;  %v5722_v56 = vld [vmem:[%s7919_s6 + $0xf8] sm:$0xff]   ;;  %v5760_v21 = vld [vmem:[%s7919_s6 + $0x220] sm:$0xff]  }
 0x236   :  { %v1594_v15 = vpop.f32.mrf.mxu0  ;;  %2097 = vmatprep.subr.bf16.mxu1 %v5995_v1  ;;  %v5762_v50 = vld [vmem:[%s7919_s6 + $0x218] sm:$0xff]   ;;  %v5763_v48 = vld [vmem:[%s7919_s6 + $0x280] sm:$0xff]   ;;  %v5764_v4 = vld [vmem:[%s7919_s6 + $0x210] sm:$0xff]  }
 0x237   :  { %v6931_v30 = vpack.c.bf16 %v1648_v9, %v1646_v37  ;;  %v6934_v41 = vadd.f32 %v6870_v25, %v1610_v54  ;;  %2260 = vmatpush1.bf16.msra.mxu0 %v5719_v32  ;;  %v5723_v25 = vld [vmem:[%s7919_s6 + $0x160] sm:$0xff]   ;;  %v5765_v59 = vld [vmem:[%s7919_s6 + $0x278] sm:$0xff]   ;;  %v5766_v5 = vld [vmem:[%s7919_s6 + $0x208] sm:$0xff]   ;;  %v2482_v7 = vrot.slane %v6921_v8, 4 }
 0x238   :  { %v1595_v14 = vpop.f32.mrf.mxu0  ;;  %2261 = vmatprep.subr.bf16.mxu0 %v5995_v1  ;;  %v5767_v6 = vld [vmem:[%s7919_s6 + $0x270] sm:$0xff]   ;;  %v5768_v32 = vld [vmem:[%s7919_s6 + $0x200] sm:$0xff]   ;;  %v5769_v9 = vld [vmem:[%s7919_s6 + $0x2d8] sm:$0xff]  }
 0x239   :  { %2098 = vmatpush1.bf16.msra.mxu1 %v5720_v22  ;;  %v2483_v11 = vrot.slane %v6931_v30, 4  ;;  %v1650_v37 = vmax.f32 %v6934_v41, 0.0  ;;  %v5770_v22 = vld [vmem:[%s7919_s6 + $0x2d0] sm:$0xff]   ;;  %v5771_v15 = vld [vmem:[%s7919_s6 + $0x2c8] sm:$0xff]   ;;  %v5776_v14 = vld [vmem:[%s7919_s6 + $0x2a0] sm:$0xff]  }
 0x23a   :  { %2099 = vmatprep.subr.bf16.mxu1 %v5995_v1  ;;  %v5774_v41 = vld [vmem:[%s7919_s6 + $0x2b0] sm:$0xff]  }
 0x23b   :  { %2262 = vmatpush1.bf16.msra.mxu0 %v5721_v2  ;;  %v1658_v54 = vpack.c.bf16 %v1650_v37, %v1650_v37  ;;  %v5775_v2 = vld [vmem:[%s7919_s6 + $0x2a8] sm:$0xff]   ;;  %v2797_v37 = vld [vmem:[%s7921_s8] sm:$0xff] }
 0x23c   :  { %2263 = vmatprep.subr.bf16.mxu0 %v5995_v1 }
 0x23d   :  { %2100 = vmatpush1.bf16.msra.mxu1 %v5722_v56  ;;  %v5777_v56 = vld [vmem:[%s7919_s6 + $0x308] sm:$0xff]  }
 0x23e   :  { %2101 = vmatprep.subr.bf16.mxu1 %v5995_v1 }
 0x23f   :  { %2264 = vmatpush1.bf16.msra.mxu0 %v5723_v25  ;;  %v5778_v25 = vld [vmem:[%s7919_s6 + $0x300] sm:$0xff]  }
 0x240   :  { %2265 = vmatprep.subr.bf16.mxu0 %v5995_v1 }
 0x241   :  { %2102 = vmatpush1.bf16.msra.mxu1 %v5724_v19  ;;  %v5779_v19 = vld [vmem:[%s7919_s6 + $0x2f8] sm:$0xff]  }
 0x242   :  { %2103 = vmatprep.subr.bf16.mxu1 %v5995_v1 }
 0x243   :  { %2266 = vmatpush1.bf16.msra.mxu0 %v5725_v20  ;;  %v5780_v20 = vld [vmem:[%s7919_s6 + $0x2f0] sm:$0xff]  }
 0x244   :  { %2267 = vmatprep.subr.bf16.mxu0 %v5995_v1 }
 0x245   :  { %2104 = vmatpush1.bf16.msra.mxu1 %v5726_v57  ;;  %v5781_v57 = vld [vmem:[%s7919_s6 + $0x2e8] sm:$0xff]  }
 0x246   :  { %2105 = vmatprep.subr.bf16.mxu1 %v5995_v1 }
 0x247   :  { %2268 = vmatpush1.bf16.msra.mxu0 %v5727_v28  ;;  %v5782_v28 = vld [vmem:[%s7919_s6 + $0x2e0] sm:$0xff]  }
 0x248   :  { %2273 = vmatprep.subr.bf16.mxu0 %v5995_v1 }
 0x249   :  { %2106 = vmatpush1.bf16.msra.mxu1 %v5728_v51  ;;  %v1649_v51 = vmax.f32 %v6924_v46, 0.0 }
 0x24a   :  { %2111 = vmatprep.subr.bf16.mxu1 %v5995_v1 }
 0x24b   :  { %2274 = vmatpush2.bf16.msra.mxu0 %v5729_v27  ;;  %v1657_v27 = vpack.c.bf16 %v1649_v51, %v1649_v51 }
 0x24c   :  { %2275 = vmatprep.subr.bf16.mxu0 %v5995_v1 }
 0x24d   :  { %2112 = vmatpush2.bf16.msra.mxu1 %v5730_v26 }
 0x24e   :  { %2113 = vmatprep.subr.bf16.mxu1 %v5995_v1 }
 0x24f   :  { %2276 = vmatpush2.bf16.msra.mxu0 %v5731_v40 }
 0x250   :  { %2277 = vmatprep.subr.bf16.mxu0 %v5995_v1 }
 0x251   :  { %2114 = vmatpush2.bf16.msra.mxu1 %v5732_v45 }
 0x252   :  { %2115 = vmatprep.subr.bf16.mxu1 %v5995_v1 }
 0x253   :  { %2278 = vmatpush2.bf16.msra.mxu0 %v5733_v29 }
 0x254   :  { %2279 = vmatprep.subr.bf16.mxu0 %v5995_v1 }
 0x255   :  { %2116 = vmatpush2.bf16.msra.mxu1 %v5734_v24 }
 0x256   :  { %2117 = vmatprep.subr.bf16.mxu1 %v5995_v1 }
 0x257   :  { %2280 = vmatpush2.bf16.msra.mxu0 %v5735_v38 }
 0x258   :  { %2281 = vmatprep.subr.bf16.mxu0 %v5995_v1 }
 0x259   :  { %2118 = vmatpush2.bf16.msra.mxu1 %v5736_v39 }
 0x25a   :  { %2119 = vmatprep.subr.bf16.mxu1 %v5995_v1 }
 0x25b   :  { %2282 = vmatpush2.bf16.msra.mxu0 %v5737_v17 }
 0x25c   :  { %2283 = vmatprep.subr.bf16.mxu0 %v5995_v1 }
 0x25d   :  { %2120 = vmatpush2.bf16.msra.mxu1 %v5738_v31 }
 0x25e   :  { %2121 = vmatprep.subr.bf16.mxu1 %v5995_v1 }
 0x25f   :  { %2284 = vmatpush2.bf16.msra.mxu0 %v5739_v18 }
 0x260   :  { %2572 = vmatprep.subr.bf16.mxu0 %v5995_v1 }
 0x261   :  { %2122 = vmatpush2.bf16.msra.mxu1 %v5740_v44 }
 0x262   :  { %2286 = vmatmul.mubr.bf16.vlgmr.msra.gmra.mxu0 %v2163_v10  ;;  %2410 = vmatprep.subr.bf16.mxu1 %v5995_v1 }
 0x263   :  { %2573 = vmatpush1.bf16.msra.mxu0 %v5741_v16  ;;  %5192 = vmatprep.mubr.msk.bf16.mxu0 %vm1039_vm2, %v2483_v11 }
 0x264   :  { %2124 = vmatmul.mubr.bf16.vlgmr.msra.gmra.mxu1 %v6898_v61  ;;  %2574 = vmatprep.subr.bf16.mxu0 %v5995_v1  ;;  %v5752_v61 = vld [vmem:[%s7919_s6 + $0x1d0] sm:$0xff]  }
 0x265   :  { %2411 = vmatpush1.bf16.msra.mxu1 %v5742_v33  ;;  %5149 = vmatprep.mubr.msk.bf16.mxu1 %vm1039_vm2, %v6931_v30  ;;  %v5773_v30 = vld [vmem:[%s7919_s6 + $0x2b8] sm:$0xff]  }
 0x266   :  { %2412 = vmatprep.subr.bf16.mxu1 %v5995_v1 }
 0x267   :  { %2575 = vmatpush1.bf16.msra.mxu0 %v5743_v43 }
 0x268   :  { %2576 = vmatprep.subr.bf16.mxu0 %v5995_v1 }
 0x269   :  { %2413 = vmatpush1.bf16.msra.mxu1 %v5744_v13 }
 0x26a   :  { %2414 = vmatprep.subr.bf16.mxu1 %v5995_v1 }
 0x26b   :  { %2577 = vmatpush1.bf16.msra.mxu0 %v5745_v47 }
 0x26c   :  { %2578 = vmatprep.subr.bf16.mxu0 %v5995_v1 }
 0x26d   :  { %2415 = vmatpush1.bf16.msra.mxu1 %v5746_v52  ;;  %v5241_v52 = vld [vmem:[%s7921_s8 + $0x8] sm:$0xff] }
 0x26e   :  { %2416 = vmatprep.subr.bf16.mxu1 %v5995_v1 }
 0x26f   :  { %2579 = vmatpush1.bf16.msra.mxu0 %v5747_v53  ;;  %v5243_v53 = vcombine.high %v5241_v52, %v5241_v52 }
 0x270   :  { %2580 = vmatprep.subr.bf16.mxu0 %v5995_v1 }
 0x271   :  { %2417 = vmatpush1.bf16.msra.mxu1 %v5748_v58  ;;  %v5242_v58 = vcombine.low %v5241_v52, %v5241_v52  ;;  %v5803_v52 = vld [vmem:[%s7924_s10 + $0x130] ss:$8 sps:$4 sm:$0xff]  }
 0x272   :  { %2418 = vmatprep.subr.bf16.mxu1 %v5995_v1 }
 0x273   :  { %2581 = vmatpush1.bf16.msra.mxu0 %v5749_v23  ;;  %v2876_v23 = vsel %vm821_vm3, %v5242_v58, 0  ;;  %v5811_v58 = vld [vmem:[%s7924_s10 + $0x124] ss:$8 sps:$4 sm:$0xff]  }
 0x274   :  { %2582 = vmatprep.subr.bf16.mxu0 %v5995_v1 }
 0x275   :  { %2419 = vmatpush1.bf16.msra.mxu1 %v5750_v35 }
 0x276   :  { %2420 = vmatprep.subr.bf16.mxu1 %v5995_v1 }
 0x277   :  { %2583 = vmatpush1.bf16.msra.mxu0 %v5751_v49 }
 0x278   :  { %2584 = vmatprep.subr.bf16.mxu0 %v5995_v1 }
 0x279   :  { %2421 = vmatpush1.bf16.msra.mxu1 %v5752_v61 }
 0x27a   :  { %2422 = vmatprep.subr.bf16.mxu1 %v5995_v1 }
 0x27b   :  { %2585 = vmatpush1.bf16.msra.mxu0 %v5753_v62 }
 0x27c   :  { %2586 = vmatprep.subr.bf16.mxu0 %v5995_v1 }
 0x27d   :  { %2423 = vmatpush1.bf16.msra.mxu1 %v5754_v34 }
 0x27e   :  { %2424 = vmatprep.subr.bf16.mxu1 %v5995_v1 }
 0x27f   :  { %2587 = vmatpush1.bf16.msra.mxu0 %v5755_v55 }
 0x280   :  { %2592 = vmatprep.subr.bf16.mxu0 %v5995_v1 }
 0x281   :  { %2425 = vmatpush1.bf16.msra.mxu1 %v5756_v60 }
 0x282   :  { %2430 = vmatprep.subr.bf16.mxu1 %v5995_v1 }
 0x283   :  { %2593 = vmatpush2.bf16.msra.mxu0 %v5757_v12 }
 0x284   :  { %2594 = vmatprep.subr.bf16.mxu0 %v5995_v1 }
 0x285   :  { %2431 = vmatpush2.bf16.msra.mxu1 %v5758_v63 }
 0x286   :  { %2432 = vmatprep.subr.bf16.mxu1 %v5995_v1 }
 0x287   :  { %2595 = vmatpush2.bf16.msra.mxu0 %v5759_v0 }
 0x288   :  { %2596 = vmatprep.subr.bf16.mxu0 %v5995_v1 }
 0x289   :  { %2433 = vmatpush2.bf16.msra.mxu1 %v5760_v21 }
 0x28a   :  { %2434 = vmatprep.subr.bf16.mxu1 %v5995_v1 }
 0x28b   :  { %2597 = vmatpush2.bf16.msra.mxu0 %v5761_v3  ;;  %v5236_v3 = vld [vmem:[%s7922_s7] ss:$0 sm:$0xff] }
 0x28c   :  { %2598 = vmatprep.subr.bf16.mxu0 %v5995_v1 }
 0x28d   :  { %2435 = vmatpush2.bf16.msra.mxu1 %v5762_v50 }
 0x28e   :  { %2436 = vmatprep.subr.bf16.mxu1 %v5995_v1 }
 0x28f   :  { %2599 = vmatpush2.bf16.msra.mxu0 %v5763_v48 }
 0x290   :  { %2600 = vmatprep.subr.bf16.mxu0 %v5995_v1 }
 0x291   :  { %2437 = vmatpush2.bf16.msra.mxu1 %v5764_v4 }
 0x292   :  { %2438 = vmatprep.subr.bf16.mxu1 %v5995_v1 }
 0x293   :  { %2601 = vmatpush2.bf16.msra.mxu0 %v5765_v59 }
 0x294   :  { %2602 = vmatprep.subr.bf16.mxu0 %v5995_v1 }
 0x295   :  { %2439 = vmatpush2.bf16.msra.mxu1 %v5766_v5 }
 0x296   :  { %2440 = vmatprep.subr.bf16.mxu1 %v5995_v1 }
 0x297   :  { %2603 = vmatpush2.bf16.msra.mxu0 %v5767_v6 }
 0x299   :  { %2441 = vmatpush2.bf16.msra.mxu1 %v5768_v32 }
 0x29a   :  { %2605 = vmatmul.mubr.bf16.vlgmr.msra.gmra.mxu0 %v2482_v7  ;;  %2729 = vmatprep.subr.bf16.mxu1 %v5995_v1  ;;  %v5238_v7 = vcombine.high %v2797_v37, %v2797_v37 }
 0x29b   :  { %2855 = vmatprep.mubr.bf16.mxu0 %v5995_v1 }
 0x29c   :  { %2443 = vmatmul.mubr.bf16.vlgmr.msra.gmra.mxu1 %v6921_v8  ;;  %v5772_v8 = vld [vmem:[%s7919_s6 + $0x2c0] sm:$0xff]   ;;  %5239 = vmatprep.subr.msk.bf16.mxu0 %vm821_vm3, %v5238_v7  ;;  %v5839_v7 = vld [vmem:[%s7924_s10 + $0x1b0] ss:$8 sps:$4 sm:$0xff]  }
 0x29d   :  { %2730 = vmatpush1.bf16.msra.mxu1 %v5769_v9  ;;  %5235 = vmatprep.mubr.msk.bf16.mxu1 %vm1039_vm2, %v1658_v54  ;;  %v5237_v9 = vcombine.low %v2797_v37, %v2797_v37  ;;  %v5842_v37 = vld [vmem:[%s7924_s10 + $0x10] ss:$8 sps:$4 sm:$0xff]  }
 0x29e   :  { %2731 = vmatprep.subr.bf16.mxu1 %v5995_v1 }
 0x29f   :  { %v2818_v54 = vsel %vm821_vm3, %v5237_v9, 0  ;;  %v5850_v9 = vld [vmem:[%s7924_s10 + $0x4] ss:$8 sps:$4 sm:$0xff]  }
 0x2a0   :  { %2838 = vmatpush1.bf16.msra.mxu0 %v2818_v54  ;;  %v5847_v54 = vld [vmem:[%s7924_s10 + $0x1a4] ss:$8 sps:$4 sm:$0xff]  }
 0x2a1   :  { %2732 = vmatpush1.bf16.msra.mxu1 %v5770_v22  ;;  %v5246_v22 = vld [vmem:[%s7921_s8 + $0x10] sm:$0xff] }
 0x2a2   :  { %2733 = vmatprep.subr.bf16.mxu1 %v5995_v1 }
 0x2a5   :  { %2734 = vmatpush1.bf16.msra.mxu1 %v5771_v15  ;;  %v5251_v15 = vld [vmem:[%s7921_s8 + $0x18] sm:$0xff] }
 0x2a6   :  { %2735 = vmatprep.subr.bf16.mxu1 %v5995_v1 }
 0x2a9   :  { %2736 = vmatpush1.bf16.msra.mxu1 %v5772_v8  ;;  %v5248_v8 = vcombine.high %v5246_v22, %v5246_v22 }
 0x2aa   :  { %2737 = vmatprep.subr.bf16.mxu1 %v5995_v1 }
 0x2ab   :  { %5249 = vmatprep.subr.msk.bf16.mxu0 %vm821_vm3, %v5248_v8  ;;  %v5856_v8 = vld [vmem:[%s7924_s10 + $0xd4] ss:$8 sps:$4 sm:$0xff]  }
 0x2ad   :  { %2738 = vmatpush1.bf16.msra.mxu1 %v5773_v30  ;;  %v5253_v30 = vcombine.high %v5251_v15, %v5251_v15 }
 0x2ae   :  { %2739 = vmatprep.subr.bf16.mxu1 %v5995_v1 }
 0x2b1   :  { %2740 = vmatpush1.bf16.msra.mxu1 %v5774_v41 }
 0x2b2   :  { %2741 = vmatprep.subr.bf16.mxu1 %v5995_v1 }
 0x2b5   :  { %2742 = vmatpush1.bf16.msra.mxu1 %v5775_v2  ;;  %v2785_v2 = vld [vmem:[%s7925_s1] sm:$0xff] }
 0x2b6   :  { %2743 = vmatprep.subr.bf16.mxu1 %v5995_v1 }
 0x2b9   :  { %2744 = vmatpush1.bf16.msra.mxu1 %v5776_v14 }
 0x2ba   :  { %2749 = vmatprep.subr.bf16.mxu1 %v5995_v1 }
 0x2bd   :  { %2750 = vmatpush2.bf16.msra.mxu1 %v5777_v56 }
 0x2be   :  { %2751 = vmatprep.subr.bf16.mxu1 %v5995_v1 }
 0x2c1   :  { %2752 = vmatpush2.bf16.msra.mxu1 %v5778_v25  ;;  %v5247_v25 = vcombine.low %v5246_v22, %v5246_v22  ;;  %v5848_v22 = vld [vmem:[%s7924_s10] ss:$8 sps:$4 sm:$0xff]  }
 0x2c2   :  { %2753 = vmatprep.subr.bf16.mxu1 %v5995_v1 }
 0x2c5   :  { %2754 = vmatpush2.bf16.msra.mxu1 %v5779_v19  ;;  %v5252_v19 = vcombine.low %v5251_v15, %v5251_v15  ;;  %v5845_v15 = vld [vmem:[%s7924_s10 + $0x1a0] ss:$8 sps:$4 sm:$0xff]  }
 0x2c6   :  { %2755 = vmatprep.subr.bf16.mxu1 %v5995_v1 }
 0x2c9   :  { %2756 = vmatpush2.bf16.msra.mxu1 %v5780_v20 }
 0x2ca   :  { %2757 = vmatprep.subr.bf16.mxu1 %v5995_v1 }
 0x2cd   :  { %2758 = vmatpush2.bf16.msra.mxu1 %v5781_v57  ;;  %v5256_v57 = vld [vmem:[%s7921_s8 + $0x20] sm:$0xff] }
 0x2ce   :  { %2759 = vmatprep.subr.bf16.mxu1 %v5995_v1 }
 0x2d1   :  { %2760 = vmatpush2.bf16.msra.mxu1 %v5782_v28  ;;  %v5261_v28 = vld [vmem:[%s7921_s8 + $0x28] sm:$0xff] }
 0x2d2   :  { %5244 = vmatprep.subr.msk.bf16.mxu1 %vm821_vm3, %v5243_v53  ;;  %v5814_v53 = vld [vmem:[%s7924_s10 + $0x64] ss:$8 sps:$4 sm:$0xff]  }
 0x2d4   :  { %2762 = vmatmul.mubr.bf16.vlgmr.msra.gmra.mxu1 %v1657_v27 }
 0x2d5   :  { %2913 = vmatprep.mubr.bf16.mxu1 %v5995_v1  ;;  %2896 = vmatpush1.bf16.msra.mxu1 %v2876_v23  ;;  %v5812_v23 = vld [vmem:[%s7924_s10 + $0x60] ss:$8 sps:$4 sm:$0xff]  }
 0x2d6   :  { %5254 = vmatprep.subr.msk.bf16.mxu1 %vm821_vm3, %v5253_v30  ;;  %v5853_v30 = vld [vmem:[%s7924_s10 + $0x194] ss:$8 sps:$4 sm:$0xff]  }
 0x2ea   :  { %v1969_v26 = vpop.f32.mrf.mxu0 }
 0x2ec   :  { %v1842_v40 = vpop.f32.mrf.mxu1  ;;  %v1971_v45 = vpop.f32.mrf.mxu0 }
 0x2ed   :  { %v1970_v29 = vadd.f32 %v1969_v26, %v1842_v40  ;;  %v2934_v26 = vsel %vm821_vm3, %v5247_v25, 0  ;;  %v2992_v40 = vsel %vm821_vm3, %v5252_v19, 0  ;;  %v5258_v45 = vcombine.high %v5256_v57, %v5256_v57  ;;  %v5862_v25 = vld [vmem:[%s7924_s10 + $0xc4] ss:$8 sps:$4 sm:$0xff]   ;;  %v5860_v19 = vld [vmem:[%s7924_s10 + $0xc0] ss:$8 sps:$4 sm:$0xff]  }
 0x2ee   :  { %v1844_v24 = vpop.f32.mrf.mxu1  ;;  %v1972_v38 = vpop.f32.mrf.mxu0 }
 0x2ef   :  { %v5257_v24 = vcombine.low %v5256_v57, %v5256_v57  ;;  %v5262_v38 = vcombine.low %v5261_v28, %v5261_v28  ;;  %v5863_v57 = vld [vmem:[%s7924_s10 + $0x170] ss:$8 sps:$4 sm:$0xff]  }
 0x2f0   :  { %v1845_v39 = vpop.f32.mrf.mxu1  ;;  %v1973_v17 = vpop.f32.mrf.mxu0 }
 0x2f1   :  { %v5266_v39 = vld [vmem:[%s7921_s8 + $0x30] sm:$0xff]  ;;  %v3050_v17 = vsel %vm821_vm3, %v5257_v24, 0 }
 0x2f2   :  { %v1846_v31 = vpop.f32.mrf.mxu1  ;;  %v5880_v24 = vld [vmem:[%s7924_s10 + $0x94] ss:$8 sps:$4 sm:$0xff]  }
 0x2f3   :  { %v3108_v31 = vsel %vm821_vm3, %v5262_v38, 0  ;;  %v5878_v38 = vld [vmem:[%s7924_s10 + $0x90] ss:$8 sps:$4 sm:$0xff]  }
 0x322   :  { %v2287_v18 = vpop.f32.mrf.mxu0 }
 0x324   :  { %v2125_v44 = vpop.f32.mrf.mxu1  ;;  %v2289_v16 = vpop.f32.mrf.mxu0 }
 0x325   :  { %v2131_v46 = vadd.f32 %v2125_v44, %v1970_v29  ;;  %v5263_v29 = vcombine.high %v5261_v28, %v5261_v28  ;;  %v5799_v44 = vld [vmem:[%s7924_s10 + $0x154] ss:$8 sps:$4 sm:$0xff]   ;;  %v5267_v16 = vcombine.low %v5266_v39, %v5266_v39 }
 0x326   :  { %v2127_v10 = vpop.f32.mrf.mxu1  ;;  %v2290_v11 = vpop.f32.mrf.mxu0  ;;  %v5868_v28 = vld [vmem:[%s7924_s10 + $0xb4] ss:$8 sps:$4 sm:$0xff]  }
 0x327   :  { %v2293_v33 = vadd.f32 %v2287_v18, %v2131_v46  ;;  %v5268_v18 = vcombine.high %v5266_v39, %v5266_v39  ;;  %v3166_v46 = vsel %vm821_vm3, %v5267_v16, 0  ;;  %v5797_v10 = vld [vmem:[%s7924_s10 + $0x150] ss:$8 sps:$4 sm:$0xff]   ;;  %v5808_v11 = vld [vmem:[%s7924_s10 + $0x74] ss:$8 sps:$4 sm:$0xff]  }
 0x328   :  { %v2128_v43 = vpop.f32.mrf.mxu1  ;;  %v2291_v13 = vpop.f32.mrf.mxu0  ;;  %v5886_v39 = vld [vmem:[%s7924_s10 + $0x84] ss:$8 sps:$4 sm:$0xff]  }
 0x329   :  { %v5800_v43 = vld [vmem:[%s7924_s10 + $0x140] ss:$8 sps:$4 sm:$0xff]   ;;  %v5805_v13 = vld [vmem:[%s7924_s10 + $0x134] ss:$8 sps:$4 sm:$0xff]  }
 0x32a   :  { %v2129_v47 = vpop.f32.mrf.mxu1 }
 0x32b   :  { %v5806_v47 = vld [vmem:[%s7924_s10 + $0x70] ss:$8 sps:$4 sm:$0xff]  }
 0x35a   :  { %v2606_v35 = vpop.f32.mrf.mxu0 }
 0x35c   :  { %v2444_v49 = vpop.f32.mrf.mxu1  ;;  %v2608_v61 = vpop.f32.mrf.mxu0 }
 0x35d   :  { %v2450_v63 = vadd.f32 %v2444_v49, %v2293_v33  ;;  %v5802_v33 = vld [vmem:[%s7924_s10 + $0x144] ss:$8 sps:$4 sm:$0xff]   ;;  %v5820_v49 = vld [vmem:[%s7924_s10 + $0x54] ss:$8 sps:$4 sm:$0xff]  }
 0x35e   :  { %v2446_v62 = vpop.f32.mrf.mxu1  ;;  %v2609_v34 = vpop.f32.mrf.mxu0  ;;  %v5817_v61 = vld [vmem:[%s7924_s10 + $0x114] ss:$8 sps:$4 sm:$0xff]  }
 0x35f   :  { %v2612_v0 = vadd.f32 %v2606_v35, %v2450_v63  ;;  %v5809_v35 = vld [vmem:[%s7924_s10 + $0x120] ss:$8 sps:$4 sm:$0xff]   ;;  %v5818_v62 = vld [vmem:[%s7924_s10 + $0x50] ss:$8 sps:$4 sm:$0xff]  }
 0x360   :  { %v2447_v55 = vpop.f32.mrf.mxu1  ;;  %v2610_v60 = vpop.f32.mrf.mxu0  ;;  %v5815_v34 = vld [vmem:[%s7924_s10 + $0x110] ss:$8 sps:$4 sm:$0xff]   ;;  %v5821_v63 = vld [vmem:[%s7924_s10 + $0x100] ss:$8 sps:$4 sm:$0xff]  }
 0x361   :  { %v5826_v55 = vld [vmem:[%s7924_s10 + $0x44] ss:$8 sps:$4 sm:$0xff]  }
 0x362   :  { %v2448_v12 = vpop.f32.mrf.mxu1  ;;  %v5823_v60 = vld [vmem:[%s7924_s10 + $0x104] ss:$8 sps:$4 sm:$0xff]  }
 0x363   :  { %v5824_v12 = vld [vmem:[%s7924_s10 + $0x40] ss:$8 sps:$4 sm:$0xff]  }
 0x394   :  { %v2763_v21 = vpop.f32.mrf.mxu1 }
 0x395   :  { %v2769_v50 = vadd.f32 %v2763_v21, %v2612_v0  ;;  %v5832_v0 = vld [vmem:[%s7924_s10 + $0x34] ss:$8 sps:$4 sm:$0xff]  }
 0x396   :  { %v2765_v48 = vpop.f32.mrf.mxu1  ;;  %v5829_v21 = vld [vmem:[%s7924_s10 + $0xf4] ss:$8 sps:$4 sm:$0xff]  }
 0x397   :  { %v2777_v4 = vadd.f32 %v5236_v3, %v2769_v50  ;;  %v5830_v3 = vld [vmem:[%s7924_s10 + $0x30] ss:$8 sps:$4 sm:$0xff]   ;;  %v5838_v48 = vld [vmem:[%s7924_s10 + $0x24] ss:$8 sps:$4 sm:$0xff]  }
 0x398   :  { %v2766_v59 = vpop.f32.mrf.mxu1  ;;  %v5827_v50 = vld [vmem:[%s7924_s10 + $0xf0] ss:$8 sps:$4 sm:$0xff]  }
 0x399   :  { %2779 = vst.msk [vmem:[%s7923_s15] sm:$0xff] %vm2778_vm5, %v2777_v4  ;;  %v2786_v5 = vmul.f32 0.5, %v2777_v4  ;;  %v5836_v59 = vld [vmem:[%s7924_s10 + $0x20] ss:$8 sps:$4 sm:$0xff]  }
 0x39a   :  { %v2767_v6 = vpop.f32.mrf.mxu1 }
 0x39b   :  { %v2787_v32 = vmul.f32 1.442695, %v2786_v5  ;;  %v5833_v5 = vld [vmem:[%s7924_s10 + $0xe0] ss:$8 sps:$4 sm:$0xff]   ;;  %v5844_v6 = vld [vmem:[%s7924_s10 + $0x14] ss:$8 sps:$4 sm:$0xff]  }
 0x39d   :  { %5965 = vpow2.f32 %v2787_v32  ;;  %v5841_v32 = vld [vmem:[%s7924_s10 + $0x1b4] ss:$8 sps:$4 sm:$0xff]  }
 0x3aa   :  { %v5966_v41 = vpop.eup %5965 }
 0x3ab   :  { %2790 = vrot.lane.b32.xlu0 %v5966_v41, %s5996_s0  ;;  %v5854_v41 = vld [vmem:[%s7924_s10 + $0xd0] ss:$8 sps:$4 sm:$0xff]  }
 0x3af   :  { %2781 = vrot.lane.b32.xlu0 %v2777_v4, %s5996_s0 }
 0x41d   :  { %v2791_v14 = vpop.permute.xlu0 %2790 }
 0x41e   :  { %v2793_v56 = vmul.f32 %v2791_v14, %v2785_v2  ;;  %v5851_v2 = vld [vmem:[%s7924_s10 + $0x190] ss:$8 sps:$4 sm:$0xff]   ;;  %v5859_v14 = vld [vmem:[%s7924_s10 + $0x184] ss:$8 sps:$4 sm:$0xff]  }
 0x420   :  { %v2794_v20 = vadd.f32 %v2793_v56, %v2777_v4  ;;  %v5835_v4 = vld [vmem:[%s7924_s10 + $0xe4] ss:$8 sps:$4 sm:$0xff]   ;;  %v5857_v56 = vld [vmem:[%s7924_s10 + $0x180] ss:$8 sps:$4 sm:$0xff]  }
 0x421   :  { %v2782_v51 = vpop.permute.xlu0 %2781 }
 0x422   :  { %v2795_v27 = vpack.c.bf16 %v2794_v20, %v2794_v20  ;;  %2784 = vst.msk [vmem:[%s7926_s16] sm:$0xff] %vm2778_vm5, %v2782_v51  ;;  %v5865_v20 = vld [vmem:[%s7924_s10 + $0x174] ss:$8 sps:$4 sm:$0xff]   ;;  %v5866_v51 = vld [vmem:[%s7924_s10 + $0xb0] ss:$8 sps:$4 sm:$0xff]  }
 0x424   :  { %5240 = vmatmul.mubr.msk.bf16.vlgmr.msra.gmra.mxu0 %vm2778_vm5, %v2795_v27  ;;  %5245 = vmatmul.mubr.msk.bf16.vlgmr.msra.gmra.mxu1 %vm2778_vm5, %v2795_v27 }
 0x425   :  { %2954 = vmatpush1.bf16.msra.mxu0 %v2934_v26  ;;  %3012 = vmatpush1.bf16.msra.mxu1 %v2992_v40  ;;  %v5869_v26 = vld [vmem:[%s7924_s10 + $0x160] ss:$8 sps:$4 sm:$0xff]   ;;  %v5874_v40 = vld [vmem:[%s7924_s10 + $0xa4] ss:$8 sps:$4 sm:$0xff]  }
 0x426   :  { %2971 = vmatprep.mubr.bf16.mxu0 %v5995_v1  ;;  %3029 = vmatprep.mubr.bf16.mxu1 %v5995_v1 }
 0x427   :  { %5259 = vmatprep.subr.msk.bf16.mxu0 %vm821_vm3, %v5258_v45  ;;  %5264 = vmatprep.subr.msk.bf16.mxu1 %vm821_vm3, %v5263_v29  ;;  %v5872_v45 = vld [vmem:[%s7924_s10 + $0xa0] ss:$8 sps:$4 sm:$0xff]   ;;  %v5877_v29 = vld [vmem:[%s7924_s10 + $0x234] ss:$8 sps:$4 sm:$0xff]  }
 0x42c   :  { %5250 = vmatmul.mubr.msk.bf16.vlgmr.msra.gmra.mxu0 %vm2778_vm5, %v2795_v27  ;;  %5255 = vmatmul.mubr.msk.bf16.vlgmr.msra.gmra.mxu1 %vm2778_vm5, %v2795_v27 }
 0x42d   :  { %3070 = vmatpush1.bf16.msra.mxu0 %v3050_v17  ;;  %3128 = vmatpush1.bf16.msra.mxu1 %v3108_v31  ;;  %v5884_v17 = vld [vmem:[%s7924_s10 + $0x80] ss:$8 sps:$4 sm:$0xff]  }
 0x42e   :  { %3087 = vmatprep.mubr.bf16.mxu0 %v5995_v1  ;;  %3145 = vmatprep.mubr.bf16.mxu1 %v5995_v1  ;;  %v2796_v31 = vld [vmem:[%s7928_s9] sm:$0x3] }
 0x42f   :  { %5269 = vmatprep.subr.msk.bf16.mxu0 %vm821_vm3, %v5268_v18  ;;  %3472 = vmatprep.subr.bf16.mxu1 %v5799_v44  ;;  %v7434_v18 = vrot.slane %v2796_v31, %v6519_v36  ;;  %v7437_v44 = vrot.slane %v2796_v31, %v6524_v42 }
 0x434   :  { %5260 = vmatmul.mubr.msk.bf16.vlgmr.msra.gmra.mxu0 %vm2778_vm5, %v2795_v27  ;;  %5265 = vmatmul.mubr.msk.bf16.vlgmr.msra.gmra.mxu1 %vm2778_vm5, %v2795_v27 }
 0x435   :  { %3186 = vmatpush1.bf16.msra.mxu0 %v3166_v46  ;;  %3203 = vmatprep.mubr.bf16.mxu0 %v5995_v1 }
 0x436   :  { %3473 = vmatpush1.bf16.msra.mxu1 %v5797_v10  ;;  %3770 = vmatprep.subr.bf16.mxu0 %v5808_v11 }
 0x437   :  { %3474 = vmatprep.subr.bf16.mxu1 %v5802_v33 }
 0x43a   :  { %3475 = vmatpush1.bf16.msra.mxu1 %v5800_v43 }
 0x43b   :  { %3476 = vmatprep.subr.bf16.mxu1 %v5805_v13 }
 0x43c   :  { %5270 = vmatmul.mubr.msk.bf16.vlgmr.msra.gmra.mxu0 %vm2778_vm5, %v2795_v27  ;;  %v5871_v27 = vld [vmem:[%s7924_s10 + $0x164] ss:$8 sps:$4 sm:$0xff]  }
 0x43d   :  { %3771 = vmatpush1.bf16.msra.mxu0 %v5806_v47 }
 0x43e   :  { %3477 = vmatpush1.bf16.msra.mxu1 %v5803_v52  ;;  %3772 = vmatprep.subr.bf16.mxu0 %v5814_v53 }
 0x43f   :  { %3478 = vmatprep.subr.bf16.mxu1 %v5811_v58 }
 0x441   :  { %3773 = vmatpush1.bf16.msra.mxu0 %v5812_v23 }
 0x442   :  { %3479 = vmatpush1.bf16.msra.mxu1 %v5809_v35  ;;  %3774 = vmatprep.subr.bf16.mxu0 %v5820_v49 }
 0x443   :  { %3480 = vmatprep.subr.bf16.mxu1 %v5817_v61 }
 0x445   :  { %3775 = vmatpush1.bf16.msra.mxu0 %v5818_v62 }
 0x446   :  { %3481 = vmatpush1.bf16.msra.mxu1 %v5815_v34  ;;  %3776 = vmatprep.subr.bf16.mxu0 %v5826_v55 }
 0x447   :  { %3482 = vmatprep.subr.bf16.mxu1 %v5823_v60 }
 0x449   :  { %3777 = vmatpush1.bf16.msra.mxu0 %v5824_v12 }
 0x44a   :  { %3483 = vmatpush1.bf16.msra.mxu1 %v5821_v63  ;;  %3778 = vmatprep.subr.bf16.mxu0 %v5832_v0 }
 0x44b   :  { %3484 = vmatprep.subr.bf16.mxu1 %v5829_v21 }
 0x44d   :  { %3779 = vmatpush1.bf16.msra.mxu0 %v5830_v3 }
 0x44e   :  { %3485 = vmatpush1.bf16.msra.mxu1 %v5827_v50  ;;  %3780 = vmatprep.subr.bf16.mxu0 %v5838_v48 }
 0x44f   :  { %3486 = vmatprep.subr.bf16.mxu1 %v5835_v4 }
 0x451   :  { %3781 = vmatpush1.bf16.msra.mxu0 %v5836_v59 }
 0x452   :  { %3487 = vmatpush1.bf16.msra.mxu1 %v5833_v5  ;;  %3782 = vmatprep.subr.bf16.mxu0 %v5844_v6 }
 0x453   :  { %3492 = vmatprep.subr.bf16.mxu1 %v5841_v32 }
 0x455   :  { %3783 = vmatpush1.bf16.msra.mxu0 %v5842_v37 }
 0x456   :  { %3493 = vmatpush2.bf16.msra.mxu1 %v5839_v7  ;;  %3784 = vmatprep.subr.bf16.mxu0 %v5850_v9  ;;  %v5875_v7 = vld [vmem:[%s7924_s10 + $0x230] ss:$8 sps:$4 sm:$0xff]  }
 0x457   :  { %3494 = vmatprep.subr.bf16.mxu1 %v5847_v54 }
 0x459   :  { %3785 = vmatpush1.bf16.msra.mxu0 %v5848_v22 }
 0x45a   :  { %3495 = vmatpush2.bf16.msra.mxu1 %v5845_v15  ;;  %3790 = vmatprep.subr.bf16.mxu0 %v5856_v8  ;;  %v5883_v8 = vld [vmem:[%s7924_s10 + $0x224] ss:$8 sps:$4 sm:$0xff]  }
 0x45b   :  { %3496 = vmatprep.subr.bf16.mxu1 %v5853_v30 }
 0x45d   :  { %3791 = vmatpush2.bf16.msra.mxu0 %v5854_v41 }
 0x45e   :  { %3497 = vmatpush2.bf16.msra.mxu1 %v5851_v2  ;;  %3792 = vmatprep.subr.bf16.mxu0 %v5862_v25 }
 0x45f   :  { %3498 = vmatprep.subr.bf16.mxu1 %v5859_v14 }
 0x461   :  { %3793 = vmatpush2.bf16.msra.mxu0 %v5860_v19 }
 0x462   :  { %3499 = vmatpush2.bf16.msra.mxu1 %v5857_v56  ;;  %3794 = vmatprep.subr.bf16.mxu0 %v5868_v28 }
 0x463   :  { %3500 = vmatprep.subr.bf16.mxu1 %v5865_v20 }
 0x465   :  { %3795 = vmatpush2.bf16.msra.mxu0 %v5866_v51 }
 0x466   :  { %3501 = vmatpush2.bf16.msra.mxu1 %v5863_v57  ;;  %3796 = vmatprep.subr.bf16.mxu0 %v5874_v40  ;;  %v5881_v57 = vld [vmem:[%s7924_s10 + $0x220] ss:$8 sps:$4 sm:$0xff]   ;;  %v5889_v40 = vld [vmem:[%s7924_s10 + $0x214] ss:$8 sps:$4 sm:$0xff]  }
 0x467   :  { %3502 = vmatprep.subr.bf16.mxu1 %v5871_v27 }
 0x469   :  { %3797 = vmatpush2.bf16.msra.mxu0 %v5872_v45 }
 0x46a   :  { %3503 = vmatpush2.bf16.msra.mxu1 %v5869_v26  ;;  %3798 = vmatprep.subr.bf16.mxu0 %v5880_v24 }
 0x46b   :  { %3981 = vmatprep.subr.bf16.mxu1 %v5877_v29 }
 0x46d   :  { %3799 = vmatpush2.bf16.msra.mxu0 %v5878_v38 }
 0x46e   :  { %3800 = vmatprep.subr.bf16.mxu0 %v5886_v39 }
 0x471   :  { %3801 = vmatpush2.bf16.msra.mxu0 %v5884_v17 }
 0x472   :  { %4266 = vmatprep.subr.bf16.mxu0 %v5995_v1 }
 0x4e4   :  { %v2857_v16 = vpop.f32.mrf.mxu0  ;;  %v2915_v46 = vpop.f32.mrf.mxu1 }
 0x4e5   :  { %v2916_v10 = vadd.f32 %v2915_v46, %v7434_v18  ;;  %v2858_v11 = vadd.f32 %v2857_v16, %v7434_v18 }
 0x4e6   :  { %v2859_v33 = vpop.f32.mrf.mxu0  ;;  %v2917_v43 = vpop.f32.mrf.mxu1 }
 0x4e7   :  { %v2922_v13 = vmax.f32 %v2916_v10, 0.0  ;;  %v2860_v47 = vadd.f32 %v2859_v33, %v7437_v44  ;;  %v2918_v52 = vadd.f32 %v2917_v43, %v7437_v44  ;;  %v2864_v49 = vmax.f32 %v2858_v11, 0.0  ;;  %v5887_v11 = vld [vmem:[%s7924_s10 + $0x210] ss:$8 sps:$4 sm:$0xff]  }
 0x4e8   :  { %v2861_v53 = vpop.f32.mrf.mxu0  ;;  %v2919_v58 = vpop.f32.mrf.mxu1 }
 0x4e9   :  { %v7443_v23 = vpack.c.bf16 %v2922_v13, %v2922_v13  ;;  %v2923_v35 = vmax.f32 %v2918_v52, 0.0  ;;  %v2865_v61 = vmax.f32 %v2860_v47, 0.0  ;;  %v2866_v50 = vpack.c.bf16 %v2864_v49, %v2864_v49  ;;  %v5892_v58 = vld [vmem:[%s7924_s10 + $0x204] ss:$8 sps:$4 sm:$0xff]  }
 0x4ea   :  { %v2862_v62 = vpop.f32.mrf.mxu0  ;;  %v2920_v34 = vpop.f32.mrf.mxu1 }
 0x4eb   :  { %v2925_v55 = vpack.c.bf16 %v2923_v35, %v2923_v35  ;;  %v3218_v60 = vrot.slane %v7443_v23, 4  ;;  %v2867_v48 = vpack.c.bf16 %v2865_v61, %v2865_v61 }
 0x4ec   :  { %v2973_v12 = vpop.f32.mrf.mxu0  ;;  %v3031_v63 = vpop.f32.mrf.mxu1 }
 0x4ed   :  { %v3219_v0 = vrot.slane %v2925_v55, 4  ;;  %v2974_v21 = vadd.f32 %v2973_v12, %v7434_v18  ;;  %v3032_v3 = vadd.f32 %v3031_v63, %v7434_v18  ;;  %v7457_v15 = vsel %vm821_vm3, %v2866_v50, %v3218_v60  ;;  %v5890_v12 = vld [vmem:[%s7924_s10 + $0x200] ss:$8 sps:$4 sm:$0xff]  }
 0x4ee   :  { %v2975_v4 = vpop.f32.mrf.mxu0  ;;  %v3033_v59 = vpop.f32.mrf.mxu1 }
 0x4ef   :  { %v2980_v5 = vmax.f32 %v2974_v21, 0.0  ;;  %v3038_v6 = vmax.f32 %v3032_v3, 0.0  ;;  %v2976_v32 = vadd.f32 %v2975_v4, %v7437_v44  ;;  %v3034_v37 = vadd.f32 %v3033_v59, %v7437_v44  ;;  %v5895_v4 = vld [vmem:[%s7924_s10 + $0x1f4] ss:$8 sps:$4 sm:$0xff]  }
 0x4f0   :  { %v2977_v9 = vpop.f32.mrf.mxu0  ;;  %v3035_v54 = vpop.f32.mrf.mxu1  ;;  %v7454_v22 = vsel %vm821_vm3, %v2867_v48, %v3219_v0 }
 0x4f1   :  { %v2982_v30 = vpack.c.bf16 %v2980_v5, %v2980_v5  ;;  %v7462_v41 = vpack.c.bf16 %v3038_v6, %v3038_v6  ;;  %v2981_v2 = vmax.f32 %v2976_v32, 0.0  ;;  %v3039_v14 = vmax.f32 %v3034_v37, 0.0  ;;  %5327 = vmatprep.mubr.msk.bf16.mxu1 %vm1039_vm2, %v7454_v22 }
 0x4f2   :  { %3505 = vmatmul.mubr.bf16.vlgmr.msra.gmra.mxu1 %v7457_v15  ;;  %v2978_v56 = vpop.f32.mrf.mxu0  ;;  %v3036_v25 = vpop.f32.mrf.mxu1 }
 0x4f3   :  { %v2983_v19 = vpack.c.bf16 %v2981_v2, %v2981_v2  ;;  %v3041_v20 = vpack.c.bf16 %v3039_v14, %v3039_v14  ;;  %3982 = vmatpush1.bf16.msra.mxu1 %v5875_v7  ;;  %v3251_v28 = vrot.slane %v2982_v30, 4  ;;  %v3222_v51 = vrot.slane %v7462_v41, 4  ;;  %v5893_v7 = vld [vmem:[%s7924_s10 + $0x1f0] ss:$8 sps:$4 sm:$0xff]   ;;  %v5896_v56 = vld [vmem:[%s7924_s10 + $0x1e0] ss:$8 sps:$4 sm:$0xff]  }
 0x4f4   :  { %v3089_v27 = vpop.f32.mrf.mxu0  ;;  %v3147_v26 = vpop.f32.mrf.mxu1  ;;  %3983 = vmatprep.subr.bf16.mxu1 %v5883_v8  ;;  %v5901_v25 = vld [vmem:[%s7924_s10 + $0x1d4] ss:$8 sps:$4 sm:$0xff]  }
 0x4f5   :  { %v3252_v45 = vrot.slane %v2983_v19, 4  ;;  %v3223_v29 = vrot.slane %v3041_v20, 4  ;;  %v3090_v24 = vadd.f32 %v3089_v27, %v7434_v18  ;;  %v3148_v38 = vadd.f32 %v3147_v26, %v7434_v18  ;;  %v5902_v27 = vld [vmem:[%s7924_s10 + $0x1c0] ss:$8 sps:$4 sm:$0xff]   ;;  %v5907_v26 = vld [vmem:[%s7924_s10 + $0x294] ss:$8 sps:$4 sm:$0xff]  }
 0x4f6   :  { %v3091_v39 = vpop.f32.mrf.mxu0  ;;  %v3149_v17 = vpop.f32.mrf.mxu1  ;;  %v7486_v52 = vsel %vm821_vm3, %v2982_v30, %v3222_v51  ;;  %v3263_v53 = vsel %vm821_vm3, %v7443_v23, %v3251_v28  ;;  %v5904_v28 = vld [vmem:[%s7924_s10 + $0x1c4] ss:$8 sps:$4 sm:$0xff]  }
 0x4f7   :  { %v3096_v31 = vmax.f32 %v3090_v24, 0.0  ;;  %v3154_v16 = vmax.f32 %v3148_v38, 0.0  ;;  %3984 = vmatpush1.bf16.msra.mxu1 %v5881_v57  ;;  %v3092_v46 = vadd.f32 %v3091_v39, %v7437_v44  ;;  %v3150_v10 = vadd.f32 %v3149_v17, %v7437_v44  ;;  %v5899_v57 = vld [vmem:[%s7924_s10 + $0x1d0] ss:$8 sps:$4 sm:$0xff]   ;;  %v5916_v38 = vld [vmem:[%s7924_s10 + $0x264] ss:$8 sps:$4 sm:$0xff]  }
 0x4f8   :  { %v3093_v33 = vpop.f32.mrf.mxu0  ;;  %v3151_v43 = vpop.f32.mrf.mxu1  ;;  %v7482_v13 = vsel %vm821_vm3, %v2983_v19, %v3223_v29  ;;  %v3267_v47 = vsel %vm821_vm3, %v2925_v55, %v3252_v45  ;;  %3985 = vmatprep.subr.bf16.mxu1 %v5889_v40  ;;  %v5905_v40 = vld [vmem:[%s7924_s10 + $0x290] ss:$8 sps:$4 sm:$0xff]   ;;  %v5908_v45 = vld [vmem:[%s7924_s10 + $0x280] ss:$8 sps:$4 sm:$0xff]   ;;  %v5913_v29 = vld [vmem:[%s7924_s10 + $0x274] ss:$8 sps:$4 sm:$0xff]  }
 0x4f9   :  { %v3098_v35 = vpack.c.bf16 %v3096_v31, %v3096_v31  ;;  %v3156_v49 = vpack.c.bf16 %v3154_v16, %v3154_v16  ;;  %v3097_v61 = vmax.f32 %v3092_v46, 0.0  ;;  %v3155_v62 = vmax.f32 %v3150_v10, 0.0  ;;  %5328 = vmatprep.mubr.msk.bf16.mxu1 %vm1039_vm2, %v7482_v13  ;;  %5387 = vmatprep.mubr.msk.bf16.mxu0 %vm1039_vm2, %v3267_v47  ;;  %v5911_v24 = vld [vmem:[%s7924_s10 + $0x270] ss:$8 sps:$4 sm:$0xff]   ;;  %v5914_v39 = vld [vmem:[%s7924_s10 + $0x260] ss:$8 sps:$4 sm:$0xff]  }
 0x4fa   :  { %3515 = vmatmul.mubr.bf16.gmra.mxu1 %v7486_v52  ;;  %3803 = vmatmul.mubr.bf16.vlgmr.msra.gmra.mxu0 %v3263_v53  ;;  %v3094_v34 = vpop.f32.mrf.mxu0  ;;  %v3152_v55 = vpop.f32.mrf.mxu1  ;;  %v5919_v17 = vld [vmem:[%s7924_s10 + $0x254] ss:$8 sps:$4 sm:$0xff]   ;;  %v5917_v31 = vld [vmem:[%s7924_s10 + $0x250] ss:$8 sps:$4 sm:$0xff]   ;;  %v5922_v16 = vld [vmem:[%s7924_s10 + $0x244] ss:$8 sps:$4 sm:$0xff]  }
 0x4fb   :  { %v3099_v60 = vpack.c.bf16 %v3097_v61, %v3097_v61  ;;  %v3157_v23 = vpack.c.bf16 %v3155_v62, %v3155_v62  ;;  %3986 = vmatpush1.bf16.msra.mxu1 %v5887_v11  ;;  %v3255_v63 = vrot.slane %v3098_v35, 4  ;;  %v3226_v21 = vrot.slane %v3156_v49, 4  ;;  %v5920_v46 = vld [vmem:[%s7924_s10 + $0x240] ss:$8 sps:$4 sm:$0xff]   ;;  %v5923_v10 = vld [vmem:[%s7927_s12 + $0x38] sm:$0xff]   ;;  %v5924_v11 = vld [vmem:[%s7927_s12 + $0x30] sm:$0xff]  }
 0x4fc   :  { %v3205_v0 = vpop.f32.mrf.mxu0  ;;  %3987 = vmatprep.subr.bf16.mxu1 %v5892_v58  ;;  %v5925_v33 = vld [vmem:[%s7927_s12 + $0x28] sm:$0xff]   ;;  %v5927_v43 = vld [vmem:[%s7927_s12 + $0x18] sm:$0xff]   ;;  %v5930_v53 = vld [vmem:[%s7927_s12] sm:$0xff]  }
 0x4fd   :  { %v3256_v3 = vrot.slane %v3099_v60, 4  ;;  %v3227_v50 = vrot.slane %v3157_v23, 4  ;;  %v3206_v48 = vadd.f32 %v3205_v0, %v7434_v18  ;;  %v5898_v18 = vld [vmem:[%s7924_s10 + $0x1e4] ss:$8 sps:$4 sm:$0xff]   ;;  %v7521_v8 = vsel %vm821_vm3, %v3098_v35, %v3226_v21  ;;  %v5940_v62 = vld [vmem:[%s7927_s12 + $0x90] sm:$0xff]   ;;  %v5933_v34 = vld [vmem:[%s7927_s12 + $0x58] sm:$0xff]  }
 0x4fe   :  { %v3207_v59 = vpop.f32.mrf.mxu0  ;;  %v3270_v30 = vsel %vm821_vm3, %v7462_v41, %v3255_v63  ;;  %v5929_v47 = vld [vmem:[%s7927_s12 + $0x8] sm:$0xff]   ;;  %v5938_v58 = vld [vmem:[%s7927_s12 + $0xa0] sm:$0xff]   ;;  %v5943_v63 = vld [vmem:[%s7927_s12 + $0x78] sm:$0xff]  }
 0x4ff   :  { %v3212_v5 = vmax.f32 %v3206_v48, 0.0  ;;  %3988 = vmatpush1.bf16.msra.mxu1 %v5890_v12  ;;  %v3208_v6 = vadd.f32 %v3207_v59, %v7437_v44  ;;  %v7506_v32 = vsel %vm821_vm3, %v3099_v60, %v3227_v50  ;;  %v3274_v37 = vsel %vm821_vm3, %v3041_v20, %v3256_v3  ;;  %v5931_v35 = vld [vmem:[%s7927_s12 + $0x68] sm:$0xff]   ;;  %v5932_v61 = vld [vmem:[%s7927_s12 + $0x60] sm:$0xff]   ;;  %v5934_v60 = vld [vmem:[%s7927_s12 + $0x50] sm:$0xff]  }
 0x500   :  { %v3209_v9 = vpop.f32.mrf.mxu0  ;;  %5329 = vmatprep.mubr.msk.bf16.mxu1 %vm1039_vm2, %v7506_v32  ;;  %5388 = vmatprep.mubr.msk.bf16.mxu0 %vm1039_vm2, %v3274_v37  ;;  %v5941_v55 = vld [vmem:[%s7927_s12 + $0x88] sm:$0xff]   ;;  %v5944_v0 = vld [vmem:[%s7927_s12 + $0x70] sm:$0xff]   ;;  %v5936_v21 = vld [vmem:[%s7927_s12 + $0x40] sm:$0xff]  }
 0x501   :  { %v7518_v44 = vpack.c.bf16 %v3212_v5, %v3212_v5  ;;  %v3213_v54 = vmax.f32 %v3208_v6, 0.0  ;;  %3989 = vmatprep.subr.bf16.mxu1 %v5895_v4  ;;  %v5935_v12 = vld [vmem:[%s7927_s12 + $0x48] sm:$0xff]   ;;  %v5945_v3 = vld [vmem:[%s7927_s12 + $0xd8] sm:$0xff]   ;;  %v5946_v50 = vld [vmem:[%s7927_s12 + $0xd0] sm:$0xff]  }
 0x502   :  { %3525 = vmatmul.mubr.bf16.gmra.mxu1 %v7521_v8  ;;  %3813 = vmatmul.mubr.bf16.gmra.mxu0 %v3270_v30  ;;  %v3210_v2 = vpop.f32.mrf.mxu0  ;;  %v5947_v48 = vld [vmem:[%s7927_s12 + $0xc8] sm:$0xff]   ;;  %v5948_v4 = vld [vmem:[%s7927_s12 + $0xc0] sm:$0xff]   ;;  %v5949_v59 = vld [vmem:[%s7927_s12 + $0xb8] sm:$0xff]  }
 0x503   :  { %v7526_v14 = vpack.c.bf16 %v3213_v54, %v3213_v54  ;;  %3990 = vmatpush1.bf16.msra.mxu1 %v5893_v7  ;;  %v3259_v19 = vrot.slane %v7518_v44, 4  ;;  %v5950_v5 = vld [vmem:[%s7927_s12 + $0xb0] sm:$0xff]   ;;  %v3282_v6 = vld [vmem:[%s7929_s11] sm:$0x3] }
 0x504   :  { %3991 = vmatprep.subr.bf16.mxu1 %v5898_v18  ;;  %v7717_v37 = vrot.slane %v3282_v6, %v6524_v42  ;;  %v7720_v7 = vrot.slane %v3282_v6, %v6519_v36 }
 0x505   :  { %v3260_v41 = vrot.slane %v7526_v14, 4  ;;  %5330 = vmatprep.mubr.msk.bf16.mxu1 %vm1039_vm2, %v7526_v14  ;;  %v3277_v51 = vsel %vm821_vm3, %v3156_v49, %v3259_v19  ;;  %v5939_v49 = vld [vmem:[%s7927_s12 + $0x98] sm:$0xff]  }
 0x507   :  { %3992 = vmatpush1.bf16.msra.mxu1 %v5896_v56  ;;  %v3281_v20 = vsel %vm821_vm3, %v3157_v23, %v3260_v41  ;;  %v5942_v23 = vld [vmem:[%s7927_s12 + $0x80] sm:$0xff]  }
 0x508   :  { %5389 = vmatprep.mubr.msk.bf16.mxu0 %vm1039_vm2, %v3281_v20  ;;  %3993 = vmatprep.subr.bf16.mxu1 %v5901_v25 }
 0x50a   :  { %3535 = vmatmul.mubr.bf16.gmra.mxu1 %v7518_v44  ;;  %3823 = vmatmul.mubr.bf16.gmra.mxu0 %v3277_v51 }
 0x50b   :  { %3994 = vmatpush1.bf16.msra.mxu1 %v5899_v57  ;;  %5418 = vmatprep.mubr.msk.bf16.mxu1 %vm1039_vm2, %v7454_v22  ;;  %v5910_v22 = vld [vmem:[%s7924_s10 + $0x284] ss:$8 sps:$4 sm:$0xff]  }
 0x50c   :  { %3995 = vmatprep.subr.bf16.mxu1 %v5904_v28  ;;  %3832 = vmatprep.mubr.bf16.mxu0 %v5995_v1 }
 0x50f   :  { %3996 = vmatpush1.bf16.msra.mxu1 %v5902_v27 }
 0x510   :  { %4001 = vmatprep.subr.bf16.mxu1 %v5907_v26 }
 0x512   :  { %3833 = vmatmul.mubr.bf16.gmra.mxu0 %v5995_v1 }
 0x513   :  { %4002 = vmatpush2.bf16.msra.mxu1 %v5905_v40 }
 0x514   :  { %4003 = vmatprep.subr.bf16.mxu1 %v5910_v22 }
 0x517   :  { %4004 = vmatpush2.bf16.msra.mxu1 %v5908_v45 }
 0x518   :  { %4005 = vmatprep.subr.bf16.mxu1 %v5913_v29 }
 0x51b   :  { %4006 = vmatpush2.bf16.msra.mxu1 %v5911_v24 }
 0x51c   :  { %4007 = vmatprep.subr.bf16.mxu1 %v5916_v38 }
 0x51f   :  { %4008 = vmatpush2.bf16.msra.mxu1 %v5914_v39 }
 0x520   :  { %4009 = vmatprep.subr.bf16.mxu1 %v5919_v17 }
 0x523   :  { %4010 = vmatpush2.bf16.msra.mxu1 %v5917_v31 }
 0x524   :  { %4011 = vmatprep.subr.bf16.mxu1 %v5922_v16 }
 0x527   :  { %4012 = vmatpush2.bf16.msra.mxu1 %v5920_v46 }
 0x528   :  { %4426 = vmatprep.subr.bf16.mxu1 %v5995_v1 }
 0x52a   :  { %4014 = vmatmul.mubr.bf16.vlgmr.msra.gmra.mxu1 %v7457_v15  ;;  %v5926_v15 = vld [vmem:[%s7927_s12 + $0x20] sm:$0xff]  }
 0x52b   :  { %5419 = vmatprep.mubr.msk.bf16.mxu1 %vm1039_vm2, %v7482_v13  ;;  %4427 = vmatpush1.bf16.msra.mxu1 %v5923_v10  ;;  %v5928_v13 = vld [vmem:[%s7927_s12 + $0x10] sm:$0xff]  }
 0x52c   :  { %4428 = vmatprep.subr.bf16.mxu1 %v5995_v1 }
 0x52f   :  { %4429 = vmatpush1.bf16.msra.mxu1 %v5924_v11 }
 0x530   :  { %4430 = vmatprep.subr.bf16.mxu1 %v5995_v1 }
 0x532   :  { %4024 = vmatmul.mubr.bf16.gmra.mxu1 %v7486_v52  ;;  %v5937_v52 = vld [vmem:[%s7927_s12 + $0xa8] sm:$0xff]  }
 0x533   :  { %5420 = vmatprep.mubr.msk.bf16.mxu1 %vm1039_vm2, %v7506_v32  ;;  %4431 = vmatpush1.bf16.msra.mxu1 %v5925_v33 }
 0x534   :  { %4432 = vmatprep.subr.bf16.mxu1 %v5995_v1  ;;  %4267 = vmatpush1.bf16.msra.mxu0 %v5937_v52 }
 0x535   :  { %4268 = vmatprep.subr.bf16.mxu0 %v5995_v1 }
 0x537   :  { %4433 = vmatpush1.bf16.msra.mxu1 %v5926_v15 }
 0x538   :  { %4434 = vmatprep.subr.bf16.mxu1 %v5995_v1  ;;  %4269 = vmatpush1.bf16.msra.mxu0 %v5938_v58 }
 0x539   :  { %4270 = vmatprep.subr.bf16.mxu0 %v5995_v1 }
 0x53a   :  { %4034 = vmatmul.mubr.bf16.gmra.mxu1 %v7521_v8 }
 0x53b   :  { %5421 = vmatprep.mubr.msk.bf16.mxu1 %vm1039_vm2, %v7526_v14  ;;  %4435 = vmatpush1.bf16.msra.mxu1 %v5927_v43 }
 0x53c   :  { %4436 = vmatprep.subr.bf16.mxu1 %v5995_v1  ;;  %4271 = vmatpush1.bf16.msra.mxu0 %v5939_v49 }
 0x53d   :  { %4272 = vmatprep.subr.bf16.mxu0 %v5995_v1 }
 0x53f   :  { %4437 = vmatpush1.bf16.msra.mxu1 %v5928_v13 }
 0x540   :  { %4438 = vmatprep.subr.bf16.mxu1 %v5995_v1  ;;  %4273 = vmatpush1.bf16.msra.mxu0 %v5940_v62 }
 0x541   :  { %4274 = vmatprep.subr.bf16.mxu0 %v5995_v1 }
 0x542   :  { %4044 = vmatmul.mubr.bf16.gmra.mxu1 %v7518_v44 }
 0x543   :  { %4439 = vmatpush1.bf16.msra.mxu1 %v5929_v47 }
 0x544   :  { %4440 = vmatprep.subr.bf16.mxu1 %v5995_v1  ;;  %4275 = vmatpush1.bf16.msra.mxu0 %v5941_v55 }
 0x545   :  { %4276 = vmatprep.subr.bf16.mxu0 %v5995_v1 }
 0x547   :  { %4441 = vmatpush1.bf16.msra.mxu1 %v5930_v53 }
 0x548   :  { %4446 = vmatprep.subr.bf16.mxu1 %v5995_v1  ;;  %4277 = vmatpush1.bf16.msra.mxu0 %v5942_v23 }
 0x549   :  { %4278 = vmatprep.subr.bf16.mxu0 %v5995_v1 }
 0x54b   :  { %4447 = vmatpush2.bf16.msra.mxu1 %v5931_v35 }
 0x54c   :  { %4448 = vmatprep.subr.bf16.mxu1 %v5995_v1  ;;  %4279 = vmatpush1.bf16.msra.mxu0 %v5943_v63 }
 0x54d   :  { %4280 = vmatprep.subr.bf16.mxu0 %v5995_v1 }
 0x54f   :  { %4449 = vmatpush2.bf16.msra.mxu1 %v5932_v61 }
 0x550   :  { %4450 = vmatprep.subr.bf16.mxu1 %v5995_v1  ;;  %4281 = vmatpush1.bf16.msra.mxu0 %v5944_v0 }
 0x551   :  { %4286 = vmatprep.subr.bf16.mxu0 %v5995_v1 }
 0x553   :  { %4451 = vmatpush2.bf16.msra.mxu1 %v5933_v34 }
 0x554   :  { %4452 = vmatprep.subr.bf16.mxu1 %v5995_v1  ;;  %4287 = vmatpush2.bf16.msra.mxu0 %v5945_v3 }
 0x555   :  { %4288 = vmatprep.subr.bf16.mxu0 %v5995_v1 }
 0x557   :  { %4453 = vmatpush2.bf16.msra.mxu1 %v5934_v60 }
 0x558   :  { %4454 = vmatprep.subr.bf16.mxu1 %v5995_v1  ;;  %4289 = vmatpush2.bf16.msra.mxu0 %v5946_v50 }
 0x559   :  { %4290 = vmatprep.subr.bf16.mxu0 %v5995_v1 }
 0x55b   :  { %4455 = vmatpush2.bf16.msra.mxu1 %v5935_v12 }
 0x55c   :  { %4456 = vmatprep.subr.bf16.mxu1 %v5995_v1  ;;  %4291 = vmatpush2.bf16.msra.mxu0 %v5947_v48 }
 0x55d   :  { %4292 = vmatprep.subr.bf16.mxu0 %v5995_v1 }
 0x55f   :  { %4457 = vmatpush2.bf16.msra.mxu1 %v5936_v21 }
 0x560   :  { %4293 = vmatpush2.bf16.msra.mxu0 %v5948_v4 }
 0x561   :  { %4294 = vmatprep.subr.bf16.mxu0 %v5995_v1 }
 0x564   :  { %4295 = vmatpush2.bf16.msra.mxu0 %v5949_v59 }
 0x565   :  { %4296 = vmatprep.subr.bf16.mxu0 %v5995_v1 }
 0x568   :  { %4297 = vmatpush2.bf16.msra.mxu0 %v5950_v5 }
 0x569   :  { %4612 = vmatprep.subr.bf16.mxu0 %v5995_v1 }
 0x5b2   :  { %v3506_v32 = vpop.f32.mrf.mxu1 }
 0x5b3   :  { %v3507_v8 = vadd.f32 %v3506_v32, %v7720_v7 }
 0x5b4   :  { %v3508_v9 = vpop.f32.mrf.mxu1 }
 0x5b5   :  { %v3509_v44 = vadd.f32 %v3508_v9, %v7717_v37  ;;  %v3543_v41 = vmax.f32 %v3507_v8, 0.0 }
 0x5b6   :  { %v3510_v18 = vpop.f32.mrf.mxu1 }
 0x5b7   :  { %v3511_v54 = vadd.f32 %v3510_v18, %v7720_v7  ;;  %v3544_v42 = vmax.f32 %v3509_v44, 0.0 }
 0x5b8   :  { %v3512_v30 = vpop.f32.mrf.mxu1 }
 0x5b9   :  { %v3513_v2 = vadd.f32 %v3512_v30, %v7717_v37  ;;  %v3545_v14 = vmax.f32 %v3511_v54, 0.0 }
 0x5ba   :  { %v3516_v56 = vpop.f32.mrf.mxu1  ;;  %v7726_v25 = vpop.f32.mrf.mxu0 }
 0x5bb   :  { %v3546_v19 = vmax.f32 %v3513_v2, 0.0  ;;  %v3517_v28 = vadd.f32 %v3516_v56, %v7720_v7  ;;  %v3557_v51 = vpack.c.bf16 %v3545_v14, %v3543_v41 }
 0x5bc   :  { %v3518_v36 = vpop.f32.mrf.mxu1  ;;  %v7728_v20 = vpop.f32.mrf.mxu0 }
 0x5bd   :  { %v3558_v57 = vpack.c.bf16 %v3546_v19, %v3544_v42  ;;  %v3519_v40 = vadd.f32 %v3518_v36, %v7717_v37  ;;  %v3547_v24 = vmax.f32 %v3517_v28, 0.0  ;;  %v4096_v15 = vrot.slane %v3557_v51, 4 }
 0x5be   :  { %v3520_v27 = vpop.f32.mrf.mxu1  ;;  %v7731_v26 = vpop.f32.mrf.mxu0 }
 0x5bf   :  { %v3521_v22 = vadd.f32 %v3520_v27, %v7720_v7  ;;  %5482 = vmatprep.mubr.msk.bf16.mxu1 %vm1039_vm2, %v3558_v57  ;;  %v3548_v16 = vmax.f32 %v3519_v40, 0.0  ;;  %v4099_v52 = vrot.slane %v3558_v57, 4 }
 0x5c0   :  { %v3522_v45 = vpop.f32.mrf.mxu1  ;;  %v7736_v29 = vpop.f32.mrf.mxu0  ;;  %4459 = vmatmul.mubr.bf16.vlgmr.msra.gmra.mxu1 %v3557_v51 }
 0x5c1   :  { %v3549_v38 = vmax.f32 %v3521_v22, 0.0  ;;  %v3523_v39 = vadd.f32 %v3522_v45, %v7717_v37 }
 0x5c2   :  { %v3526_v17 = vpop.f32.mrf.mxu1  ;;  %v7739_v31 = vpop.f32.mrf.mxu0 }
 0x5c3   :  { %v3559_v46 = vpack.c.bf16 %v3549_v38, %v3547_v24  ;;  %v3550_v10 = vmax.f32 %v3523_v39, 0.0  ;;  %v3527_v47 = vadd.f32 %v3526_v17, %v7720_v7 }
 0x5c4   :  { %v3528_v11 = vpop.f32.mrf.mxu1  ;;  %v7741_v33 = vpop.f32.mrf.mxu0 }
 0x5c5   :  { %v4097_v43 = vrot.slane %v3559_v46, 4  ;;  %v3560_v13 = vpack.c.bf16 %v3550_v10, %v3548_v16  ;;  %v3529_v49 = vadd.f32 %v3528_v11, %v7717_v37  ;;  %v3551_v60 = vmax.f32 %v3527_v47, 0.0 }
 0x5c6   :  { %v3530_v53 = vpop.f32.mrf.mxu1  ;;  %v7744_v58 = vpop.f32.mrf.mxu0 }
 0x5c7   :  { %v4100_v35 = vrot.slane %v3560_v13, 4  ;;  %v3531_v61 = vadd.f32 %v3530_v53, %v7720_v7  ;;  %5483 = vmatprep.mubr.msk.bf16.mxu1 %vm1039_vm2, %v3560_v13  ;;  %v7750_v62 = vsel %vm821_vm3, %v4096_v15, %v4097_v43  ;;  %v3552_v3 = vmax.f32 %v3529_v49, 0.0 }
 0x5c8   :  { %v3532_v34 = vpop.f32.mrf.mxu1  ;;  %v7752_v55 = vpop.f32.mrf.mxu0  ;;  %4467 = vmatmul.mubr.bf16.gmra.mxu1 %v3559_v46 }
 0x5c9   :  { %v3553_v23 = vmax.f32 %v3531_v61, 0.0  ;;  %v3533_v12 = vadd.f32 %v3532_v34, %v7717_v37  ;;  %v7756_v63 = vsel %vm821_vm3, %v4099_v52, %v4100_v35 }
 0x5ca   :  { %v3536_v0 = vpop.f32.mrf.mxu1  ;;  %v7758_v21 = vpop.f32.mrf.mxu0 }
 0x5cb   :  { %v3561_v50 = vpack.c.bf16 %v3553_v23, %v3551_v60  ;;  %v3554_v48 = vmax.f32 %v3533_v12, 0.0  ;;  %v3537_v4 = vadd.f32 %v3536_v0, %v7720_v7 }
 0x5cc   :  { %v3538_v59 = vpop.f32.mrf.mxu1  ;;  %v7761_v5 = vpop.f32.mrf.mxu0 }
 0x5cd   :  { %v4102_v6 = vrot.slane %v3561_v50, 4  ;;  %v3562_v32 = vpack.c.bf16 %v3554_v48, %v3552_v3  ;;  %v3555_v9 = vmax.f32 %v3537_v4, 0.0  ;;  %v3539_v18 = vadd.f32 %v3538_v59, %v7717_v37  ;;  %v5952_v4 = vld [vmem:[%s7927_s12 + $0x110] sm:$0xff]  }
 0x5ce   :  { %v3540_v44 = vpop.f32.mrf.mxu1  ;;  %v7764_v54 = vpop.f32.mrf.mxu0 }
 0x5cf   :  { %v4104_v8 = vrot.slane %v3562_v32, 4  ;;  %v3563_v30 = vpack.c.bf16 %v3555_v9, %v3555_v9  ;;  %v3556_v2 = vmax.f32 %v3539_v18, 0.0  ;;  %5484 = vmatprep.mubr.msk.bf16.mxu1 %vm1039_vm2, %v3562_v32  ;;  %v7768_v14 = vsel %vm821_vm3, %v4097_v43, %v4102_v6 }
 0x5d0   :  { %v3541_v56 = vpop.f32.mrf.mxu1  ;;  %v7770_v42 = vpop.f32.mrf.mxu0  ;;  %4475 = vmatmul.mubr.bf16.gmra.mxu1 %v3561_v50 }
 0x5d1   :  { %v4106_v19 = vrot.slane %v3563_v30, 4  ;;  %v3564_v41 = vpack.c.bf16 %v3556_v2, %v3556_v2  ;;  %v7773_v36 = vsel %vm821_vm3, %v4100_v35, %v4104_v8  ;;  %v5953_v56 = vld [vmem:[%s7927_s12 + $0x108] sm:$0xff]  }
 0x5d2   :  { %v7775_v57 = vpop.f32.mrf.mxu0 }
 0x5d3   :  { %v4108_v28 = vrot.slane %v3564_v41, 4  ;;  %5485 = vmatprep.mubr.msk.bf16.mxu1 %vm1039_vm2, %v3564_v41  ;;  %v7779_v51 = vsel %vm821_vm3, %v4102_v6, %v4106_v19 }
 0x5d4   :  { %v7781_v27 = vpop.f32.mrf.mxu0 }
 0x5d5   :  { %v7784_v40 = vsel %vm821_vm3, %v4104_v8, %v4108_v28 }
 0x5d6   :  { %v3838_v22 = vpop.f32.mrf.mxu0 }
 0x5d8   :  { %4483 = vmatmul.mubr.bf16.gmra.mxu1 %v3563_v30  ;;  %v3839_v45 = vpop.f32.mrf.mxu0 }
 0x5ea   :  { %v4015_v24 = vpop.f32.mrf.mxu1 }
 0x5eb   :  { %v4016_v17 = vadd.f32 %v4015_v24, %v7726_v25  ;;  %v5954_v24 = vld [vmem:[%s7927_s12 + $0x100] sm:$0xff]  }
 0x5ec   :  { %v4017_v38 = vpop.f32.mrf.mxu1 }
 0x5ed   :  { %v4018_v39 = vadd.f32 %v4017_v38, %v7728_v20  ;;  %v4052_v13 = vadd.f32 %v4016_v17, %v7720_v7 }
 0x5ee   :  { %v4019_v16 = vpop.f32.mrf.mxu1 }
 0x5ef   :  { %v4020_v46 = vadd.f32 %v4019_v16, %v7731_v26  ;;  %v4053_v11 = vadd.f32 %v4018_v39, %v7717_v37  ;;  %v4066_v61 = vmax.f32 %v4052_v13, 0.0  ;;  %v5955_v13 = vld [vmem:[%s7927_s12 + $0xf8] sm:$0xff]  }
 0x5f0   :  { %v4021_v10 = vpop.f32.mrf.mxu1 }
 0x5f1   :  { %v4054_v15 = vadd.f32 %v4020_v46, %v7720_v7  ;;  %v4022_v43 = vadd.f32 %v4021_v10, %v7736_v29  ;;  %v4067_v20 = vmax.f32 %v4053_v11, 0.0  ;;  %v5951_v29 = vld [vmem:[%s7927_s12 + $0x118] sm:$0xff]  }
 0x5f2   :  { %v4025_v47 = vpop.f32.mrf.mxu1 }
 0x5f3   :  { %v4055_v52 = vadd.f32 %v4022_v43, %v7717_v37  ;;  %v4068_v53 = vmax.f32 %v4054_v15, 0.0  ;;  %v4026_v26 = vadd.f32 %v4025_v47, %v7739_v31 }
 0x5f4   :  { %v4027_v35 = vpop.f32.mrf.mxu1 }
 0x5f5   :  { %v4069_v49 = vmax.f32 %v4055_v52, 0.0  ;;  %v4028_v25 = vadd.f32 %v4027_v35, %v7741_v33  ;;  %v4080_v12 = vpack.c.bf16 %v4068_v53, %v4066_v61  ;;  %v4056_v31 = vadd.f32 %v4026_v26, %v7720_v7  ;;  %v5960_v61 = vld [vmem:[%s7927_s12 + $0x140] sm:$0xff]   ;;  %v5962_v26 = vld [vmem:[%s7927_s12 + $0x130] sm:$0xff]  }
 0x5f6   :  { %v4029_v34 = vpop.f32.mrf.mxu1 }
 0x5f7   :  { %v4081_v60 = vpack.c.bf16 %v4069_v49, %v4067_v20  ;;  %v4030_v23 = vadd.f32 %v4029_v34, %v7744_v58  ;;  %v4057_v3 = vadd.f32 %v4028_v25, %v7717_v37  ;;  %v4070_v18 = vmax.f32 %v4056_v31, 0.0  ;;  %v5958_v49 = vld [vmem:[%s7927_s12 + $0xe0] sm:$0xff]   ;;  %v5959_v25 = vld [vmem:[%s7927_s12 + $0x148] sm:$0xff]  }
 0x5f8   :  { %v4031_v0 = vpop.f32.mrf.mxu1  ;;  %v5963_v34 = vld [vmem:[%s7927_s12 + $0x128] sm:$0xff]  }
 0x5f9   :  { %v4058_v50 = vadd.f32 %v4030_v23, %v7720_v7  ;;  %v4032_v48 = vadd.f32 %v4031_v0, %v7752_v55  ;;  %5464 = vmatprep.mubr.msk.bf16.mxu0 %vm1039_vm2, %v4081_v60  ;;  %v4071_v32 = vmax.f32 %v4057_v3, 0.0  ;;  %v5964_v60 = vld [vmem:[%s7927_s12 + $0x120] sm:$0xff]  }
 0x5fa   :  { %v4035_v33 = vpop.f32.mrf.mxu1  ;;  %4299 = vmatmul.mubr.bf16.vlgmr.msra.gmra.mxu0 %v4080_v12 }
 0x5fb   :  { %v4059_v58 = vadd.f32 %v4032_v48, %v7717_v37  ;;  %4613 = vmatpush1.bf16.msra.mxu0 %v5951_v29  ;;  %v4072_v59 = vmax.f32 %v4058_v50, 0.0  ;;  %v4036_v44 = vadd.f32 %v4035_v33, %v7758_v21 }
 0x5fc   :  { %v4037_v6 = vpop.f32.mrf.mxu1  ;;  %4614 = vmatprep.subr.bf16.mxu0 %v5995_v1 }
 0x5fd   :  { %v4073_v9 = vmax.f32 %v4059_v58, 0.0  ;;  %v4038_v55 = vadd.f32 %v4037_v6, %v7761_v5  ;;  %v4082_v19 = vpack.c.bf16 %v4072_v59, %v4070_v18  ;;  %v4060_v21 = vadd.f32 %v4036_v44, %v7720_v7 }
 0x5fe   :  { %v4039_v8 = vpop.f32.mrf.mxu1 }
 0x5ff   :  { %v4083_v30 = vpack.c.bf16 %v4073_v9, %v4071_v32  ;;  %v4040_v2 = vadd.f32 %v4039_v8, %v7764_v54  ;;  %4615 = vmatpush1.bf16.msra.mxu0 %v5952_v4  ;;  %v4061_v28 = vadd.f32 %v4038_v55, %v7717_v37  ;;  %v4074_v10 = vmax.f32 %v4060_v21, 0.0 }
 0x600   :  { %v4041_v41 = vpop.f32.mrf.mxu1  ;;  %4616 = vmatprep.subr.bf16.mxu0 %v5995_v1 }
 0x601   :  { %v4062_v5 = vadd.f32 %v4040_v2, %v7720_v7  ;;  %v4042_v22 = vadd.f32 %v4041_v41, %v7770_v42  ;;  %5465 = vmatprep.mubr.msk.bf16.mxu0 %vm1039_vm2, %v4083_v30  ;;  %v4075_v42 = vmax.f32 %v4061_v28, 0.0 }
 0x602   :  { %v4045_v54 = vpop.f32.mrf.mxu1  ;;  %4307 = vmatmul.mubr.bf16.gmra.mxu0 %v4082_v19 }
 0x603   :  { %v4063_v45 = vadd.f32 %v4042_v22, %v7717_v37  ;;  %4617 = vmatpush1.bf16.msra.mxu0 %v5953_v56  ;;  %v4076_v38 = vmax.f32 %v4062_v5, 0.0  ;;  %v4046_v39 = vadd.f32 %v4045_v54, %v7775_v57  ;;  %v5531_v54 = vld [vmem:[%s7930_s13] ss:$0 sm:$0xff] }
 0x604   :  { %v4047_v17 = vpop.f32.mrf.mxu1  ;;  %4618 = vmatprep.subr.bf16.mxu0 %v5995_v1 }
 0x605   :  { %v4077_v16 = vmax.f32 %v4063_v45, 0.0  ;;  %v4048_v46 = vadd.f32 %v4047_v17, %v7781_v27  ;;  %v4084_v47 = vpack.c.bf16 %v4076_v38, %v4074_v10  ;;  %v4064_v57 = vadd.f32 %v4046_v39, %v7720_v7  ;;  %v5957_v7 = vld [vmem:[%s7927_s12 + $0xe8] sm:$0xff]  }
 0x606   :  { %v4049_v11 = vpop.f32.mrf.mxu1 }
 0x607   :  { %v4085_v15 = vpack.c.bf16 %v4077_v16, %v4075_v42  ;;  %v4065_v43 = vadd.f32 %v4048_v46, %v7717_v37  ;;  %4619 = vmatpush1.bf16.msra.mxu0 %v5954_v24  ;;  %v5956_v37 = vld [vmem:[%s7927_s12 + $0xf0] sm:$0xff]   ;;  %v4078_v35 = vmax.f32 %v4064_v57, 0.0 }
 0x608   :  { %v4050_v52 = vpop.f32.mrf.mxu1  ;;  %4620 = vmatprep.subr.bf16.mxu0 %v5995_v1 }
 0x609   :  { %v4079_v53 = vmax.f32 %v4065_v43, 0.0  ;;  %5466 = vmatprep.mubr.msk.bf16.mxu0 %vm1039_vm2, %v4085_v15  ;;  %v4086_v20 = vpack.c.bf16 %v4078_v35, %v4078_v35 }
 0x60a   :  { %4315 = vmatmul.mubr.bf16.gmra.mxu0 %v4084_v47 }
 0x60b   :  { %v4087_v27 = vpack.c.bf16 %v4079_v53, %v4079_v53  ;;  %4621 = vmatpush1.bf16.msra.mxu0 %v5955_v13 }
 0x60c   :  { %4622 = vmatprep.subr.bf16.mxu0 %v5995_v1 }
 0x60d   :  { %5467 = vmatprep.mubr.msk.bf16.mxu0 %vm1039_vm2, %v4087_v27 }
 0x60f   :  { %4623 = vmatpush1.bf16.msra.mxu0 %v5956_v37 }
 0x610   :  { %4624 = vmatprep.subr.bf16.mxu0 %v5995_v1 }
 0x612   :  { %4323 = vmatmul.mubr.bf16.gmra.mxu0 %v4086_v20 }
 0x613   :  { %4625 = vmatpush1.bf16.msra.mxu0 %v5957_v7  ;;  %5528 = vmatprep.mubr.msk.bf16.mxu0 %vm1039_vm2, %v7756_v63  ;;  %v5961_v63 = vld [vmem:[%s7927_s12 + $0x138] sm:$0xff]  }
 0x614   :  { %4626 = vmatprep.subr.bf16.mxu0 %v5995_v1 }
 0x617   :  { %4627 = vmatpush1.bf16.msra.mxu0 %v5958_v49 }
 0x618   :  { %4632 = vmatprep.subr.bf16.mxu0 %v5995_v1 }
 0x61b   :  { %4633 = vmatpush2.bf16.msra.mxu0 %v5959_v25 }
 0x61c   :  { %4634 = vmatprep.subr.bf16.mxu0 %v5995_v1 }
 0x61f   :  { %4635 = vmatpush2.bf16.msra.mxu0 %v5960_v61 }
 0x620   :  { %4636 = vmatprep.subr.bf16.mxu0 %v5995_v1 }
 0x623   :  { %4637 = vmatpush2.bf16.msra.mxu0 %v5961_v63 }
 0x624   :  { %4638 = vmatprep.subr.bf16.mxu0 %v5995_v1 }
 0x627   :  { %4639 = vmatpush2.bf16.msra.mxu0 %v5962_v26 }
 0x628   :  { %4640 = vmatprep.subr.bf16.mxu0 %v5995_v1 }
 0x62b   :  { %4641 = vmatpush2.bf16.msra.mxu0 %v5963_v34 }
 0x62c   :  { %4642 = vmatprep.subr.bf16.mxu0 %v5995_v1 }
 0x62f   :  { %4643 = vmatpush2.bf16.msra.mxu0 %v5964_v60 }
 0x632   :  { %4645 = vmatmul.mubr.bf16.vlgmr.msra.gmra.mxu0 %v7750_v62 }
 0x633   :  { %5529 = vmatprep.mubr.msk.bf16.mxu0 %vm1039_vm2, %v7773_v36 }
 0x63a   :  { %4653 = vmatmul.mubr.bf16.gmra.mxu0 %v7768_v14 }
 0x63b   :  { %5530 = vmatprep.mubr.msk.bf16.mxu0 %vm1039_vm2, %v7784_v40 }
 0x642   :  { %4661 = vmatmul.mubr.bf16.gmra.mxu0 %v7779_v51 }
 0x643   :  { %4668 = vmatprep.mubr.bf16.mxu0 %v5995_v1 }
 0x64a   :  { %4669 = vmatmul.mubr.bf16.gmra.mxu0 %v5995_v1 }
 0x680   :  { %v4460_v23 = vpop.f32.mrf.mxu1 }
 0x682   :  { %v4462_v29 = vpop.f32.mrf.mxu1 }
 0x684   :  { %v4463_v12 = vpop.f32.mrf.mxu1 }
 0x686   :  { %v4465_v0 = vpop.f32.mrf.mxu1 }
 0x688   :  { %v4468_v3 = vpop.f32.mrf.mxu1 }
 0x68a   :  { %v4470_v62 = vpop.f32.mrf.mxu1 }
 0x68c   :  { %v4471_v50 = vpop.f32.mrf.mxu1 }
 0x68e   :  { %v4473_v48 = vpop.f32.mrf.mxu1 }
 0x690   :  { %v4476_v36 = vpop.f32.mrf.mxu1 }
 0x692   :  { %v4478_v31 = vpop.f32.mrf.mxu1 }
 0x694   :  { %v4479_v14 = vpop.f32.mrf.mxu1 }
 0x696   :  { %v4481_v33 = vpop.f32.mrf.mxu1 }
 0x698   :  { %v4484_v58 = vpop.f32.mrf.mxu1 }
 0x69a   :  { %v4486_v40 = vpop.f32.mrf.mxu1 }
 0x69c   :  { %v4487_v4 = vpop.f32.mrf.mxu1 }
 0x69e   :  { %v4488_v51 = vpop.f32.mrf.mxu1 }
 0x6ba   :  { %v4300_v59 = vpop.f32.mrf.mxu0 }
 0x6bb   :  { %v4461_v22 = vadd.f32 %v4460_v23, %v4300_v59 }
 0x6bc   :  { %v4302_v6 = vpop.f32.mrf.mxu0 }
 0x6be   :  { %v4303_v32 = vpop.f32.mrf.mxu0 }
 0x6bf   :  { %v4464_v38 = vadd.f32 %v4463_v12, %v4303_v32 }
 0x6c0   :  { %v4305_v1 = vpop.f32.mrf.mxu0 }
 0x6c2   :  { %v4308_v9 = vpop.f32.mrf.mxu0 }
 0x6c3   :  { %v4469_v10 = vadd.f32 %v4468_v3, %v4308_v9 }
 0x6c4   :  { %v4310_v55 = vpop.f32.mrf.mxu0 }
 0x6c6   :  { %v4311_v18 = vpop.f32.mrf.mxu0 }
 0x6c7   :  { %v4472_v57 = vadd.f32 %v4471_v50, %v4311_v18 }
 0x6c8   :  { %v4313_v44 = vpop.f32.mrf.mxu0 }
 0x6ca   :  { %v4316_v8 = vpop.f32.mrf.mxu0 }
 0x6cb   :  { %v4477_v7 = vadd.f32 %v4476_v36, %v4316_v8 }
 0x6cc   :  { %v4318_v30 = vpop.f32.mrf.mxu0 }
 0x6ce   :  { %v4319_v2 = vpop.f32.mrf.mxu0 }
 0x6cf   :  { %v4480_v26 = vadd.f32 %v4479_v14, %v4319_v2 }
 0x6d0   :  { %v4321_v56 = vpop.f32.mrf.mxu0 }
 0x6d2   :  { %v4324_v19 = vpop.f32.mrf.mxu0 }
 0x6d3   :  { %v4485_v62 = vadd.f32 %v4484_v58, %v4324_v19 }
 0x6d4   :  { %v4326_v41 = vpop.f32.mrf.mxu0 }
 0x6d6   :  { %v4327_v28 = vpop.f32.mrf.mxu0 }
 0x6d8   :  { %v4328_v5 = vpop.f32.mrf.mxu0 }
 0x6f2   :  { %v4646_v21 = vpop.f32.mrf.mxu0 }
 0x6f3   :  { %v4676_v45 = vadd.f32 %v4646_v21, %v4461_v22 }
 0x6f4   :  { %v4648_v24 = vpop.f32.mrf.mxu0 }
 0x6f5   :  { %v4690_v39 = vadd.f32 %v5531_v54, %v4676_v45 }
 0x6f6   :  { %v4649_v17 = vpop.f32.mrf.mxu0 }
 0x6f7   :  { %v5532_v42 = vmul.f32 -1.442695, %v4690_v39  ;;  %v4677_v16 = vadd.f32 %v4649_v17, %v4464_v38 }
 0x6f8   :  { %v4651_v46 = vpop.f32.mrf.mxu0 }
 0x6f9   :  { %5967 = vpow2.f32 %v5532_v42  ;;  %v4691_v11 = vadd.f32 %v5531_v54, %v4677_v16 }
 0x6fa   :  { %v4654_v15 = vpop.f32.mrf.mxu0 }
 0x6fb   :  { %v5533_v43 = vmul.f32 -1.442695, %v4691_v11  ;;  %v4678_v13 = vadd.f32 %v4654_v15, %v4469_v10 }
 0x6fc   :  { %v4656_v47 = vpop.f32.mrf.mxu0 }
 0x6fd   :  { %5969 = vpow2.f32 %v5533_v43  ;;  %v4692_v52 = vadd.f32 %v5531_v54, %v4678_v13 }
 0x6fe   :  { %v4657_v53 = vpop.f32.mrf.mxu0 }
 0x6ff   :  { %v5534_v27 = vmul.f32 -1.442695, %v4692_v52  ;;  %v4679_v37 = vadd.f32 %v4657_v53, %v4472_v57 }
 0x700   :  { %v4659_v35 = vpop.f32.mrf.mxu0 }
 0x701   :  { %5971 = vpow2.f32 %v5534_v27  ;;  %v4693_v20 = vadd.f32 %v5531_v54, %v4679_v37 }
 0x702   :  { %v4662_v49 = vpop.f32.mrf.mxu0 }
 0x703   :  { %v5535_v25 = vmul.f32 -1.442695, %v4693_v20  ;;  %v4680_v61 = vadd.f32 %v4662_v49, %v4477_v7 }
 0x704   :  { %v4664_v63 = vpop.f32.mrf.mxu0 }
 0x705   :  { %5973 = vpow2.f32 %v5535_v25  ;;  %v4694_v34 = vadd.f32 %v5531_v54, %v4680_v61 }
 0x706   :  { %v5968_v60 = vpop.eup %5967  ;;  %v4665_v23 = vpop.f32.mrf.mxu0 }
 0x707   :  { %v4718_v29 = vadd.f32 1.0, %v5968_v60  ;;  %v5536_v12 = vmul.f32 -1.442695, %v4694_v34  ;;  %v4681_v0 = vadd.f32 %v4665_v23, %v4480_v26 }
 0x708   :  { %v4667_v3 = vpop.f32.mrf.mxu0 }
 0x709   :  { %5975 = vrcp.f32 %v4718_v29  ;;  %v4695_v50 = vadd.f32 %v5531_v54, %v4681_v0 }
 0x70a   :  { %v5970_v48 = vpop.eup %5969  ;;  %5977 = vpow2.f32 %v5536_v12  ;;  %v4670_v36 = vpop.f32.mrf.mxu0 }
 0x70b   :  { %v4719_v31 = vadd.f32 1.0, %v5970_v48  ;;  %v5537_v33 = vmul.f32 -1.442695, %v4695_v50  ;;  %v4682_v40 = vadd.f32 %v4670_v36, %v4485_v62 }
 0x70c   :  { %v4672_v4 = vpop.f32.mrf.mxu0 }
 0x70d   :  { %5979 = vrcp.f32 %v4719_v31  ;;  %v4696_v14 = vadd.f32 %v5531_v54, %v4682_v40 }
 0x70e   :  { %v5972_v51 = vpop.eup %5971  ;;  %5981 = vpow2.f32 %v5537_v33  ;;  %v4673_v59 = vpop.f32.mrf.mxu0 }
 0x70f   :  { %v4720_v6 = vadd.f32 1.0, %v5972_v51  ;;  %v5538_v32 = vmul.f32 -1.442695, %v4696_v14 }
 0x710   :  { %v4674_v1 = vpop.f32.mrf.mxu0 }
 0x711   :  { %5983 = vrcp.f32 %v4720_v6 }
 0x712   :  { %v5974_v9 = vpop.eup %5973  ;;  %5985 = vpow2.f32 %v5538_v32 }
 0x713   :  { %v4721_v58 = vadd.f32 1.0, %v5974_v9 }
 0x715   :  { %5987 = vrcp.f32 %v4721_v58 }
 0x716   :  { %v5976_v55 = vpop.eup %5975 }
 0x717   :  { %v5978_v18 = vpop.eup %5977  ;;  %4740 = vst.msk [vmem:[%s7931_s14] sm:$0xff] %vm4739_vm6, %v5976_v55 }
 0x718   :  { %v4722_v44 = vadd.f32 1.0, %v5978_v18 }
 0x71a   :  { %v5980_v8 = vpop.eup %5979  ;;  %5989 = vrcp.f32 %v4722_v44 }
 0x71b   :  { %v5982_v30 = vpop.eup %5981  ;;  %4741 = vst.msk [vmem:[%s7931_s14 + $0x8] sm:$0xff] %vm4739_vm6, %v5980_v8 }
 0x71c   :  { %v4723_v2 = vadd.f32 1.0, %v5982_v30 }
 0x71e   :  { %v5984_v56 = vpop.eup %5983  ;;  %5991 = vrcp.f32 %v4723_v2 }
 0x71f   :  { %v5986_v19 = vpop.eup %5985  ;;  %4742 = vst.msk [vmem:[%s7931_s14 + $0x10] sm:$0xff] %vm4739_vm6, %v5984_v56 }
 0x720   :  { %v4724_v41 = vadd.f32 1.0, %v5986_v19 }
 0x722   :  { %v5988_v28 = vpop.eup %5987  ;;  %5993 = vrcp.f32 %v4724_v41 }
 0x723   :  { %4743 = vst.msk [vmem:[%s7931_s14 + $0x18] sm:$0xff] %vm4739_vm6, %v5988_v28 }
 0x727   :  { %v5990_v5 = vpop.eup %5989 }
 0x728   :  { %4744 = vst.msk [vmem:[%s7931_s14 + $0x20] sm:$0xff] %vm4739_vm6, %v5990_v5 }
 0x72b   :  { %v5992_v22 = vpop.eup %5991 }
 0x72c   :  { %4745 = vst.msk [vmem:[%s7931_s14 + $0x28] sm:$0xff] %vm4739_vm6, %v5992_v22 }
 0x72f   :  { %v5994_v21 = vpop.eup %5993 }
 0x730   :  { %4746 = vst.msk [vmem:[%s7931_s14 + $0x30] sm:$0xff] %vm4739_vm6, %v5994_v21 }

</bundles_post_ra>
